<compile_context>
chip_gen: v5e
topology: v5e:2x2
jax: 0.10.0
libtpu: 0.0.40
codegen_flags: <defaults>
</compile_context>

<pallas_src>
import math

import jax
import jax.numpy as jnp
from jax.experimental import pallas as pl
from jax.experimental.pallas import tpu as pltpu

LAYER_NORM_EPS = 1e-12
LANE = 128  # lane-padded decoder width


def _gelu(x):
    # exact erf-based gelu, matching the PyTorch reference implementation
    return x * 0.5 * (1.0 + jax.lax.erf(x / math.sqrt(2.0)))


def _round_up(x, m):
    return ((x + m - 1) // m) * m


def _pad_cols(x, width):
    pad = width - x.shape[-1]
    return jnp.pad(x, ((0, 0), (0, pad))) if pad > 0 else x


# ----------------------------- fused kernel ---------------------------------


def heads_kernel(seq_ref, child_ref, head_ref,
                 pos_wd_ref, pos_vecs_ref, pos_wdec_ref,
                 dep_wc_ref, dep_wh_ref, dep_vecs_ref, dep_wdec_ref,
                 dec_bias_ref,
                 tag_ref, dep_ref):
    f32 = jnp.float32

    # ---------------- pos head: dense(H->H) -> gelu -> LN -> decoder -------
    x = seq_ref[...].astype(f32)
    b_dense = pos_vecs_ref[0:1, :]
    gamma = pos_vecs_ref[1:2, :]
    beta = pos_vecs_ref[2:3, :]

    h = jnp.dot(x, pos_wd_ref[...], preferred_element_type=f32) + b_dense
    h = _gelu(h)
    mean = jnp.mean(h, axis=-1, keepdims=True)
    var = jnp.mean(h * h, axis=-1, keepdims=True) - mean * mean
    hn = (h - mean) * jax.lax.rsqrt(var + LAYER_NORM_EPS) * gamma + beta

    tag = jnp.dot(hn, pos_wdec_ref[...], preferred_element_type=f32)
    tag_ref[...] = (tag + dec_bias_ref[0:1, :]).astype(tag_ref.dtype)

    # ---------------- dep head: two H->H/3 transforms -> LN -> decoder -----
    c_in = child_ref[...].astype(f32)
    h_in = head_ref[...].astype(f32)
    bc = dep_vecs_ref[0:1, :]
    bh = dep_vecs_ref[1:2, :]

    c = _gelu(jnp.dot(c_in, dep_wc_ref[...], preferred_element_type=f32) + bc)
    hd = _gelu(jnp.dot(h_in, dep_wh_ref[...], preferred_element_type=f32) + bh)
    ch = c * hd

    # LayerNorm over the (virtual) concat [c, hd, c*hd] without materializing it.
    h_full = 3 * c.shape[-1]
    s1 = (jnp.sum(c, axis=-1, keepdims=True)
          + jnp.sum(hd, axis=-1, keepdims=True)
          + jnp.sum(ch, axis=-1, keepdims=True))
    s2 = (jnp.sum(c * c, axis=-1, keepdims=True)
          + jnp.sum(hd * hd, axis=-1, keepdims=True)
          + jnp.sum(ch * ch, axis=-1, keepdims=True))
    mean_d = s1 / h_full
    var_d = s2 / h_full - mean_d * mean_d
    inv = jax.lax.rsqrt(var_d + LAYER_NORM_EPS)

    n0 = (c - mean_d) * inv * dep_vecs_ref[2:3, :] + dep_vecs_ref[5:6, :]
    n1 = (hd - mean_d) * inv * dep_vecs_ref[3:4, :] + dep_vecs_ref[6:7, :]
    n2 = (ch - mean_d) * inv * dep_vecs_ref[4:5, :] + dep_vecs_ref[7:8, :]

    dep = (jnp.dot(n0, dep_wdec_ref[0], preferred_element_type=f32)
           + jnp.dot(n1, dep_wdec_ref[1], preferred_element_type=f32)
           + jnp.dot(n2, dep_wdec_ref[2], preferred_element_type=f32))
    dep_ref[...] = (dep + dec_bias_ref[1:2, :]).astype(dep_ref.dtype)


# ----------------------------- wrapper ---------------------------------------


def depbert_pretraining_heads(sequence_output, child_output, head_output,
                              params, *, tile=256):
    """Returns (tag_prediction_scores [B,S,83], dep_relationship_scores [B,S,47])."""
    B, S, H = sequence_output.shape
    assert H % 3 == 0
    h3 = H // 3
    N = B * S

    # Effective tile: multiple of 8, at most half the (rounded-up) token count
    # so the grid has >=2 steps (lets v7x shard across its two TensorCores).
    tile = max(8, min(_round_up(tile, 8), _round_up(pl.cdiv(N, 2), 8)))
    n_pad = _round_up(N, tile)

    def flat_pad(x):
        x = x.reshape(N, H)
        if n_pad != N:
            x = jnp.pad(x, ((0, n_pad - N), (0, 0)))
        return x

    seq = flat_pad(sequence_output)
    child = flat_pad(child_output)
    head = flat_pad(head_output)

    # ---- packed parameter slabs (fewer, denser DMAs) ----
    pos_vecs = jnp.concatenate(
        [params["pos_b_dense"], params["pos_gamma"], params["pos_beta"]], axis=0)  # (3, H)
    dep_gamma3 = params["dep_gamma"].reshape(3, h3)
    dep_beta3 = params["dep_beta"].reshape(3, h3)
    dep_vecs = jnp.concatenate(
        [params["dep_bc"], params["dep_bh"], dep_gamma3, dep_beta3], axis=0)       # (8, h3)

    pos_w_dec = _pad_cols(params["pos_w_dec"], LANE)                 # (H, 128)
    dep_w_dec = _pad_cols(params["dep_w_dec"], LANE).reshape(3, h3, LANE)
    dec_bias = jnp.concatenate(
        [_pad_cols(params["pos_dec_bias"], LANE),
         _pad_cols(params["dep_dec_bias"], LANE)], axis=0)           # (2, 128)

    tok = lambda i: (i, 0)
    full2 = lambda i: (0, 0)
    full3 = lambda i: (0, 0, 0)

    tag_pad, dep_pad = pl.pallas_call(
        heads_kernel,
        out_shape=(jax.ShapeDtypeStruct((n_pad, LANE), jnp.float32),
                   jax.ShapeDtypeStruct((n_pad, LANE), jnp.float32)),
        grid=(n_pad // tile,),
        in_specs=[
            pl.BlockSpec((tile, H), tok),       # sequence_output tokens
            pl.BlockSpec((tile, H), tok),       # child_output tokens
            pl.BlockSpec((tile, H), tok),       # head_output tokens
            pl.BlockSpec((H, H), full2),        # pos dense weight
            pl.BlockSpec((3, H), full2),        # pos [b_dense; gamma; beta]
            pl.BlockSpec((H, LANE), full2),     # pos decoder weight (lane-padded)
            pl.BlockSpec((H, h3), full2),       # dep child_transform weight
            pl.BlockSpec((H, h3), full2),       # dep head_transform weight
            pl.BlockSpec((8, h3), full2),       # dep [bc; bh; gamma x3; beta x3]
            pl.BlockSpec((3, h3, LANE), full3), # dep decoder weight, split x3
            pl.BlockSpec((2, LANE), full2),     # [pos dec bias; dep dec bias]
        ],
        out_specs=(pl.BlockSpec((tile, LANE), tok),
                   pl.BlockSpec((tile, LANE), tok)),
        compiler_params=pltpu.CompilerParams(
            dimension_semantics=("parallel",),
            vmem_limit_bytes=48 * 1024 * 1024),
    )(seq, child, head,
      params["pos_w_dense"], pos_vecs, pos_w_dec,
      params["dep_wc"], params["dep_wh"], dep_vecs, dep_w_dec,
      dec_bias)

    tag = tag_pad[:N, :83].reshape(B, S, 83)
    dep = dep_pad[:N, :47].reshape(B, S, 47)
    return tag, dep


# ------------------------- pure-JAX reference --------------------------------


def reference(sequence_output, child_output, head_output, p):
    def ln(x, g, b):
        m = jnp.mean(x, -1, keepdims=True)
        v = jnp.mean((x - m) ** 2, -1, keepdims=True)
        return (x - m) / jnp.sqrt(v + LAYER_NORM_EPS) * g + b

    # pos head
    h = _gelu(sequence_output @ p["pos_w_dense"] + p["pos_b_dense"][0])
    h = ln(h, p["pos_gamma"][0], p["pos_beta"][0])
    tag = h @ p["pos_w_dec"] + p["pos_dec_bias"][0]

    # dep head
    c = _gelu(child_output @ p["dep_wc"] + p["dep_bc"][0])
    hd = _gelu(head_output @ p["dep_wh"] + p["dep_bh"][0])
    cat = jnp.concatenate([c, hd, c * hd], axis=-1)
    cat = ln(cat, p["dep_gamma"][0], p["dep_beta"][0])
    dep = cat @ p["dep_w_dec"] + p["dep_dec_bias"][0]
    return tag, dep


# ------------------------------ main ------------------------------------------

if __name__ == "__main__":
    # hidden_size must be divisible by 3 (module requirement).  S=100 makes
    # B*S not a tile multiple, exercising the ragged/padding path.
    B, S, H = 2, 100, 96
    h3 = H // 3

    key = jax.random.PRNGKey(0)
    ks = jax.random.split(key, 12)

    params = {
        # pos head (BertPosPredictionHead)
        "pos_w_dense": jax.random.normal(ks[0], (H, H), jnp.float32) * 0.02,
        "pos_b_dense": jax.random.normal(ks[1], (1, H), jnp.float32) * 0.02,
        "pos_gamma": jnp.ones((1, H), jnp.float32),
        "pos_beta": jnp.zeros((1, H), jnp.float32),
        "pos_w_dec": jax.random.normal(ks[2], (H, 83), jnp.float32) * 0.02,
        "pos_dec_bias": jnp.zeros((1, 83), jnp.float32),   # torch.zeros(83)
        # dep head (BertDepPredictionHead)
        "dep_wc": jax.random.normal(ks[3], (H, h3), jnp.float32) * 0.02,
        "dep_bc": jax.random.normal(ks[4], (1, h3), jnp.float32) * 0.02,
        "dep_wh": jax.random.normal(ks[5], (H, h3), jnp.float32) * 0.02,
        "dep_bh": jax.random.normal(ks[6], (1, h3), jnp.float32) * 0.02,
        "dep_gamma": jnp.ones((1, H), jnp.float32),
        "dep_beta": jnp.zeros((1, H), jnp.float32),
        "dep_w_dec": jax.random.normal(ks[7], (H, 47), jnp.float32) * 0.02,
        "dep_dec_bias": jnp.zeros((1, 47), jnp.float32),   # torch.zeros(47)
    }

    sequence_output = jax.random.normal(ks[8], (B, S, H), jnp.float32)
    child_output = jax.random.normal(ks[9], (B, S, H), jnp.float32)
    head_output = jax.random.normal(ks[10], (B, S, H), jnp.float32)

    tag_scores, dep_scores = depbert_pretraining_heads(
        sequence_output, child_output, head_output, params)
    jax.block_until_ready((tag_scores, dep_scores))

    ref_tag, ref_dep = reference(sequence_output, child_output, head_output, params)
    assert tag_scores.shape == (B, S, 83) and dep_scores.shape == (B, S, 47)
    assert jnp.allclose(tag_scores, ref_tag, atol=1e-4, rtol=1e-4)
    assert jnp.allclose(dep_scores, ref_dep, atol=1e-4, rtol=1e-4)

    print("KERNEL_OK")
</pallas_src>

<mosaic_0001>
module attributes {stable_mosaic.version = 11 : i64} {
  func.func @heads_kernel(%arg0: i32, %arg1: memref<104x96xf32, #tpu.memory_space<vmem>>, %arg2: memref<104x96xf32, #tpu.memory_space<vmem>>, %arg3: memref<104x96xf32, #tpu.memory_space<vmem>>, %arg4: memref<96x96xf32, #tpu.memory_space<vmem>>, %arg5: memref<3x96xf32, #tpu.memory_space<vmem>>, %arg6: memref<96x128xf32, #tpu.memory_space<vmem>>, %arg7: memref<96x32xf32, #tpu.memory_space<vmem>>, %arg8: memref<96x32xf32, #tpu.memory_space<vmem>>, %arg9: memref<8x32xf32, #tpu.memory_space<vmem>>, %arg10: memref<3x32x128xf32, #tpu.memory_space<vmem>>, %arg11: memref<2x128xf32, #tpu.memory_space<vmem>>, %arg12: memref<104x128xf32, #tpu.memory_space<vmem>>, %arg13: memref<104x128xf32, #tpu.memory_space<vmem>>) attributes {dimension_semantics = [#tpu.dimension_semantics<parallel>], iteration_bounds = array<i64: 2>, scalar_prefetch = 0 : i64, scratch_operands = 0 : i64, tpu.core_type = #tpu.core_type<tc>, window_params = [{transform_indices = @transform_0, window_bounds = array<i64: 104, 96>}, {transform_indices = @transform_1, window_bounds = array<i64: 104, 96>}, {transform_indices = @transform_2, window_bounds = array<i64: 104, 96>}, {pipeline_mode = #tpu.pipeline_mode<synchronous>, transform_indices = @transform_3, window_bounds = array<i64: 96, 96>}, {pipeline_mode = #tpu.pipeline_mode<synchronous>, transform_indices = @transform_4, window_bounds = array<i64: 3, 96>}, {pipeline_mode = #tpu.pipeline_mode<synchronous>, transform_indices = @transform_5, window_bounds = array<i64: 96, 128>}, {pipeline_mode = #tpu.pipeline_mode<synchronous>, transform_indices = @transform_6, window_bounds = array<i64: 96, 32>}, {pipeline_mode = #tpu.pipeline_mode<synchronous>, transform_indices = @transform_7, window_bounds = array<i64: 96, 32>}, {pipeline_mode = #tpu.pipeline_mode<synchronous>, transform_indices = @transform_8, window_bounds = array<i64: 8, 32>}, {pipeline_mode = #tpu.pipeline_mode<synchronous>, transform_indices = @transform_9, window_bounds = array<i64: 3, 32, 128>}, {pipeline_mode = #tpu.pipeline_mode<synchronous>, transform_indices = @transform_10, window_bounds = array<i64: 2, 128>}, {transform_indices = @transform_11, window_bounds = array<i64: 104, 128>}, {transform_indices = @transform_12, window_bounds = array<i64: 104, 128>}]} {
    %c0 = arith.constant 0 : index
    %c0_0 = arith.constant 0 : index
    %0 = vector.load %arg1[%c0, %c0_0] : memref<104x96xf32, #tpu.memory_space<vmem>>, vector<104x96xf32>
    %c0_1 = arith.constant 0 : index
    %c0_2 = arith.constant 0 : index
    %1 = vector.load %arg5[%c0_1, %c0_2] : memref<3x96xf32, #tpu.memory_space<vmem>>, vector<1x96xf32>
    %c1 = arith.constant 1 : index
    %c0_3 = arith.constant 0 : index
    %2 = vector.load %arg5[%c1, %c0_3] : memref<3x96xf32, #tpu.memory_space<vmem>>, vector<1x96xf32>
    %c2 = arith.constant 2 : index
    %c0_4 = arith.constant 0 : index
    %3 = vector.load %arg5[%c2, %c0_4] : memref<3x96xf32, #tpu.memory_space<vmem>>, vector<1x96xf32>
    %c0_5 = arith.constant 0 : index
    %c0_6 = arith.constant 0 : index
    %4 = vector.load %arg4[%c0_5, %c0_6] : memref<96x96xf32, #tpu.memory_space<vmem>>, vector<96x96xf32>
    %cst = arith.constant dense<0.000000e+00> : vector<104x96xf32>
    %5 = tpu.matmul %0, %4, %cst {dimension_numbers = #tpu.dot_dimension_numbers<[1], [0], [0], [1], [0, 0, 1, 1], [], []>} : vector<104x96xf32>, vector<96x96xf32>, vector<104x96xf32> -> vector<104x96xf32>
    %6 = vector.broadcast %1 : vector<1x96xf32> to vector<104x96xf32>
    %7 = arith.addf %5, %6 : vector<104x96xf32>
    %cst_7 = arith.constant 5.000000e-01 : f32
    %8 = vector.broadcast %cst_7 : f32 to vector<104x96xf32>
    %9 = arith.mulf %7, %8 : vector<104x96xf32>
    %cst_8 = arith.constant 1.41421354 : f32
    %10 = vector.broadcast %cst_8 : f32 to vector<104x96xf32>
    %11 = arith.divf %7, %10 : vector<104x96xf32>
    %12 = math.erf %11 : vector<104x96xf32>
    %cst_9 = arith.constant 1.000000e+00 : f32
    %13 = vector.broadcast %cst_9 : f32 to vector<104x96xf32>
    %14 = arith.addf %13, %12 : vector<104x96xf32>
    %15 = arith.mulf %9, %14 : vector<104x96xf32>
    %cst_10 = arith.constant dense<0.000000e+00> : vector<104xf32>
    %16 = vector.multi_reduction <add>, %15, %cst_10 [1] : vector<104x96xf32> to vector<104xf32>
    %17 = vector.shape_cast %16 : vector<104xf32> to vector<104x1xf32>
    %cst_11 = arith.constant 9.600000e+01 : f32
    %18 = vector.broadcast %cst_11 : f32 to vector<104x1xf32>
    %19 = arith.divf %17, %18 : vector<104x1xf32>
    %20 = arith.mulf %15, %15 : vector<104x96xf32>
    %cst_12 = arith.constant dense<0.000000e+00> : vector<104xf32>
    %21 = vector.multi_reduction <add>, %20, %cst_12 [1] : vector<104x96xf32> to vector<104xf32>
    %22 = vector.shape_cast %21 : vector<104xf32> to vector<104x1xf32>
    %cst_13 = arith.constant 9.600000e+01 : f32
    %23 = vector.broadcast %cst_13 : f32 to vector<104x1xf32>
    %24 = arith.divf %22, %23 : vector<104x1xf32>
    %25 = arith.mulf %19, %19 : vector<104x1xf32>
    %26 = arith.subf %24, %25 : vector<104x1xf32>
    %27 = vector.broadcast %19 : vector<104x1xf32> to vector<104x96xf32>
    %28 = arith.subf %15, %27 : vector<104x96xf32>
    %cst_14 = arith.constant 9.99999996E-13 : f32
    %29 = vector.broadcast %cst_14 : f32 to vector<104x1xf32>
    %30 = arith.addf %26, %29 : vector<104x1xf32>
    %31 = math.rsqrt %30 : vector<104x1xf32>
    %32 = vector.broadcast %31 : vector<104x1xf32> to vector<104x96xf32>
    %33 = arith.mulf %28, %32 : vector<104x96xf32>
    %34 = vector.broadcast %2 : vector<1x96xf32> to vector<104x96xf32>
    %35 = arith.mulf %33, %34 : vector<104x96xf32>
    %36 = vector.broadcast %3 : vector<1x96xf32> to vector<104x96xf32>
    %37 = arith.addf %35, %36 : vector<104x96xf32>
    %c0_15 = arith.constant 0 : index
    %c0_16 = arith.constant 0 : index
    %38 = vector.load %arg6[%c0_15, %c0_16] : memref<96x128xf32, #tpu.memory_space<vmem>>, vector<96x128xf32>
    %cst_17 = arith.constant dense<0.000000e+00> : vector<104x128xf32>
    %39 = tpu.matmul %37, %38, %cst_17 {dimension_numbers = #tpu.dot_dimension_numbers<[1], [0], [0], [1], [0, 0, 1, 1], [], []>} : vector<104x96xf32>, vector<96x128xf32>, vector<104x128xf32> -> vector<104x128xf32>
    %c0_18 = arith.constant 0 : index
    %c0_19 = arith.constant 0 : index
    %40 = vector.load %arg11[%c0_18, %c0_19] : memref<2x128xf32, #tpu.memory_space<vmem>>, vector<1x128xf32>
    %41 = vector.broadcast %40 : vector<1x128xf32> to vector<104x128xf32>
    %42 = arith.addf %39, %41 : vector<104x128xf32>
    %c0_20 = arith.constant 0 : index
    %c0_21 = arith.constant 0 : index
    %43 = vector.load %arg12[%c0_20, %c0_21] : memref<104x128xf32, #tpu.memory_space<vmem>>, vector<104x128xf32>
    tpu.vector_store %arg12[%c0_20, %c0_21], %42 {strides = array<i32>} : memref<104x128xf32, #tpu.memory_space<vmem>>, vector<104x128xf32>,
    %c0_22 = arith.constant 0 : index
    %c0_23 = arith.constant 0 : index
    %44 = vector.load %arg2[%c0_22, %c0_23] : memref<104x96xf32, #tpu.memory_space<vmem>>, vector<104x96xf32>
    %c0_24 = arith.constant 0 : index
    %c0_25 = arith.constant 0 : index
    %45 = vector.load %arg3[%c0_24, %c0_25] : memref<104x96xf32, #tpu.memory_space<vmem>>, vector<104x96xf32>
    %c0_26 = arith.constant 0 : index
    %c0_27 = arith.constant 0 : index
    %46 = vector.load %arg9[%c0_26, %c0_27] : memref<8x32xf32, #tpu.memory_space<vmem>>, vector<1x32xf32>
    %c1_28 = arith.constant 1 : index
    %c0_29 = arith.constant 0 : index
    %47 = vector.load %arg9[%c1_28, %c0_29] : memref<8x32xf32, #tpu.memory_space<vmem>>, vector<1x32xf32>
    %c0_30 = arith.constant 0 : index
    %c0_31 = arith.constant 0 : index
    %48 = vector.load %arg7[%c0_30, %c0_31] : memref<96x32xf32, #tpu.memory_space<vmem>>, vector<96x32xf32>
    %cst_32 = arith.constant dense<0.000000e+00> : vector<104x32xf32>
    %49 = tpu.matmul %44, %48, %cst_32 {dimension_numbers = #tpu.dot_dimension_numbers<[1], [0], [0], [1], [0, 0, 1, 1], [], []>} : vector<104x96xf32>, vector<96x32xf32>, vector<104x32xf32> -> vector<104x32xf32>
    %50 = vector.broadcast %46 : vector<1x32xf32> to vector<104x32xf32>
    %51 = arith.addf %49, %50 : vector<104x32xf32>
    %cst_33 = arith.constant 5.000000e-01 : f32
    %52 = vector.broadcast %cst_33 : f32 to vector<104x32xf32>
    %53 = arith.mulf %51, %52 : vector<104x32xf32>
    %cst_34 = arith.constant 1.41421354 : f32
    %54 = vector.broadcast %cst_34 : f32 to vector<104x32xf32>
    %55 = arith.divf %51, %54 : vector<104x32xf32>
    %56 = math.erf %55 : vector<104x32xf32>
    %cst_35 = arith.constant 1.000000e+00 : f32
    %57 = vector.broadcast %cst_35 : f32 to vector<104x32xf32>
    %58 = arith.addf %57, %56 : vector<104x32xf32>
    %59 = arith.mulf %53, %58 : vector<104x32xf32>
    %c0_36 = arith.constant 0 : index
    %c0_37 = arith.constant 0 : index
    %60 = vector.load %arg8[%c0_36, %c0_37] : memref<96x32xf32, #tpu.memory_space<vmem>>, vector<96x32xf32>
    %cst_38 = arith.constant dense<0.000000e+00> : vector<104x32xf32>
    %61 = tpu.matmul %45, %60, %cst_38 {dimension_numbers = #tpu.dot_dimension_numbers<[1], [0], [0], [1], [0, 0, 1, 1], [], []>} : vector<104x96xf32>, vector<96x32xf32>, vector<104x32xf32> -> vector<104x32xf32>
    %62 = vector.broadcast %47 : vector<1x32xf32> to vector<104x32xf32>
    %63 = arith.addf %61, %62 : vector<104x32xf32>
    %cst_39 = arith.constant 5.000000e-01 : f32
    %64 = vector.broadcast %cst_39 : f32 to vector<104x32xf32>
    %65 = arith.mulf %63, %64 : vector<104x32xf32>
    %cst_40 = arith.constant 1.41421354 : f32
    %66 = vector.broadcast %cst_40 : f32 to vector<104x32xf32>
    %67 = arith.divf %63, %66 : vector<104x32xf32>
    %68 = math.erf %67 : vector<104x32xf32>
    %cst_41 = arith.constant 1.000000e+00 : f32
    %69 = vector.broadcast %cst_41 : f32 to vector<104x32xf32>
    %70 = arith.addf %69, %68 : vector<104x32xf32>
    %71 = arith.mulf %65, %70 : vector<104x32xf32>
    %72 = arith.mulf %59, %71 : vector<104x32xf32>
    %cst_42 = arith.constant dense<0.000000e+00> : vector<104xf32>
    %73 = vector.multi_reduction <add>, %59, %cst_42 [1] : vector<104x32xf32> to vector<104xf32>
    %74 = vector.shape_cast %73 : vector<104xf32> to vector<104x1xf32>
    %cst_43 = arith.constant dense<0.000000e+00> : vector<104xf32>
    %75 = vector.multi_reduction <add>, %71, %cst_43 [1] : vector<104x32xf32> to vector<104xf32>
    %76 = vector.shape_cast %75 : vector<104xf32> to vector<104x1xf32>
    %77 = arith.addf %74, %76 : vector<104x1xf32>
    %cst_44 = arith.constant dense<0.000000e+00> : vector<104xf32>
    %78 = vector.multi_reduction <add>, %72, %cst_44 [1] : vector<104x32xf32> to vector<104xf32>
    %79 = vector.shape_cast %78 : vector<104xf32> to vector<104x1xf32>
    %80 = arith.addf %77, %79 : vector<104x1xf32>
    %81 = arith.mulf %59, %59 : vector<104x32xf32>
    %cst_45 = arith.constant dense<0.000000e+00> : vector<104xf32>
    %82 = vector.multi_reduction <add>, %81, %cst_45 [1] : vector<104x32xf32> to vector<104xf32>
    %83 = vector.shape_cast %82 : vector<104xf32> to vector<104x1xf32>
    %84 = arith.mulf %71, %71 : vector<104x32xf32>
    %cst_46 = arith.constant dense<0.000000e+00> : vector<104xf32>
    %85 = vector.multi_reduction <add>, %84, %cst_46 [1] : vector<104x32xf32> to vector<104xf32>
    %86 = vector.shape_cast %85 : vector<104xf32> to vector<104x1xf32>
    %87 = arith.addf %83, %86 : vector<104x1xf32>
    %88 = arith.mulf %72, %72 : vector<104x32xf32>
    %cst_47 = arith.constant dense<0.000000e+00> : vector<104xf32>
    %89 = vector.multi_reduction <add>, %88, %cst_47 [1] : vector<104x32xf32> to vector<104xf32>
    %90 = vector.shape_cast %89 : vector<104xf32> to vector<104x1xf32>
    %91 = arith.addf %87, %90 : vector<104x1xf32>
    %cst_48 = arith.constant 9.600000e+01 : f32
    %92 = vector.broadcast %cst_48 : f32 to vector<104x1xf32>
    %93 = arith.divf %80, %92 : vector<104x1xf32>
    %cst_49 = arith.constant 9.600000e+01 : f32
    %94 = vector.broadcast %cst_49 : f32 to vector<104x1xf32>
    %95 = arith.divf %91, %94 : vector<104x1xf32>
    %96 = arith.mulf %93, %93 : vector<104x1xf32>
    %97 = arith.subf %95, %96 : vector<104x1xf32>
    %cst_50 = arith.constant 9.99999996E-13 : f32
    %98 = vector.broadcast %cst_50 : f32 to vector<104x1xf32>
    %99 = arith.addf %97, %98 : vector<104x1xf32>
    %100 = math.rsqrt %99 : vector<104x1xf32>
    %101 = vector.broadcast %93 : vector<104x1xf32> to vector<104x32xf32>
    %102 = arith.subf %59, %101 : vector<104x32xf32>
    %103 = vector.broadcast %100 : vector<104x1xf32> to vector<104x32xf32>
    %104 = arith.mulf %102, %103 : vector<104x32xf32>
    %c2_51 = arith.constant 2 : index
    %c0_52 = arith.constant 0 : index
    %105 = vector.load %arg9[%c2_51, %c0_52] : memref<8x32xf32, #tpu.memory_space<vmem>>, vector<1x32xf32>
    %106 = vector.broadcast %105 : vector<1x32xf32> to vector<104x32xf32>
    %107 = arith.mulf %104, %106 : vector<104x32xf32>
    %c5 = arith.constant 5 : index
    %c0_53 = arith.constant 0 : index
    %108 = vector.load %arg9[%c5, %c0_53] : memref<8x32xf32, #tpu.memory_space<vmem>>, vector<1x32xf32>
    %109 = vector.broadcast %108 : vector<1x32xf32> to vector<104x32xf32>
    %110 = arith.addf %107, %109 : vector<104x32xf32>
    %111 = vector.broadcast %93 : vector<104x1xf32> to vector<104x32xf32>
    %112 = arith.subf %71, %111 : vector<104x32xf32>
    %113 = vector.broadcast %100 : vector<104x1xf32> to vector<104x32xf32>
    %114 = arith.mulf %112, %113 : vector<104x32xf32>
    %c3 = arith.constant 3 : index
    %c0_54 = arith.constant 0 : index
    %115 = vector.load %arg9[%c3, %c0_54] : memref<8x32xf32, #tpu.memory_space<vmem>>, vector<1x32xf32>
    %116 = vector.broadcast %115 : vector<1x32xf32> to vector<104x32xf32>
    %117 = arith.mulf %114, %116 : vector<104x32xf32>
    %c6 = arith.constant 6 : index
    %c0_55 = arith.constant 0 : index
    %118 = vector.load %arg9[%c6, %c0_55] : memref<8x32xf32, #tpu.memory_space<vmem>>, vector<1x32xf32>
    %119 = vector.broadcast %118 : vector<1x32xf32> to vector<104x32xf32>
    %120 = arith.addf %117, %119 : vector<104x32xf32>
    %121 = vector.broadcast %93 : vector<104x1xf32> to vector<104x32xf32>
    %122 = arith.subf %72, %121 : vector<104x32xf32>
    %123 = vector.broadcast %100 : vector<104x1xf32> to vector<104x32xf32>
    %124 = arith.mulf %122, %123 : vector<104x32xf32>
    %c4 = arith.constant 4 : index
    %c0_56 = arith.constant 0 : index
    %125 = vector.load %arg9[%c4, %c0_56] : memref<8x32xf32, #tpu.memory_space<vmem>>, vector<1x32xf32>
    %126 = vector.broadcast %125 : vector<1x32xf32> to vector<104x32xf32>
    %127 = arith.mulf %124, %126 : vector<104x32xf32>
    %c7 = arith.constant 7 : index
    %c0_57 = arith.constant 0 : index
    %128 = vector.load %arg9[%c7, %c0_57] : memref<8x32xf32, #tpu.memory_space<vmem>>, vector<1x32xf32>
    %129 = vector.broadcast %128 : vector<1x32xf32> to vector<104x32xf32>
    %130 = arith.addf %127, %129 : vector<104x32xf32>
    %c0_58 = arith.constant 0 : index
    %c0_59 = arith.constant 0 : index
    %c0_60 = arith.constant 0 : index
    %131 = vector.load %arg10[%c0_58, %c0_59, %c0_60] : memref<3x32x128xf32, #tpu.memory_space<vmem>>, vector<1x32x128xf32>
    %132 = vector.shape_cast %131 : vector<1x32x128xf32> to vector<32x128xf32>
    %cst_61 = arith.constant dense<0.000000e+00> : vector<104x128xf32>
    %133 = tpu.matmul %110, %132, %cst_61 {dimension_numbers = #tpu.dot_dimension_numbers<[1], [0], [0], [1], [0, 0, 1, 1], [], []>} : vector<104x32xf32>, vector<32x128xf32>, vector<104x128xf32> -> vector<104x128xf32>
    %c1_62 = arith.constant 1 : index
    %c0_63 = arith.constant 0 : index
    %c0_64 = arith.constant 0 : index
    %134 = vector.load %arg10[%c1_62, %c0_63, %c0_64] : memref<3x32x128xf32, #tpu.memory_space<vmem>>, vector<1x32x128xf32>
    %135 = vector.shape_cast %134 : vector<1x32x128xf32> to vector<32x128xf32>
    %cst_65 = arith.constant dense<0.000000e+00> : vector<104x128xf32>
    %136 = tpu.matmul %120, %135, %cst_65 {dimension_numbers = #tpu.dot_dimension_numbers<[1], [0], [0], [1], [0, 0, 1, 1], [], []>} : vector<104x32xf32>, vector<32x128xf32>, vector<104x128xf32> -> vector<104x128xf32>
    %137 = arith.addf %133, %136 : vector<104x128xf32>
    %c2_66 = arith.constant 2 : index
    %c0_67 = arith.constant 0 : index
    %c0_68 = arith.constant 0 : index
    %138 = vector.load %arg10[%c2_66, %c0_67, %c0_68] : memref<3x32x128xf32, #tpu.memory_space<vmem>>, vector<1x32x128xf32>
    %139 = vector.shape_cast %138 : vector<1x32x128xf32> to vector<32x128xf32>
    %cst_69 = arith.constant dense<0.000000e+00> : vector<104x128xf32>
    %140 = tpu.matmul %130, %139, %cst_69 {dimension_numbers = #tpu.dot_dimension_numbers<[1], [0], [0], [1], [0, 0, 1, 1], [], []>} : vector<104x32xf32>, vector<32x128xf32>, vector<104x128xf32> -> vector<104x128xf32>
    %141 = arith.addf %137, %140 : vector<104x128xf32>
    %c1_70 = arith.constant 1 : index
    %c0_71 = arith.constant 0 : index
    %142 = vector.load %arg11[%c1_70, %c0_71] : memref<2x128xf32, #tpu.memory_space<vmem>>, vector<1x128xf32>
    %143 = vector.broadcast %142 : vector<1x128xf32> to vector<104x128xf32>
    %144 = arith.addf %141, %143 : vector<104x128xf32>
    %c0_72 = arith.constant 0 : index
    %c0_73 = arith.constant 0 : index
    %145 = vector.load %arg13[%c0_72, %c0_73] : memref<104x128xf32, #tpu.memory_space<vmem>>, vector<104x128xf32>
    tpu.vector_store %arg13[%c0_72, %c0_73], %144 {strides = array<i32>} : memref<104x128xf32, #tpu.memory_space<vmem>>, vector<104x128xf32>,
    return
  }
  func.func @transform_0(%arg0: i32) -> (i32, i32) {
    %c0_i32 = arith.constant 0 : i32
    %c0_i32_0 = arith.constant 0 : i32
    return %arg0, %c0_i32 : i32, i32
  }
  func.func @transform_1(%arg0: i32) -> (i32, i32) {
    %c0_i32 = arith.constant 0 : i32
    %c0_i32_0 = arith.constant 0 : i32
    return %arg0, %c0_i32 : i32, i32
  }
  func.func @transform_2(%arg0: i32) -> (i32, i32) {
    %c0_i32 = arith.constant 0 : i32
    %c0_i32_0 = arith.constant 0 : i32
    return %arg0, %c0_i32 : i32, i32
  }
  func.func @transform_3(%arg0: i32) -> (i32, i32) {
    %c0_i32 = arith.constant 0 : i32
    %c0_i32_0 = arith.constant 0 : i32
    %c0_i32_1 = arith.constant 0 : i32
    return %c0_i32, %c0_i32_0 : i32, i32
  }
  func.func @transform_4(%arg0: i32) -> (i32, i32) {
    %c0_i32 = arith.constant 0 : i32
    %c0_i32_0 = arith.constant 0 : i32
    %c0_i32_1 = arith.constant 0 : i32
    return %c0_i32, %c0_i32_0 : i32, i32
  }
  func.func @transform_5(%arg0: i32) -> (i32, i32) {
    %c0_i32 = arith.constant 0 : i32
    %c0_i32_0 = arith.constant 0 : i32
    %c0_i32_1 = arith.constant 0 : i32
    return %c0_i32, %c0_i32_0 : i32, i32
  }
  func.func @transform_6(%arg0: i32) -> (i32, i32) {
    %c0_i32 = arith.constant 0 : i32
    %c0_i32_0 = arith.constant 0 : i32
    %c0_i32_1 = arith.constant 0 : i32
    return %c0_i32, %c0_i32_0 : i32, i32
  }
  func.func @transform_7(%arg0: i32) -> (i32, i32) {
    %c0_i32 = arith.constant 0 : i32
    %c0_i32_0 = arith.constant 0 : i32
    %c0_i32_1 = arith.constant 0 : i32
    return %c0_i32, %c0_i32_0 : i32, i32
  }
  func.func @transform_8(%arg0: i32) -> (i32, i32) {
    %c0_i32 = arith.constant 0 : i32
    %c0_i32_0 = arith.constant 0 : i32
    %c0_i32_1 = arith.constant 0 : i32
    return %c0_i32, %c0_i32_0 : i32, i32
  }
  func.func @transform_9(%arg0: i32) -> (i32, i32, i32) {
    %c0_i32 = arith.constant 0 : i32
    %c0_i32_0 = arith.constant 0 : i32
    %c0_i32_1 = arith.constant 0 : i32
    %c0_i32_2 = arith.constant 0 : i32
    return %c0_i32, %c0_i32_0, %c0_i32_1 : i32, i32, i32
  }
  func.func @transform_10(%arg0: i32) -> (i32, i32) {
    %c0_i32 = arith.constant 0 : i32
    %c0_i32_0 = arith.constant 0 : i32
    %c0_i32_1 = arith.constant 0 : i32
    return %c0_i32, %c0_i32_0 : i32, i32
  }
  func.func @transform_11(%arg0: i32) -> (i32, i32) {
    %c0_i32 = arith.constant 0 : i32
    %c0_i32_0 = arith.constant 0 : i32
    return %arg0, %c0_i32 : i32, i32
  }
  func.func @transform_12(%arg0: i32) -> (i32, i32) {
    %c0_i32 = arith.constant 0 : i32
    %c0_i32_0 = arith.constant 0 : i32
    return %arg0, %c0_i32 : i32, i32
  }
}

</mosaic_0001>

<bundles_post_ra>
// kernel: tpu_custom_call.1
= control target key start
LH: loop header
LB: loop body
LE: loop exit
PB: predicated region body
PF: predicated region fallthrough
CT: control target
= control target key end

     0   :  { %s8272_s0 = inlined_call_operand.vmem [shape: f32[208,96], index: 0, kind: input, shape index: {}]   ;;  %s8273_s1 = inlined_call_operand.vmem [shape: f32[208,96], index: 1, kind: input, shape index: {}]   ;;  %s8274_s2 = inlined_call_operand.vmem [shape: f32[208,96], index: 2, kind: input, shape index: {}]   ;;  %s8275_s3 = inlined_call_operand.vmem [shape: f32[96,96], index: 3, kind: input, shape index: {}]   ;;  %s8276_s4 = inlined_call_operand.vmem [shape: f32[3,96], index: 4, kind: input, shape index: {}]   ;;  %s8277_s5 = inlined_call_operand.vmem [shape: f32[96,128], index: 5, kind: input, shape index: {}]   ;;  %s8278_s6 = inlined_call_operand.vmem [shape: f32[96,32], index: 6, kind: input, shape index: {}]   ;;  %s8279_s7 = inlined_call_operand.vmem [shape: f32[96,32], index: 7, kind: input, shape index: {}]   ;;  %s8280_s8 = inlined_call_operand.vmem [shape: f32[8,32], index: 8, kind: input, shape index: {}]   ;;  %s8281_s9 = inlined_call_operand.vmem [shape: f32[3,32,128], index: 9, kind: input, shape index: {}]   ;;  %s8282_s10 = inlined_call_operand.vmem [shape: f32[2,128], index: 10, kind: input, shape index: {}]   ;;  %s8283_s11 = inlined_call_operand.hbm [shape: f32[208,128], index: 11, kind: output, shape index: {0}]   ;;  %s8284_s12 = inlined_call_operand.hbm [shape: f32[208,128], index: 12, kind: output, shape index: {1}]  }
   0x1   :  { %8307 = sst [smem:[#allocation37_spill]] %s8272_s0 }
   0x2   :  { %8308 = sst [smem:[#allocation38_spill]] %s8273_s1 }
   0x3   :  { %8309 = sst [smem:[#allocation39_spill]] %s8274_s2 }
   0x4   :  { %8310 = sst [smem:[#allocation40_spill]] %s8275_s3 }
   0x5   :  { %8311 = sst [smem:[#allocation41_spill]] %s8276_s4 }
   0x6   :  { %18 = vsyncpa [#allocation3], 0 }
   0x7   :  { %20 = vsyncpa [#allocation3 + $0x1], 0 }
   0x8   :  { %21 = vsyncpa [#allocation5], 0 }
   0x9   :  { %23 = vsyncpa [#allocation5 + $0x1], 0  ;;  %s4801_s21 = smov 0   ;;  %s4803_s22 = smov 0  }
   0xa   :  { %s4805_s23 = smov 0   ;;  %s4807_s24 = smov 0  }
   0xb LB: > { %8312 = sst [smem:[#allocation8_spill]] %s4726_s23  ;;  %s4822_s25 = sadd.s32 4294967295, %s4730_s24   ;;  %s4730_s24 = sphi %s4807_s24, %s8527_s24   ;;  %s4726_s23 = sphi %s4805_s23, %s8524_s23   ;;  %s4722_s22 = sphi %s4803_s22, %s8526_s22   ;;  %s4718_s21 = sphi %s4801_s21, %s8525_s21  }
   0xc   : > { %s4231_s26 = sadd.s32 4294967294, %s4730_s24   ;;  %s4826_s27 = sadd.s32 1, %s4730_s24  }
   0xd   : > { %s282_s28 = sadd.s32 1, %s4726_s23  ;;  %s279_s29 = ssub.s32 %s4730_s24, %s4826_s27 }
   0xe   : > { %p292_p0 = scmp.ne.s32.totalorder %s4726_s23, %s4722_s22  ;;  %p280_p1 = scmp.eq.s32.totalorder %s279_s29, 0 }
   0xf   : > { %p293_p2 = scmp.eq.s32.totalorder %s4822_s25, 1  ;;  %p298_p3 = scmp.ne.s32.totalorder %s4722_s22, %s4718_s21 }
  0x10   : > { %p299_p4 = scmp.eq.s32.totalorder %s4231_s26, 1  ;;  %p4234_p7 = scmp.ge.s32.totalorder %s4730_s24, 1 }
  0x11   : > { %s4837_s30 = scalar_select %p280_p1, %s4726_s23, %s282_s28  }
  0x12   : > { %p4839_p5 = por %p293_p2, %p292_p0  ;;  %p4843_p6 = por %p299_p4, %p298_p3 }
  0x13   : > { %8313 = sst [smem:[#allocation9_spill]] %s4837_s30  ;;  %p394_p8 = scmp.lt.s32.totalorder %s4730_s24, 3 }
  0x15   : > { %p395_p9 = pnand %p4234_p7, %p394_p8 }
  0x17   : > { %398 = sbr.rel (%p395_p9) target bundleno = 1208 (0x4b8), region = 64 }
  0x1c   : > { %s8316_s3 = sld [smem:[#allocation40_spill]]  ;;  %s451_s26 = smul.u32 13, %s4822_s25  ;;  %v1683_v6 = vld [vmem:[%s8278_s6 + $0x58] sm:$0xff]  ;;  %v1682_v7 = vld [vmem:[%s8278_s6 + $0x50] sm:$0xff]  ;;  %v1681_v9 = vld [vmem:[%s8278_s6 + $0x48] sm:$0xff]  ;;  %vm500_vm0 = vcmask 785408  }
  0x1d   : > { %1728 = vmatpush.msra.mxu2 %v1683_v6  ;;  %v1680_v11 = vld [vmem:[%s8278_s6 + $0x40] sm:$0xff]  ;;  %v1679_v13 = vld [vmem:[%s8278_s6 + $0x38] sm:$0xff]  ;;  %v1678_v15 = vld [vmem:[%s8278_s6 + $0x30] sm:$0xff]  ;;  %s8317_s0 = sld [smem:[#allocation37_spill]]  ;;  %v4732_v37 = vmov 1.4142135  }
  0x1e   : > { %p452_p10 = scmp.lt.s32.totalorder %s451_s26, 25  ;;  %v1677_v17 = vld [vmem:[%s8278_s6 + $0x28] sm:$0xff]  ;;  %v1676_v21 = vld [vmem:[%s8278_s6 + $0x20] sm:$0xff]  ;;  %v1675_v22 = vld [vmem:[%s8278_s6 + $0x18] sm:$0xff]  ;;  %s8318_s1 = sld [smem:[#allocation38_spill]]  ;;  %4480 = vrcp.f32 %v4732_v37 }
  0x1f   : > { %1729 = vmatpush.msra.mxu2 %v1682_v7  ;;  %v1674_v23 = vld [vmem:[%s8278_s6 + $0x10] sm:$0xff]  ;;  %v1673_v24 = vld [vmem:[%s8278_s6 + $0x8] sm:$0xff]  ;;  %v1672_v27 = vld [vmem:[%s8278_s6] sm:$0xff]  ;;  %s8319_s4 = sld [smem:[#allocation41_spill]] }
  0x20   : > { %s8529_s26 = smov (!%p452_p10, %s451_s26), 25  ;;  %s8396_s2 = sld [smem:[#allocation39_spill]] }
  0x21   : > { %s4889_s29 = sshll.u32 %s8529_s26, 3  ;;  %1730 = vmatpush.msra.mxu2 %v1681_v9 }
  0x22   : > { %v498_v0 = vld [vmem:[%s8316_s3 + $0x58] sm:$0xff]  ;;  %v497_v1 = vld [vmem:[%s8316_s3 + $0x50] sm:$0xff]  ;;  %v496_v2 = vld [vmem:[%s8316_s3 + $0x48] sm:$0xff] }
  0x23   : > { %4382 = vmatpush.msra.mxu3 %v498_v0  ;;  %544 = vmatpush.msra.mxu0 %v498_v0  ;;  %v495_v3 = vld [vmem:[%s8316_s3 + $0x40] sm:$0xff]  ;;  %v494_v4 = vld [vmem:[%s8316_s3 + $0x38] sm:$0xff]  ;;  %v493_v5 = vld [vmem:[%s8316_s3 + $0x30] sm:$0xff]  ;;  %s4907_s15 = scalar_lea.vmem %s8317_s0, %s4889_s29  ;;  %s4380_s0 = smul.u32 104, %s4822_s25 }
  0x24   : > { %v492_v8 = vld [vmem:[%s8316_s3 + $0x28] sm:$0xff]  ;;  %v491_v10 = vld [vmem:[%s8316_s3 + $0x20] sm:$0xff]  ;;  %v490_v12 = vld [vmem:[%s8316_s3 + $0x18] sm:$0xff]  ;;  %1731 = vmatpush.msra.mxu2 %v1680_v11  ;;  %s4935_s26 = scalar_lea.vmem %s8318_s1, %s4889_s29  ;;  %v4481_v38 = vpop.eup %4480 }
  0x25   : > { %4383 = vmatpush.msra.mxu3 %v497_v1  ;;  %545 = vmatpush.msra.mxu0 %v497_v1  ;;  %v489_v14 = vld [vmem:[%s8316_s3 + $0x10] sm:$0xff]  ;;  %v488_v16 = vld [vmem:[%s8316_s3 + $0x8] sm:$0xff]  ;;  %v487_v18 = vld [vmem:[%s8316_s3] sm:$0xff]  ;;  %v610_v39 = vmul.f32 1.4142135, %v4481_v38  ;;  %vm614_vm1 = vweird.f32 %v4481_v38 }
  0x26   : > { %1732 = vmatpush.msra.mxu2 %v1679_v13  ;;  %v481_v19 = vld [vmem:[%s4907_s15 + $0x50] sm:$0xff]  ;;  %v471_v20 = vld [vmem:[%s4907_s15] sm:$0xff]  ;;  %v482_v25 = vld [vmem:[%s4907_s15 + $0x58] sm:$0xff]  ;;  %s6301_s23 = scalar_lea.vmem %s8396_s2, %s4889_s29  ;;  %s6404_s29 = sand.u32 1, %s4722_s22  }
  0x27   : > { %4384 = vmatpush.msra.mxu3 %v496_v2  ;;  %546 = vmatpush.msra.mxu0 %v496_v2  ;;  %v472_v26 = vld [vmem:[%s4907_s15 + $0x8] sm:$0xff]  ;;  %v1644_v28 = vld [vmem:[%s4935_s26] sm:$0xff]  ;;  %v473_v30 = vld [vmem:[%s4907_s15 + $0x10] sm:$0xff]  ;;  %v611_v41 = vsub.f32 1.0, %v610_v39 }
  0x28   : > { %1733 = vmatpush.msra.mxu2 %v1678_v15  ;;  %v483_v29 = vld [vmem:[%s4907_s15 + $0x60] sm:$0xff]  ;;  %v1645_v31 = vld [vmem:[%s4935_s26 + $0x8] sm:$0xff]  ;;  %v474_v32 = vld [vmem:[%s4907_s15 + $0x18] sm:$0xff] }
  0x29   : > { %4385 = vmatpush.msra.mxu3 %v495_v3  ;;  %547 = vmatpush.msra.mxu0 %v495_v3  ;;  %v1646_v33 = vld [vmem:[%s4935_s26 + $0x10] sm:$0xff]  ;;  %v475_v34 = vld [vmem:[%s4907_s15 + $0x20] sm:$0xff]  ;;  %v1647_v35 = vld [vmem:[%s4935_s26 + $0x18] sm:$0xff]  ;;  %v612_v43 = vmul.f32 %v4481_v38, %v611_v41 }
  0x2a   : > { %1734 = vmatpush.msra.mxu2 %v1677_v17  ;;  %v1648_v36 = vld [vmem:[%s4935_s26 + $0x20] sm:$0xff]  ;;  %v476_v40 = vld [vmem:[%s4907_s15 + $0x28] sm:$0xff]  ;;  %v477_v52 = vld [vmem:[%s4907_s15 + $0x30] sm:$0xff] }
  0x2b   : > { %4386 = vmatpush.msra.mxu3 %v494_v4  ;;  %548 = vmatpush.msra.mxu0 %v494_v4  ;;  %v1649_v42 = vld [vmem:[%s4935_s26 + $0x28] sm:$0xff]  ;;  %v613_v44 = vadd.f32 %v4481_v38, %v612_v43  ;;  %v4969_v45 = vld [vmem:[%s8319_s4] ss:$0 sm:$0xff]  ;;  %v1650_v53 = vld [vmem:[%s4935_s26 + $0x30] sm:$0xff] }
  0x2c   : > { %1735 = vmatpush.msra.mxu2 %v1676_v21  ;;  %v478_v3 = vld [vmem:[%s4907_s15 + $0x38] sm:$0xff] }
  0x2d   : > { %4387 = vmatpush.msra.mxu3 %v493_v5  ;;  %549 = vmatpush.msra.mxu0 %v493_v5  ;;  %v4971_v47 = vsel %vm614_vm1, %v4481_v38, %v613_v44 }
  0x2e   : > { %1736 = vmatpush.msra.mxu2 %v1675_v22 }
  0x2f   : > { %4388 = vmatpush.msra.mxu3 %v492_v8  ;;  %550 = vmatpush.msra.mxu0 %v492_v8 }
  0x30   : > { %1737 = vmatpush.msra.mxu2 %v1674_v23 }
  0x31   : > { %4389 = vmatpush.msra.mxu3 %v491_v10  ;;  %551 = vmatpush.msra.mxu0 %v491_v10 }
  0x32   : > { %1738 = vmatpush.msra.mxu2 %v1673_v24 }
  0x33   : > { %4390 = vmatpush.msra.mxu3 %v490_v12  ;;  %552 = vmatpush.msra.mxu0 %v490_v12 }
  0x34   : > { %1739 = vmatpush.msra.mxu2 %v1672_v27 }
  0x35   : > { %4391 = vmatpush.msra.mxu3 %v489_v14  ;;  %553 = vmatpush.msra.mxu0 %v489_v14 }
  0x36   : > { %4277 = vmatmul.msk.f32.vlgmr.msra.gmra.mxu2 %vm500_vm0, %v1644_v28  ;;  %v479_v28 = vld [vmem:[%s4907_s15 + $0x40] sm:$0xff] }
  0x37   : > { %4392 = vmatpush.msra.mxu3 %v488_v16  ;;  %554 = vmatpush.msra.mxu0 %v488_v16 }
  0x39   : > { %4393 = vmatpush.msra.mxu3 %v487_v18  ;;  %555 = vmatpush.msra.mxu0 %v487_v18 }
  0x3a   : > { %4248 = vmatmul.msk.f32.vlgmr.msra.gmra.mxu3 %vm500_vm0, %v481_v19  ;;  %4238 = vmatmul.msk.f32.vlgmr.msra.gmra.mxu0 %vm500_vm0, %v471_v20 }
  0x3e   : > { %4278 = vmatmul.msk.f32.gmra.mxu2 %vm500_vm0, %v1645_v31 }
  0x42   : > { %4249 = vmatmul.msk.f32.gmra.mxu3 %vm500_vm0, %v482_v25  ;;  %4239 = vmatmul.msk.f32.gmra.mxu0 %vm500_vm0, %v472_v26 }
  0x46   : > { %4279 = vmatmul.msk.f32.gmra.mxu2 %vm500_vm0, %v1646_v33 }
  0x4a   : > { %4250 = vmatmul.msk.f32.gmra.mxu3 %vm500_vm0, %v483_v29  ;;  %4240 = vmatmul.msk.f32.gmra.mxu0 %vm500_vm0, %v473_v30 }
  0x4e   : > { %4280 = vmatmul.msk.f32.gmra.mxu2 %vm500_vm0, %v1647_v35 }
  0x52   : > { %4241 = vmatmul.msk.f32.gmra.mxu0 %vm500_vm0, %v474_v32 }
  0x56   : > { %4281 = vmatmul.msk.f32.gmra.mxu2 %vm500_vm0, %v1648_v36 }
  0x5a   : > { %4242 = vmatmul.msk.f32.gmra.mxu0 %vm500_vm0, %v475_v34 }
  0x5e   : > { %4282 = vmatmul.msk.f32.gmra.mxu2 %vm500_vm0, %v1649_v42 }
  0x62   : > { %4243 = vmatmul.msk.f32.gmra.mxu0 %vm500_vm0, %v476_v40 }
  0x66   : > { %4283 = vmatmul.msk.f32.gmra.mxu2 %vm500_vm0, %v1650_v53 }
  0x6a   : > { %4244 = vmatmul.msk.f32.gmra.mxu0 %vm500_vm0, %v477_v52 }
  0x72   : > { %4245 = vmatmul.msk.f32.gmra.mxu0 %vm500_vm0, %v478_v3 }
  0x7a   : > { %4246 = vmatmul.msk.f32.gmra.mxu0 %vm500_vm0, %v479_v28 }
  0xb7   : > { %v557_v58 = vpop.f32.mrf.mxu0 }
  0xbd   : > { %v587_v46 = vpop.f32.mrf.mxu3 }
  0xbe   : > { %v4974_v48 = vadd.f32 %v4969_v45, %v587_v46 }
  0xbf   : > { %v560_v9 = vpop.f32.mrf.mxu0 }
  0xc0   : > { %v4978_v49 = vmul.f32 %v4971_v47, %v4974_v48  ;;  %v5017_v16 = vadd.f32 %v4969_v45, %v560_v9 }
  0xc2   : > { %v1029_v50 = vmul.f32 %v4978_v49, %v4978_v49  ;;  %v5026_v21 = vmul.f32 %v4971_v47, %v5017_v16 }
  0xc4   : > { %v4982_v51 = vmin.f32 %v1029_v50, 16.0  ;;  %v669_v27 = vmul.f32 %v5026_v21, %v5026_v21 }
  0xc5   : > { %v590_v54 = vpop.f32.mrf.mxu3 }
  0xc6   : > { %v1031_v55 = vmul.f32 2.1237322e-06, %v4982_v51  ;;  %v1042_v56 = vmul.f32 3.8918573e-05, %v4982_v51  ;;  %v4991_v57 = vadd.f32 %v4969_v45, %v590_v54  ;;  %v5041_v36 = vmin.f32 %v669_v27, 16.0 }
  0xc7   : > { %v563_v37 = vpop.f32.mrf.mxu0 }
  0xc8   : > { %v1032_v59 = vadd.f32 0.00028619796, %v1031_v55  ;;  %v1043_v60 = vadd.f32 0.001143296, %v1042_v56  ;;  %v4995_v61 = vmul.f32 %v4971_v47, %v4991_v57  ;;  %v5048_v44 = vadd.f32 %v4969_v45, %v563_v37 }
  0xc9   : > { %v682_v52 = vmul.f32 3.8918573e-05, %v5041_v36 }
  0xca   : > { %v1033_v62 = vmul.f32 %v1032_v59, %v4982_v51  ;;  %v1044_v63 = vmul.f32 %v1043_v60, %v4982_v51  ;;  %v1069_v0 = vmul.f32 %v4995_v61, %v4995_v61  ;;  %v5054_v59 = vadd.f32 %v4969_v45, %v557_v58 }
  0xcb   : > { %v683_v60 = vadd.f32 0.001143296, %v682_v52 }
  0xcc   : > { %v1045_v1 = vadd.f32 0.014752088, %v1044_v63  ;;  %v5001_v2 = vmin.f32 %v1069_v0, 16.0  ;;  %v1034_v4 = vadd.f32 0.0036580483, %v1033_v62  ;;  %v5059_v63 = vmul.f32 %v4971_v47, %v5048_v44 }
  0xcd   : > { %v593_v5 = vpop.f32.mrf.mxu3 }
  0xce   : > { %v1046_v6 = vmul.f32 %v1045_v1, %v4982_v51  ;;  %v1071_v7 = vmul.f32 2.1237322e-06, %v5001_v2  ;;  %v1082_v8 = vmul.f32 3.8918573e-05, %v5001_v2  ;;  %v5009_v10 = vadd.f32 %v4969_v45, %v593_v5 }
  0xcf   : > { %v1035_v13 = vmul.f32 %v1034_v4, %v4982_v51  ;;  %v5067_v5 = vmul.f32 %v4971_v47, %v5054_v59 }
  0xd0   : > { %v1047_v11 = vadd.f32 0.112945676, %v1046_v6  ;;  %v1072_v12 = vadd.f32 0.00028619796, %v1071_v7  ;;  %v1083_v14 = vadd.f32 0.001143296, %v1082_v8  ;;  %v5014_v15 = vmul.f32 %v4971_v47, %v5009_v10 }
  0xd1   : > { %v1036_v24 = vadd.f32 0.05243302, %v1035_v13  ;;  %v629_v9 = vmul.f32 %v5067_v5, %v5067_v5 }
  0xd2   : > { %v1048_v17 = vmul.f32 %v1047_v11, %v4982_v51  ;;  %v1073_v18 = vmul.f32 %v1072_v12, %v5001_v2  ;;  %v1084_v19 = vmul.f32 %v1083_v14, %v5001_v2  ;;  %v1109_v20 = vmul.f32 %v5014_v15, %v5014_v15 }
  0xd3   : > { %v1037_v38 = vmul.f32 %v1036_v24, %v4982_v51  ;;  %v684_v11 = vmul.f32 %v683_v60, %v5041_v36  ;;  %v5079_v14 = vmul.f32 0.5, %v4974_v48 }
  0xd4   : > { %v1049_v22 = vadd.f32 0.4994258, %v1048_v17  ;;  %v1074_v23 = vadd.f32 0.0036580483, %v1073_v18  ;;  %v1085_v25 = vadd.f32 0.014752088, %v1084_v19  ;;  %v709_v18 = vmul.f32 %v5059_v63, %v5059_v63 }
  0xd5   : > { %v5028_v26 = vmin.f32 %v1109_v20, 16.0  ;;  %v1038_v53 = vadd.f32 0.18741608, %v1037_v38 }
  0xd6   : > { %v1050_v29 = vmul.f32 %v1049_v22, %v4982_v51  ;;  %v1075_v30 = vmul.f32 %v1074_v23, %v5001_v2  ;;  %v1086_v31 = vmul.f32 %v1085_v25, %v5001_v2  ;;  %v5086_v22 = vmin.f32 %v629_v9, 16.0 }
  0xd7   : > { %v1111_v32 = vmul.f32 2.1237322e-06, %v5028_v26  ;;  %v1122_v33 = vmul.f32 3.8918573e-05, %v5028_v26  ;;  %v1039_v58 = vmul.f32 %v1038_v53, %v4982_v51  ;;  %v685_v23 = vadd.f32 0.014752088, %v684_v11 }
  0xd8   : > { %v5039_v34 = vadd.f32 1.0, %v1050_v29  ;;  %v1076_v35 = vadd.f32 0.05243302, %v1075_v30  ;;  %v1087_v39 = vadd.f32 0.112945676, %v1086_v31  ;;  %v480_v30 = vld [vmem:[%s4907_s15 + $0x48] sm:$0xff]  ;;  %s4091_s15 = scalar_lea.hbm %s8283_s11, %s4380_s0 }
  0xd9   : > { %v1112_v40 = vadd.f32 0.00028619796, %v1111_v32  ;;  %v1123_v41 = vadd.f32 0.001143296, %v1122_v33  ;;  %v1040_v19 = vadd.f32 1.1283791, %v1039_v58  ;;  %v686_v29 = vmul.f32 %v685_v23, %v5041_v36  ;;  %4247 = vmatmul.msk.f32.gmra.mxu0 %vm500_vm0, %v480_v30 }
  0xda   : > { %4482 = vrcp.f32 %v5039_v34  ;;  %v1088_v42 = vmul.f32 %v1087_v39, %v5001_v2  ;;  %v1077_v46 = vmul.f32 %v1076_v35, %v5001_v2  ;;  %v1061_v24 = vand.u32 2147483647, %v5039_v34 }
  0xdb   : > { %v1113_v43 = vmul.f32 %v1112_v40, %v5028_v26  ;;  %v1124_v50 = vmul.f32 %v1123_v41, %v5028_v26  ;;  %v1063_v48 = vand.u32 2147483648, %v5039_v34  ;;  %v631_v27 = vmul.f32 2.1237322e-06, %v5086_v22 }
  0xdc   : > { %v1089_v54 = vadd.f32 0.4994258, %v1088_v42  ;;  %v1078_v1 = vadd.f32 0.18741608, %v1077_v46  ;;  %v642_v28 = vmul.f32 3.8918573e-05, %v5086_v22  ;;  %v1041_v42 = vmul.f32 %v1040_v19, %v4978_v49 }
  0xdd   : > { %v1114_v55 = vadd.f32 0.0036580483, %v1113_v43  ;;  %v1125_v56 = vadd.f32 0.014752088, %v1124_v50  ;;  %v671_v33 = vmul.f32 2.1237322e-06, %v5041_v36  ;;  %vm1057_vm3 = vweird.f32 %v5039_v34 }
  0xde   : > { %v1090_v62 = vmul.f32 %v1089_v54, %v5001_v2  ;;  %v1079_v51 = vmul.f32 %v1078_v1, %v5001_v2  ;;  %v5098_v35 = vmin.f32 %v709_v18, 16.0  ;;  %v632_v39 = vadd.f32 0.00028619796, %v631_v27 }
  0xdf   : > { %v1115_v3 = vmul.f32 %v1114_v55, %v5028_v26  ;;  %v1126_v4 = vmul.f32 %v1125_v56, %v5028_v26  ;;  %v643_v40 = vadd.f32 0.001143296, %v642_v28  ;;  %v687_v41 = vadd.f32 0.112945676, %v686_v29 }
  0xe0   : > { %v5061_v0 = vpop.eup %4482  ;;  %v5072_v7 = vadd.f32 1.0, %v1090_v62  ;;  %v1080_v31 = vadd.f32 1.1283791, %v1079_v51  ;;  %vm5106_vm4 = vcmp.eq.f32.partialorder %v1061_v24, 8.507059e+37  ;;  %v1064_v50 = vor.u32 1.1754944e-38, %v1063_v48 }
  0xe1   : > { %v1053_v6 = vmul.f32 %v5061_v0, %v5039_v34  ;;  %v1127_v8 = vadd.f32 0.112945676, %v1126_v4  ;;  %v1116_v13 = vadd.f32 0.05243302, %v1115_v3  ;;  %vm1058_vm2 = vweird.f32 %v5061_v0 }
  0xe2   : > { %4484 = vrcp.f32 %v5072_v7  ;;  %v644_v54 = vmul.f32 %v643_v40, %v5086_v22  ;;  %vm5117_vm5 = vmor %vm1057_vm3, %vm1058_vm2  ;;  %v633_v34 = vmul.f32 %v632_v39, %v5086_v22  ;;  %v672_v56 = vadd.f32 0.00028619796, %v671_v33 }
  0xe3   : > { %v1054_v12 = vsub.f32 1.0, %v1053_v6  ;;  %v1128_v17 = vmul.f32 %v1127_v8, %v5028_v26  ;;  %v1117_v2 = vmul.f32 %v1116_v13, %v5028_v26  ;;  %v688_v60 = vmul.f32 %v687_v41, %v5041_v36 }
  0xe4   : > { %v5127_v1 = vmul.f32 %v1080_v31, %v4995_v61  ;;  %v722_v3 = vmul.f32 3.8918573e-05, %v5098_v35  ;;  %v1101_v58 = vand.u32 2147483647, %v5072_v7  ;;  %v645_v6 = vadd.f32 0.014752088, %v644_v54 }
  0xe5   : > { %v1055_v20 = vmul.f32 %v5061_v0, %v1054_v12  ;;  %v1129_v25 = vadd.f32 0.4994258, %v1128_v17  ;;  %v1118_v52 = vadd.f32 0.18741608, %v1117_v2  ;;  %v673_v8 = vmul.f32 %v672_v56, %v5041_v36 }
  0xe6   : > { %v1103_v9 = vand.u32 2147483648, %v5072_v7  ;;  %v689_v12 = vadd.f32 0.4994258, %v688_v60  ;;  %v634_v13 = vadd.f32 0.0036580483, %v633_v34  ;;  %v646_v51 = vmul.f32 %v645_v6, %v5086_v22 }
  0xe7   : > { %v1130_v32 = vmul.f32 %v1129_v25, %v5028_v26  ;;  %v1056_v38 = vadd.f32 %v5061_v0, %v1055_v20  ;;  %v1119_v11 = vmul.f32 %v1118_v52, %v5028_v26  ;;  %v674_v17 = vadd.f32 0.0036580483, %v673_v8 }
  0xe8   : > { %v5101_v37 = vpop.eup %4484  ;;  %vm1097_vm6 = vweird.f32 %v5072_v7  ;;  %v690_v18 = vmul.f32 %v689_v12, %v5041_v36  ;;  %v723_v20 = vadd.f32 0.001143296, %v722_v3  ;;  %v647_v26 = vadd.f32 0.112945676, %v646_v51 }
  0xe9   : > { %v1093_v46 = vmul.f32 %v5101_v37, %v5072_v7  ;;  %v5112_v53 = vadd.f32 1.0, %v1130_v32  ;;  %v1060_v62 = vsel %vm5117_vm5, %v5061_v0, %v1056_v38  ;;  %v711_v0 = vmul.f32 2.1237322e-06, %v5098_v35 }
  0xea   : > { %v1065_v61 = vsel %vm5106_vm4, %v1064_v50, %v1060_v62  ;;  %vm1098_vm7 = vweird.f32 %v5101_v37  ;;  %v675_v24 = vmul.f32 %v674_v17, %v5041_v36  ;;  %vm5145_vm8 = vcmp.eq.f32.partialorder %v1101_v58, 8.507059e+37  ;;  %v1741_v58 = vpop.f32.mrf.mxu2 }
  0xeb   : > { %v1094_v49 = vsub.f32 1.0, %v1093_v46  ;;  %4486 = vrcp.f32 %v5112_v53  ;;  %v712_v19 = vadd.f32 0.00028619796, %v711_v0  ;;  %v1066_v25 = vmul.f32 %v1065_v61, %v1041_v42  ;;  %vm5156_vm9 = vmor %vm1097_vm6, %vm1098_vm7 }
  0xec   : > { %v1120_v27 = vadd.f32 1.1283791, %v1119_v11  ;;  %v5149_v28 = vadd.f32 1.0, %v690_v18  ;;  %v1104_v29 = vor.u32 1.1754944e-38, %v1103_v9  ;;  %v635_v31 = vmul.f32 %v634_v13, %v5086_v22 }
  0xed   : > { %v1095_v4 = vmul.f32 %v5101_v37, %v1094_v49  ;;  %v713_v32 = vmul.f32 %v712_v19, %v5098_v35  ;;  %v648_v38 = vmul.f32 %v647_v26, %v5086_v22  ;;  %v676_v39 = vadd.f32 0.05243302, %v675_v24 }
  0xee   : > { %4488 = vrcp.f32 %v5149_v28  ;;  %v724_v40 = vmul.f32 %v723_v20, %v5098_v35  ;;  %v1141_v43 = vand.u32 2147483647, %v5112_v53  ;;  %v1143_v7 = vand.u32 2147483648, %v5112_v53 }
  0xef   : > { %v1096_v23 = vadd.f32 %v5101_v37, %v1095_v4  ;;  %v1121_v46 = vmul.f32 %v1120_v27, %v5014_v15  ;;  %v649_v50 = vadd.f32 0.4994258, %v648_v38  ;;  %v677_v52 = vmul.f32 %v676_v39, %v5041_v36  ;;  %v5177_v15 = vld [vmem:[%s8280_s8] ss:$0 sm:$0xff] }
  0xf0   : > { %v4261_v54 = vclamps-f32 %v1066_v25, 1.0  ;;  %v636_v49 = vadd.f32 0.05243302, %v635_v31  ;;  %v714_v34 = vadd.f32 0.0036580483, %v713_v32  ;;  %vm1137_vm11 = vweird.f32 %v5112_v53 }
  0xf1   : > { %v4487_v48 = vpop.eup %4486  ;;  %v1100_v41 = vsel %vm5156_vm9, %v5101_v37, %v1096_v23  ;;  %v650_v37 = vmul.f32 %v649_v50, %v5086_v22  ;;  %v725_v60 = vadd.f32 0.014752088, %v724_v40  ;;  %vm1142_vm12 = vcmp.eq.f32.partialorder %v1141_v43, 8.507059e+37 }
  0xf2   : > { %v1133_v30 = vmul.f32 %v4487_v48, %v5112_v53  ;;  %vm1138_vm10 = vweird.f32 %v4487_v48  ;;  %v1105_v56 = vsel %vm5145_vm8, %v1104_v29, %v1100_v41  ;;  %v1144_v3 = vor.u32 1.1754944e-38, %v1143_v7 }
  0xf3   : > { %v678_v4 = vadd.f32 0.18741608, %v677_v52  ;;  %vm1139_vm13 = vmor %vm1137_vm11, %vm1138_vm10  ;;  %v5179_v8 = vadd.f32 1.0, %v650_v37  ;;  %v715_v9 = vmul.f32 %v714_v34, %v5098_v35  ;;  %v726_v53 = vmul.f32 %v725_v60, %v5098_v35 }
  0xf4   : > { %v1134_v42 = vsub.f32 1.0, %v1133_v30  ;;  %v4489_v6 = vpop.eup %4488  ;;  %v1159_v11 = vadd.f32 1.0, %v4261_v54  ;;  %v1106_v12 = vmul.f32 %v1105_v56, %v5127_v1  ;;  %v637_v61 = vmul.f32 %v636_v49, %v5086_v22 }
  0xf5   : > { %v693_v13 = vmul.f32 %v4489_v6, %v5149_v28  ;;  %4490 = vrcp.f32 %v5179_v8  ;;  %vm697_vm14 = vweird.f32 %v5149_v28  ;;  %v5189_v17 = vadd.f32 %v5177_v15, %v1741_v58 }
  0xf6   : > { %v1135_v55 = vmul.f32 %v4487_v48, %v1134_v42  ;;  %v679_v18 = vmul.f32 %v678_v4, %v5041_v36  ;;  %vm698_vm15 = vweird.f32 %v4489_v6  ;;  %v703_v20 = vand.u32 2147483648, %v5149_v28 }
  0xf7   : > { %v694_v19 = vsub.f32 1.0, %v693_v13  ;;  %v716_v23 = vadd.f32 0.05243302, %v715_v9  ;;  %v727_v26 = vadd.f32 0.112945676, %v726_v53  ;;  %v5194_v24 = vmul.f32 %v1159_v11, %v5079_v14  ;;  %vm5197_vm1 = vmor %vm697_vm14, %vm698_vm15 }
  0xf8   : > { %v1136_v62 = vadd.f32 %v4487_v48, %v1135_v55  ;;  %v701_v25 = vand.u32 2147483647, %v5149_v28  ;;  %v638_v2 = vadd.f32 0.18741608, %v637_v61  ;;  %v5206_v30 = vmul.f32 %v5189_v17, %v4971_v47 }
  0xf9   : > { %v728_v36 = vmul.f32 %v727_v26, %v5098_v35  ;;  %v1205_v29 = vsel %vm500_vm0, %v5194_v24, 0.0  ;;  %v680_v31 = vadd.f32 1.1283791, %v679_v18  ;;  %v717_v32 = vmul.f32 %v716_v23, %v5098_v35 }
  0xfa   : > { %v1140_v0 = vsel %vm1139_vm13, %v4487_v48, %v1136_v62  ;;  %v695_v48 = vmul.f32 %v4489_v6, %v694_v19  ;;  %1206 = vadd.xlane.f32.xlu0 %v1205_v29  ;;  %v4262_v28 = vclamps-f32 %v1106_v12, 1.0  ;;  %v704_v38 = vor.u32 1.1754944e-38, %v703_v20 }
  0xfb   : > { %v1145_v51 = vsel %vm1142_vm12, %v1144_v3, %v1140_v0  ;;  %v5209_v33 = vpop.eup %4490  ;;  %v729_v39 = vadd.f32 0.4994258, %v728_v36  ;;  %v1806_v40 = vmul.f32 %v5206_v30, %v5206_v30  ;;  %v607_v42 = vmul.f32 0.5, %v4991_v57 }
  0xfc   : > { %v1146_v1 = vmul.f32 %v1145_v51, %v1121_v46  ;;  %v696_v14 = vadd.f32 %v4489_v6, %v695_v48  ;;  %vm702_vm2 = vcmp.eq.f32.partialorder %v701_v25, 8.507059e+37  ;;  %v1160_v7 = vadd.f32 1.0, %v4262_v28  ;;  %v1744_v46 = vpop.f32.mrf.mxu2 }
  0xfd   : > { %v639_v50 = vmul.f32 %v638_v2, %v5086_v22  ;;  %v730_v52 = vmul.f32 %v729_v39, %v5098_v35  ;;  %v5218_v54 = vmin.f32 %v1806_v40, 16.0  ;;  %v1244_v55 = vmul.f32 %v5194_v24, %v5194_v24 }
  0xfe   : > { %v4263_v41 = vclamps-f32 %v1146_v1, 1.0  ;;  %v700_v43 = vsel %vm5197_vm1, %v4489_v6, %v696_v14  ;;  %v653_v49 = vmul.f32 %v5209_v33, %v5179_v8  ;;  %v681_v57 = vmul.f32 %v680_v31, %v5026_v21 }
  0xff   : > { %v718_v34 = vadd.f32 0.18741608, %v717_v32  ;;  %v5225_v56 = vmul.f32 %v1160_v7, %v607_v42  ;;  %v705_v37 = vsel %vm702_vm2, %v704_v38, %v700_v43  ;;  %v5227_v60 = vadd.f32 1.0, %v730_v52 }
 0x100   : > { %v1808_v22 = vmul.f32 2.1237322e-06, %v5218_v54  ;;  %v1161_v62 = vadd.f32 1.0, %v4263_v41  ;;  %v608_v3 = vmul.f32 0.5, %v5009_v10  ;;  %v5232_v4 = vmul.f32 0.5, %v5017_v16 }
 0x101   : > { %v1819_v58 = vmul.f32 3.8918573e-05, %v5218_v54  ;;  %v1208_v6 = vsel %vm500_vm0, %v5225_v56, 0.0  ;;  %v663_v21 = vand.u32 2147483648, %v5179_v8  ;;  %v5239_v9 = vmul.f32 0.5, %v5048_v44 }
 0x102   : > { %4492 = vrcp.f32 %v5227_v60  ;;  %1209 = vadd.xlane.f32.xlu1 %v1208_v6  ;;  %v1277_v53 = vsel %vm500_vm0, %v1244_v55, 0.0  ;;  %v706_v11 = vmul.f32 %v705_v37, %v681_v57  ;;  %v719_v10 = vmul.f32 %v718_v34, %v5098_v35 }
 0x103   : > { %v1809_v16 = vadd.f32 0.00028619796, %v1808_v22  ;;  %1278 = vadd.xlane.f32.xlu0 %v1277_v53  ;;  %v5245_v12 = vadd.f32 %v5177_v15, %v1744_v46  ;;  %v5247_v0 = vadd.f32 1.1283791, %v639_v50  ;;  %v654_v61 = vsub.f32 1.0, %v653_v49 }
 0x104   : > { %v1820_v13 = vadd.f32 0.001143296, %v1819_v58  ;;  %v5249_v51 = vmul.f32 %v1161_v62, %v608_v3  ;;  %vm657_vm3 = vweird.f32 %v5179_v8  ;;  %v661_v44 = vand.u32 2147483647, %v5179_v8  ;;  %v1747_v19 = vpop.f32.mrf.mxu2 }
 0x105   : > { %v1810_v18 = vmul.f32 %v1809_v16, %v5218_v54  ;;  %v1245_v35 = vmul.f32 %v5225_v56, %v5225_v56  ;;  %vm658_vm4 = vweird.f32 %v5209_v33  ;;  %v5257_v20 = vor.u32 1.1754944e-38, %v663_v21 }
 0x106   : > { %v1821_v1 = vmul.f32 %v1820_v13, %v5218_v54  ;;  %v1211_v23 = vsel %vm500_vm0, %v5249_v51, 0.0  ;;  %v4252_v26 = vclamps-f32 %v706_v11, 1.0  ;;  %v720_v48 = vadd.f32 1.1283791, %v719_v10  ;;  %vm5298_vm8 = vmor %vm657_vm3, %vm658_vm4 }
 0x107   : > { %v1811_v25 = vadd.f32 0.0036580483, %v1810_v18  ;;  %1212 = vadd.xlane.f32.xlu2 %v1211_v23  ;;  %v5264_v2 = vmul.f32 %v5245_v12, %v4971_v47  ;;  %v655_v36 = vmul.f32 %v5209_v33, %v654_v61  ;;  %v743_v29 = vand.u32 2147483648, %v5227_v60  ;;  %v566_v18 = vpop.f32.mrf.mxu0 }
 0x108   : > { %v4493_v27 = vpop.eup %4492  ;;  %v1822_v31 = vadd.f32 0.014752088, %v1821_v1  ;;  %v5269_v14 = vadd.f32 %v5177_v15, %v1747_v19  ;;  %v1280_v38 = vsel %vm500_vm0, %v1245_v35, 0.0  ;;  %v1246_v39 = vmul.f32 %v5249_v51, %v5249_v51 }
 0x109   : > { %v733_v32 = vmul.f32 %v4493_v27, %v5227_v60  ;;  %v1812_v28 = vmul.f32 %v1811_v25, %v5218_v54  ;;  %vm5276_vm5 = vcmp.eq.f32.partialorder %v661_v44, 8.507059e+37  ;;  %vm737_vm6 = vweird.f32 %v5227_v60 }
 0x10a   : > { %v1823_v41 = vmul.f32 %v1822_v31, %v5218_v54  ;;  %1281 = vadd.xlane.f32.xlu1 %v1280_v38  ;;  %v1846_v42 = vmul.f32 %v5264_v2, %v5264_v2  ;;  %v5286_v43 = vmul.f32 %v5269_v14, %v4971_v47  ;;  %v1150_v7 = vadd.f32 1.0, %v4252_v26 }
 0x10b   : > { %v734_v46 = vsub.f32 1.0, %v733_v32  ;;  %vm738_vm7 = vweird.f32 %v4493_v27  ;;  %v741_v50 = vand.u32 2147483647, %v5227_v60  ;;  %v656_v52 = vadd.f32 %v5209_v33, %v655_v36 }
 0x10c   : > { %v1824_v55 = vadd.f32 0.112945676, %v1823_v41  ;;  %v5290_v49 = vmin.f32 %v1846_v42, 16.0  ;;  %v1886_v57 = vmul.f32 %v5286_v43, %v5286_v43  ;;  %v744_v22 = vor.u32 1.1754944e-38, %v743_v29  ;;  %vm5305_vm9 = vmor %vm737_vm6, %vm738_vm7  ;;  %v1750_v60 = vpop.f32.mrf.mxu2 }
 0x10d   : > { %v735_v37 = vmul.f32 %v4493_v27, %v734_v46  ;;  %v1813_v62 = vadd.f32 0.05243302, %v1812_v28  ;;  %v1283_v3 = vsel %vm500_vm0, %v1246_v39, 0.0  ;;  %v5315_v11 = vmul.f32 %v1150_v7, %v5232_v4 }
 0x10e   : > { %v1825_v6 = vmul.f32 %v1824_v55, %v5218_v54  ;;  %v1848_v21 = vmul.f32 2.1237322e-06, %v5290_v49  ;;  %v1859_v8 = vmul.f32 3.8918573e-05, %v5290_v49  ;;  %v5312_v53 = vmin.f32 %v1886_v57, 16.0 }
 0x10f   : > { %v721_v10 = vmul.f32 %v720_v48, %v5059_v63  ;;  %v736_v16 = vadd.f32 %v4493_v27, %v735_v37  ;;  %vm742_vm10 = vcmp.eq.f32.partialorder %v741_v50, 8.507059e+37  ;;  %1284 = vadd.xlane.f32.xlu2 %v1283_v3  ;;  %v5319_v35 = vadd.f32 %v5177_v15, %v1750_v60 }
 0x110   : > { %v1826_v61 = vadd.f32 0.4994258, %v1825_v6  ;;  %v1849_v13 = vadd.f32 0.00028619796, %v1848_v21  ;;  %v1860_v44 = vadd.f32 0.001143296, %v1859_v8  ;;  %v660_v19 = vsel %vm5298_vm8, %v5209_v33, %v656_v52  ;;  %v569_v21 = vpop.f32.mrf.mxu0 }
 0x111   : > { %v740_v4 = vsel %vm5305_vm9, %v4493_v27, %v736_v16  ;;  %v1814_v63 = vmul.f32 %v1813_v62, %v5218_v54  ;;  %v1899_v1 = vmul.f32 3.8918573e-05, %v5312_v53  ;;  %v641_v36 = vmul.f32 %v5247_v0, %v5067_v5 }
 0x112   : > { %v745_v23 = vsel %vm742_vm10, %v744_v22, %v740_v4  ;;  %v1827_v26 = vmul.f32 %v1826_v61, %v5218_v54  ;;  %v1850_v48 = vmul.f32 %v1849_v13, %v5290_v49  ;;  %v1861_v25 = vmul.f32 %v1860_v44, %v5290_v49 }
 0x113   : > { %v746_v29 = vmul.f32 %v745_v23, %v721_v10  ;;  %v1900_v31 = vadd.f32 0.001143296, %v1899_v1  ;;  %v5335_v33 = vmul.f32 %v5319_v35, %v4971_v47  ;;  %v1178_v38 = vsel %vm500_vm0, %v5315_v11, 0.0 }
 0x114   : > { %v5337_v27 = vadd.f32 1.0, %v1827_v26  ;;  %v1851_v32 = vadd.f32 0.0036580483, %v1850_v48  ;;  %v1862_v28 = vadd.f32 0.014752088, %v1861_v25  ;;  %v665_v39 = vsel %vm5276_vm5, %v5257_v20, %v660_v19 }
 0x115   : > { %v4253_v41 = vclamps-f32 %v746_v29, 1.0  ;;  %v1901_v5 = vmul.f32 %v1900_v31, %v5312_v53  ;;  %v1926_v0 = vmul.f32 %v5335_v33, %v5335_v33  ;;  %v1815_v42 = vadd.f32 0.18741608, %v1814_v63 }
 0x116   : > { %4494 = vrcp.f32 %v5337_v27  ;;  %v1852_v46 = vmul.f32 %v1851_v32, %v5290_v49  ;;  %v1863_v50 = vmul.f32 %v1862_v28, %v5290_v49  ;;  %v1888_v52 = vmul.f32 2.1237322e-06, %v5312_v53 }
 0x117   : > { %v1151_v7 = vadd.f32 1.0, %v4253_v41  ;;  %1179 = vadd.xlane.f32.xlu2 %v1178_v38  ;;  %v666_v55 = vmul.f32 %v665_v39, %v641_v36  ;;  %v1902_v40 = vadd.f32 0.014752088, %v1901_v5  ;;  %v5351_v20 = vmin.f32 %v1926_v0, 16.0 }
 0x118   : > { %v1853_v34 = vadd.f32 0.05243302, %v1852_v46  ;;  %v1864_v37 = vadd.f32 0.112945676, %v1863_v50  ;;  %v1889_v22 = vadd.f32 0.00028619796, %v1888_v52  ;;  %v1816_v62 = vmul.f32 %v1815_v42, %v5218_v54 }
 0x119   : > { %v5354_v57 = vmul.f32 %v1151_v7, %v5239_v9  ;;  %v1838_v3 = vand.u32 2147483647, %v5337_v27  ;;  %v1903_v58 = vmul.f32 %v1902_v40, %v5312_v53  ;;  %v1939_v6 = vmul.f32 3.8918573e-05, %v5351_v20 }
 0x11a   : > { %v1854_v8 = vmul.f32 %v1853_v34, %v5290_v49  ;;  %v1865_v10 = vmul.f32 %v1864_v37, %v5290_v49  ;;  %v1890_v16 = vmul.f32 %v1889_v22, %v5312_v53  ;;  %vm1834_vm11 = vweird.f32 %v5337_v27 }
 0x11b   : > { %v1236_v9 = vmul.f32 %v5354_v57, %v5354_v57  ;;  %v1840_v54 = vand.u32 2147483648, %v5337_v27  ;;  %v1904_v61 = vadd.f32 0.112945676, %v1903_v58  ;;  %v1940_v13 = vadd.f32 0.001143296, %v1939_v6 }
 0x11c   : > { %v4495_v60 = vpop.eup %4494  ;;  %v1855_v19 = vadd.f32 0.18741608, %v1854_v8  ;;  %v1866_v4 = vadd.f32 0.4994258, %v1865_v10  ;;  %v5369_v63 = vadd.f32 %v4969_v45, %v569_v21  ;;  %v1891_v1 = vadd.f32 0.0036580483, %v1890_v16 }
 0x11d   : > { %v1830_v44 = vmul.f32 %v4495_v60, %v5337_v27  ;;  %v1905_v23 = vmul.f32 %v1904_v61, %v5312_v53  ;;  %v5373_v26 = vadd.f32 %v4969_v45, %v566_v18  ;;  %v1941_v48 = vmul.f32 %v1940_v13, %v5351_v20 }
 0x11e   : > { %vm1835_vm12 = vweird.f32 %v4495_v60  ;;  %v1867_v36 = vmul.f32 %v1866_v4, %v5290_v49  ;;  %v1253_v29 = vsel %vm500_vm0, %v1236_v9, 0.0  ;;  %v1856_v31 = vmul.f32 %v1855_v19, %v5290_v49 }
 0x11f   : > { %v1831_v25 = vsub.f32 1.0, %v1830_v44  ;;  %v1892_v32 = vmul.f32 %v1891_v1, %v5312_v53  ;;  %v1906_v28 = vadd.f32 0.4994258, %v1905_v23  ;;  %v5382_v38 = vmul.f32 %v4971_v47, %v5373_v26  ;;  %1254 = vadd.xlane.f32.xlu2 %v1253_v29  ;;  %vm5390_vm13 = vmor %vm1834_vm11, %vm1835_vm12 }
 0x120   : > { %v1868_v18 = vadd.f32 1.0, %v1867_v36  ;;  %v1942_v39 = vadd.f32 0.014752088, %v1941_v48  ;;  %v5386_v41 = vmul.f32 %v4971_v47, %v5369_v63  ;;  %v4251_v7 = vclamps-f32 %v666_v55, 1.0 }
 0x121   : > { %v1832_v45 = vmul.f32 %v4495_v60, %v1831_v25  ;;  %v1893_v49 = vadd.f32 0.05243302, %v1892_v32  ;;  %v1907_v0 = vmul.f32 %v1906_v28, %v5312_v53  ;;  %v749_v42 = vmul.f32 %v5382_v38, %v5382_v38 }
 0x122   : > { %v1817_v46 = vadd.f32 1.1283791, %v1816_v62  ;;  %4496 = vrcp.f32 %v1868_v18  ;;  %vm5397_vm14 = vcmp.eq.f32.partialorder %v1838_v3, 8.507059e+37  ;;  %v1841_v40 = vor.u32 1.1754944e-38, %v1840_v54 }
 0x123   : > { %v1833_v50 = vadd.f32 %v4495_v60, %v1832_v45  ;;  %v1857_v27 = vadd.f32 1.1283791, %v1856_v31  ;;  %v5401_v34 = vadd.f32 1.0, %v1907_v0  ;;  %v5405_v22 = vmin.f32 %v749_v42, 16.0 }
 0x124   : > { %v1943_v58 = vmul.f32 %v1942_v39, %v5351_v20  ;;  %v789_v55 = vmul.f32 %v5386_v41, %v5386_v41  ;;  %v5411_v62 = vmul.f32 0.5, %v5054_v59  ;;  %v1878_v3 = vand.u32 2147483647, %v1868_v18 }
 0x125   : > { %v1837_v37 = vsel %vm5390_vm13, %v4495_v60, %v1833_v50  ;;  %v1880_v6 = vand.u32 2147483648, %v1868_v18  ;;  %v1894_v21 = vmul.f32 %v1893_v49, %v5312_v53  ;;  %v5414_v8 = vadd.f32 1.0, %v4251_v7 }
 0x126   : > { %v5417_v10 = vmul.f32 0.5, %v5189_v17  ;;  %v1818_v16 = vmul.f32 %v1817_v46, %v5206_v30  ;;  %4498 = vrcp.f32 %v5401_v34  ;;  %v1842_v9 = vsel %vm5397_vm14, %v1841_v40, %v1837_v37 }
 0x127   : > { %v1858_v60 = vmul.f32 %v1857_v27, %v5264_v2  ;;  %v751_v59 = vmul.f32 2.1237322e-06, %v5405_v22  ;;  %v762_v54 = vmul.f32 3.8918573e-05, %v5405_v22  ;;  %vm1874_vm15 = vweird.f32 %v1868_v18 }
 0x128   : > { %v4497_v61 = vpop.eup %4496  ;;  %v1928_v13 = vmul.f32 2.1237322e-06, %v5351_v20  ;;  %v1944_v44 = vadd.f32 0.112945676, %v1943_v58  ;;  %v5427_v17 = vmin.f32 %v789_v55, 16.0  ;;  %vm5429_vm1 = vcmp.eq.f32.partialorder %v1878_v3, 8.507059e+37 }
 0x129   : > { %v1870_v19 = vmul.f32 %v4497_v61, %v1868_v18  ;;  %v1881_v4 = vor.u32 1.1754944e-38, %v1880_v6  ;;  %v1895_v1 = vadd.f32 0.18741608, %v1894_v21  ;;  %v1843_v23 = vmul.f32 %v1842_v9, %v1818_v16 }
 0x12a   : > { %v752_v2 = vadd.f32 0.00028619796, %v751_v59  ;;  %v763_v48 = vadd.f32 0.001143296, %v762_v54  ;;  %v1945_v25 = vmul.f32 %v1944_v44, %v5351_v20  ;;  %vm1875_vm2 = vweird.f32 %v4497_v61 }
 0x12b   : > { %v1871_v36 = vsub.f32 1.0, %v1870_v19  ;;  %vm1914_vm3 = vweird.f32 %v5401_v34  ;;  %v1929_v29 = vadd.f32 0.00028619796, %v1928_v13  ;;  %v1918_v32 = vand.u32 2147483647, %v5401_v34  ;;  %vm5442_vm4 = vmor %vm1874_vm15, %vm1875_vm2 }
 0x12c   : > { %v4499_v31 = vpop.eup %4498  ;;  %v753_v28 = vmul.f32 %v752_v2, %v5405_v22  ;;  %v764_v45 = vmul.f32 %v763_v48, %v5405_v22  ;;  %v1946_v39 = vadd.f32 0.4994258, %v1945_v25  ;;  %v1896_v49 = vmul.f32 %v1895_v1, %v5312_v53 }
 0x12d   : > { %v1872_v5 = vmul.f32 %v4497_v61, %v1871_v36  ;;  %v1910_v0 = vmul.f32 %v4499_v31, %v5401_v34  ;;  %v1930_v42 = vmul.f32 %v1929_v29, %v5351_v20  ;;  %v4290_v7 = vclamps-f32 %v1843_v23, 1.0 }
 0x12e   : > { %v754_v50 = vadd.f32 0.0036580483, %v753_v28  ;;  %v765_v52 = vadd.f32 0.014752088, %v764_v45  ;;  %v1947_v40 = vmul.f32 %v1946_v39, %v5351_v20  ;;  %v802_v55 = vmul.f32 3.8918573e-05, %v5427_v17 }
 0x12f   : > { %v1873_v27 = vadd.f32 %v4497_v61, %v1872_v5  ;;  %v1911_v37 = vsub.f32 1.0, %v1910_v0  ;;  %v1931_v58 = vadd.f32 0.0036580483, %v1930_v42  ;;  %v791_v18 = vmul.f32 2.1237322e-06, %v5427_v17 }
 0x130   : > { %v755_v53 = vmul.f32 %v754_v50, %v5405_v22  ;;  %v766_v3 = vmul.f32 %v765_v52, %v5405_v22  ;;  %v5450_v6 = vadd.f32 1.0, %v1947_v40  ;;  %vm1915_vm5 = vweird.f32 %v4499_v31 }
 0x131   : > { %v1877_v21 = vsel %vm5442_vm4, %v4497_v61, %v1873_v27  ;;  %v1912_v16 = vmul.f32 %v4499_v31, %v1911_v37  ;;  %v1932_v9 = vmul.f32 %v1931_v58, %v5351_v20  ;;  %v1920_v54 = vand.u32 2147483648, %v5401_v34  ;;  %vm5462_vm6 = vmor %vm1914_vm3, %vm1915_vm5 }
 0x132   : > { %v1882_v59 = vsel %vm5429_vm1, %v1881_v4, %v1877_v21  ;;  %v767_v13 = vadd.f32 0.112945676, %v766_v3  ;;  %4500 = vrcp.f32 %v5450_v6  ;;  %v1897_v44 = vadd.f32 1.1283791, %v1896_v49 }
 0x133   : > { %v1913_v19 = vadd.f32 %v4499_v31, %v1912_v16  ;;  %v1933_v1 = vadd.f32 0.05243302, %v1932_v9  ;;  %v803_v23 = vadd.f32 0.001143296, %v802_v55  ;;  %v2326_v2 = vadd.f32 1.0, %v4290_v7 }
 0x134   : > { %v756_v48 = vadd.f32 0.05243302, %v755_v53  ;;  %v768_v30 = vmul.f32 %v767_v13, %v5405_v22  ;;  %v792_v4 = vadd.f32 0.00028619796, %v791_v18  ;;  %v5469_v25 = vmul.f32 %v5414_v8, %v5411_v62  ;;  %v1753_v53 = vpop.f32.mrf.mxu2 }
 0x135   : > { %v1883_v36 = vmul.f32 %v1882_v59, %v1858_v60  ;;  %v1934_v29 = vmul.f32 %v1933_v1, %v5351_v20  ;;  %v1781_v28 = vmul.f32 0.5, %v5245_v12  ;;  %vm5473_vm7 = vcmp.eq.f32.partialorder %v1918_v32, 8.507059e+37 }
 0x136   : > { %v1921_v34 = vor.u32 1.1754944e-38, %v1920_v54  ;;  %v769_v39 = vadd.f32 0.4994258, %v768_v30  ;;  %v1898_v5 = vmul.f32 %v1897_v44, %v5286_v43  ;;  %v1917_v49 = vsel %vm5462_vm6, %v4499_v31, %v1913_v19  ;;  %v572_v54 = vpop.f32.mrf.mxu0 }
 0x137   : > { %v1935_v0 = vadd.f32 0.18741608, %v1934_v29  ;;  %v804_v62 = vmul.f32 %v803_v23, %v5427_v17  ;;  %v5482_v60 = vmul.f32 %v2326_v2, %v5417_v10  ;;  %v757_v12 = vmul.f32 %v756_v48, %v5405_v22 }
 0x138   : > { %v4501_v8 = vpop.eup %4500  ;;  %v770_v32 = vmul.f32 %v769_v39, %v5405_v22  ;;  %v793_v42 = vmul.f32 %v792_v4, %v5427_v17  ;;  %v4291_v7 = vclamps-f32 %v1883_v36, 1.0  ;;  %vm1954_vm8 = vweird.f32 %v5450_v6  ;;  %v5529_v36 = vld [vmem:[%s8319_s4] ss:$0 sm:$0xff] }
 0x139   : > { %v1950_v46 = vmul.f32 %v4501_v8, %v5450_v6  ;;  %v1958_v43 = vand.u32 2147483647, %v5450_v6  ;;  %v1922_v31 = vsel %vm5473_vm7, %v1921_v34, %v1917_v49  ;;  %v1960_v10 = vand.u32 2147483648, %v5450_v6 }
 0x13a   : > { %v5492_v50 = vadd.f32 1.0, %v770_v32  ;;  %v794_v52 = vadd.f32 0.0036580483, %v793_v42  ;;  %v1936_v40 = vmul.f32 %v1935_v0, %v5351_v20  ;;  %vm1955_vm9 = vweird.f32 %v4501_v8 }
 0x13b   : > { %v1951_v27 = vsub.f32 1.0, %v1950_v46  ;;  %v805_v37 = vadd.f32 0.014752088, %v804_v62  ;;  %v1782_v58 = vmul.f32 0.5, %v5269_v14  ;;  %v758_v55 = vadd.f32 0.18741608, %v757_v12  ;;  %vm5507_vm12 = vmor %vm1954_vm8, %vm1955_vm9 }
 0x13c   : > { %4502 = vrcp.f32 %v5492_v50  ;;  %vm3045_vm10 = vcmask 261120   ;;  %v1923_v3 = vmul.f32 %v1922_v31, %v1898_v5  ;;  %v5499_v18 = vmul.f32 0.5, %v5373_v26 }
 0x13d   : > { %v1952_v21 = vmul.f32 %v4501_v8, %v1951_v27  ;;  %vm5501_vm11 = vcmp.eq.f32.partialorder %v1958_v43, 8.507059e+37  ;;  %v2327_v20 = vadd.f32 1.0, %v4291_v7  ;;  %v795_v14 = vmul.f32 %v794_v52, %v5427_v17 }
 0x13e   : > { %v806_v59 = vmul.f32 %v805_v37, %v5427_v17  ;;  %v3189_v26 = vmul.f32 %v5482_v60, %v5482_v60  ;;  %v1937_v13 = vadd.f32 1.1283791, %v1936_v40  ;;  %v1961_v19 = vor.u32 1.1754944e-38, %v1960_v10 }
 0x13f   : > { %v1953_v44 = vadd.f32 %v4501_v8, %v1952_v21  ;;  %v5516_v1 = vadd.f32 %v5177_v15, %v1753_v53  ;;  %v759_v6 = vmul.f32 %v758_v55, %v5405_v22  ;;  %v796_v23 = vadd.f32 0.05243302, %v795_v14 }
 0x140   : > { %v807_v2 = vadd.f32 0.112945676, %v806_v59  ;;  %v3202_v61 = vsel %vm3045_vm10, %v3189_v26, 0.0  ;;  %v4292_v48 = vclamps-f32 %v1923_v3, 1.0  ;;  %v5532_v22 = vadd.f32 %v5529_v36, %v572_v54 }
 0x141   : > { %v1957_v30 = vsel %vm5507_vm12, %v4501_v8, %v1953_v44  ;;  %3203 = vadd.xlane.f32.xlu2 %v3202_v61  ;;  %v5524_v4 = vmul.f32 %v5516_v1, %v4971_v47  ;;  %v5536_v45 = vmul.f32 %v2327_v20, %v1781_v28  ;;  %v5539_v34 = vmul.f32 0.5, %v5319_v35 }
 0x142   : > { %v5534_v29 = vpop.eup %4502  ;;  %v797_v39 = vmul.f32 %v796_v23, %v5427_v17  ;;  %v808_v5 = vmul.f32 %v807_v2, %v5427_v17  ;;  %v1938_v0 = vmul.f32 %v1937_v13, %v5335_v33  ;;  %v5547_v62 = vmul.f32 0.5, %v5369_v63  ;;  %v1756_v63 = vpop.f32.mrf.mxu2 }
 0x143   : > { %8352 = vst [vmem:[#allocation10_spill] sm:$0xff] %v5536_v45  ;;  %v773_v49 = vmul.f32 %v5534_v29, %v5492_v50  ;;  %v1966_v8 = vmul.f32 %v5524_v4, %v5524_v4  ;;  %v1962_v28 = vsel %vm5501_vm11, %v1961_v19, %v1957_v30  ;;  %v5555_v32 = vmul.f32 %v4971_v47, %v5532_v22 }
 0x144   : > { %v798_v35 = vadd.f32 0.18741608, %v797_v39  ;;  %v809_v12 = vadd.f32 0.4994258, %v808_v5  ;;  %v2328_v42 = vadd.f32 1.0, %v4292_v48  ;;  %v3049_v10 = vsel %vm3045_vm10, %v5536_v45, 0.0 }
 0x145   : > { %v760_v7 = vadd.f32 1.1283791, %v759_v6  ;;  %v781_v46 = vand.u32 2147483647, %v5492_v50  ;;  %v5558_v33 = vmin.f32 %v1966_v8, 16.0  ;;  %v774_v43 = vsub.f32 1.0, %v773_v49 }
 0x146   : > { %v810_v31 = vmul.f32 %v809_v12, %v5427_v17  ;;  %v829_v52 = vmul.f32 %v5555_v32, %v5555_v32  ;;  %v1963_v40 = vmul.f32 %v1962_v28, %v1938_v0  ;;  %v799_v27 = vmul.f32 %v798_v35, %v5427_v17 }
 0x147   : > { %v1968_v37 = vmul.f32 2.1237322e-06, %v5558_v33  ;;  %v1979_v55 = vmul.f32 3.8918573e-05, %v5558_v33  ;;  %v783_v53 = vand.u32 2147483648, %v5492_v50  ;;  %v5574_v16 = vadd.f32 %v5177_v15, %v1756_v63 }
 0x148   : > { %v5569_v3 = vadd.f32 1.0, %v810_v31  ;;  %v5571_v21 = vmin.f32 %v829_v52, 16.0  ;;  %v5576_v20 = vmul.f32 %v2328_v42, %v1782_v58  ;;  %v3190_v17 = vmul.f32 %v5536_v45, %v5536_v45 }
 0x149   : > { %3050 = vadd.xlane.f32.xlu2 %v3049_v10  ;;  %v1969_v9 = vadd.f32 0.00028619796, %v1968_v37  ;;  %v1980_v14 = vadd.f32 0.001143296, %v1979_v55  ;;  %v5581_v59 = vmul.f32 %v760_v7, %v5382_v38  ;;  %v775_v26 = vmul.f32 %v5534_v29, %v774_v43 }
 0x14a   : > { %8353 = vst [vmem:[#allocation11_spill] sm:$0xff] %v5576_v20  ;;  %vm777_vm13 = vweird.f32 %v5492_v50  ;;  %4504 = vrcp.f32 %v5569_v3  ;;  %vm5586_vm14 = vcmp.eq.f32.partialorder %v781_v46, 8.507059e+37  ;;  %v4293_v58 = vclamps-f32 %v1963_v40, 1.0 }
 0x14b   : > { %v800_v13 = vadd.f32 1.1283791, %v799_v27  ;;  %v1970_v44 = vmul.f32 %v1969_v9, %v5558_v33  ;;  %v1981_v19 = vmul.f32 %v1980_v14, %v5558_v33  ;;  %vm778_vm15 = vweird.f32 %v5534_v29 }
 0x14c   : > { %v784_v38 = vor.u32 1.1754944e-38, %v783_v53  ;;  %v842_v6 = vmul.f32 3.8918573e-05, %v5571_v21  ;;  %v5596_v23 = vmul.f32 %v5574_v16, %v4971_v47  ;;  %v3205_v48 = vsel %vm3045_vm10, %v3190_v17, 0.0  ;;  %vm5610_vm1 = vmor %vm777_vm13, %vm778_vm15 }
 0x14d   : > { %v1971_v2 = vadd.f32 0.0036580483, %v1970_v44  ;;  %v1982_v61 = vadd.f32 0.014752088, %v1981_v19  ;;  %v3052_v30 = vsel %vm3045_vm10, %v5576_v20, 0.0  ;;  %v776_v39 = vadd.f32 %v5534_v29, %v775_v26 }
 0x14e   : > { %v843_v5 = vadd.f32 0.001143296, %v842_v6  ;;  %v5604_v49 = vmul.f32 %v5576_v20, %v5576_v20  ;;  %v2006_v0 = vmul.f32 %v5596_v23, %v5596_v23  ;;  %v2329_v28 = vadd.f32 1.0, %v4293_v58  ;;  %v575_v58 = vpop.f32.mrf.mxu0 }
 0x14f   : > { %v801_v35 = vmul.f32 %v800_v13, %v5386_v41  ;;  %v1972_v12 = vmul.f32 %v1971_v2, %v5558_v33  ;;  %v1983_v42 = vmul.f32 %v1982_v61, %v5558_v33  ;;  %vm817_vm2 = vweird.f32 %v5569_v3 }
 0x150   : > { %v4505_v7 = vpop.eup %4504  ;;  %v831_v46 = vmul.f32 2.1237322e-06, %v5571_v21  ;;  %v844_v63 = vmul.f32 %v843_v5, %v5571_v21  ;;  %v5620_v43 = vmin.f32 %v2006_v0, 16.0  ;;  %v821_v31 = vand.u32 2147483647, %v5569_v3 }
 0x151   : > { %v813_v50 = vmul.f32 %v4505_v7, %v5569_v3  ;;  %v823_v10 = vand.u32 2147483648, %v5569_v3  ;;  %v1973_v41 = vadd.f32 0.05243302, %v1972_v12  ;;  %3206 = vadd.xlane.f32.xlu2 %v3205_v48  ;;  %v780_v52 = vsel %vm5610_vm1, %v5534_v29, %v776_v39 }
 0x152   : > { %v1984_v40 = vadd.f32 0.112945676, %v1983_v42  ;;  %v832_v27 = vadd.f32 0.00028619796, %v831_v46  ;;  %v845_v37 = vadd.f32 0.014752088, %v844_v63  ;;  %vm818_vm3 = vweird.f32 %v4505_v7 }
 0x153   : > { %v814_v55 = vsub.f32 1.0, %v813_v50  ;;  %v1974_v53 = vmul.f32 %v1973_v41, %v5558_v33  ;;  %v2019_v26 = vmul.f32 3.8918573e-05, %v5620_v43  ;;  %v824_v44 = vor.u32 1.1754944e-38, %v823_v10  ;;  %vm5640_vm4 = vmor %vm817_vm2, %vm818_vm3 }
 0x154   : > { %v1985_v9 = vmul.f32 %v1984_v40, %v5558_v33  ;;  %v833_v14 = vmul.f32 %v832_v27, %v5571_v21  ;;  %v846_v17 = vmul.f32 %v845_v37, %v5571_v21  ;;  %v5634_v29 = vadd.f32 %v5529_v36, %v575_v58 }
 0x155   : > { %v815_v13 = vmul.f32 %v4505_v7, %v814_v55  ;;  %v1975_v19 = vadd.f32 0.18741608, %v1974_v53  ;;  %v785_v6 = vsel %vm5586_vm14, %v784_v38, %v780_v52  ;;  %vm822_vm5 = vcmp.eq.f32.partialorder %v821_v31, 8.507059e+37  ;;  %v1759_v53 = vpop.f32.mrf.mxu2 }
 0x156   : > { %v1986_v61 = vadd.f32 0.4994258, %v1985_v9  ;;  %v834_v48 = vadd.f32 0.0036580483, %v833_v14  ;;  %v847_v39 = vadd.f32 0.112945676, %v846_v17  ;;  %v5654_v50 = vmul.f32 %v4971_v47, %v5634_v29 }
 0x157   : > { %v816_v5 = vadd.f32 %v4505_v7, %v815_v13  ;;  %v2020_v0 = vadd.f32 0.001143296, %v2019_v26  ;;  %v4733_v8 = vmov 96.0   ;;  %v1976_v12 = vmul.f32 %v1975_v19, %v5558_v33 }
 0x158   : > { %4506 = vrcp.f32 %v4733_v8  ;;  %v1987_v42 = vmul.f32 %v1986_v61, %v5558_v33  ;;  %v835_v54 = vmul.f32 %v834_v48, %v5571_v21  ;;  %v848_v3 = vmul.f32 %v847_v39, %v5571_v21 }
 0x159   : > { %v820_v38 = vsel %vm5640_vm4, %v4505_v7, %v816_v5  ;;  %3053 = vadd.xlane.f32.xlu2 %v3052_v30  ;;  %v2008_v46 = vmul.f32 2.1237322e-06, %v5620_v43  ;;  %v2021_v63 = vmul.f32 %v2020_v0, %v5620_v43  ;;  %v5657_v40 = vmul.f32 0.5, %v5516_v1 }
 0x15a   : > { %v825_v31 = vsel %vm822_vm5, %v824_v44, %v820_v38  ;;  %v1988_v10 = vadd.f32 1.0, %v1987_v42  ;;  %v836_v41 = vadd.f32 0.05243302, %v835_v54  ;;  %v849_v33 = vadd.f32 0.4994258, %v848_v3 }
 0x15b   : > { %v826_v52 = vmul.f32 %v825_v31, %v801_v35  ;;  %v2009_v27 = vadd.f32 0.00028619796, %v2008_v46  ;;  %v2022_v37 = vadd.f32 0.014752088, %v2021_v63  ;;  %v5660_v30 = vmul.f32 %v785_v6, %v5581_v59 }
 0x15c   : > { %v5663_v7 = vmul.f32 %v2329_v28, %v5539_v34  ;;  %v1977_v55 = vadd.f32 1.1283791, %v1976_v12  ;;  %4508 = vrcp.f32 %v1988_v10  ;;  %v837_v17 = vmul.f32 %v836_v41, %v5571_v21 }
 0x15d   : > { %v4255_v14 = vclamps-f32 %v826_v52, 1.0  ;;  %v850_v35 = vmul.f32 %v849_v33, %v5571_v21  ;;  %v2010_v1 = vmul.f32 %v2009_v27, %v5620_v43  ;;  %v1998_v26 = vand.u32 2147483647, %v1988_v10 }
 0x15e   : > { %8360 = vst [vmem:[#allocation12_spill] sm:$0xff] %v5663_v7  ;;  %v5665_v9 = vpop.eup %4506  ;;  %v3208_v59 = vsel %vm3045_vm10, %v5604_v49, 0.0  ;;  %v2023_v58 = vmul.f32 %v2022_v37, %v5620_v43  ;;  %v869_v34 = vmul.f32 %v5654_v50, %v5654_v50  ;;  %v2000_v28 = vand.u32 2147483648, %v1988_v10 }
 0x15f   : > { %v5675_v13 = vadd.f32 1.0, %v850_v35  ;;  %v2011_v44 = vadd.f32 0.0036580483, %v2010_v1  ;;  %v5678_v19 = vadd.f32 %v5177_v15, %v1759_v53  ;;  %v1153_v6 = vadd.f32 1.0, %v4255_v14 }
 0x160   : > { %v838_v2 = vadd.f32 0.18741608, %v837_v17  ;;  %v2024_v61 = vadd.f32 0.112945676, %v2023_v58  ;;  %v3055_v48 = vsel %vm3045_vm10, %v5663_v7, 0.0  ;;  %v4254_v49 = vclamps-f32 %v5660_v30, 1.0 }
 0x161   : > { %v1978_v39 = vmul.f32 %v1977_v55, %v5524_v4  ;;  %4510 = vrcp.f32 %v5675_v13  ;;  %3209 = vadd.xlane.f32.xlu2 %v3208_v59  ;;  %v5685_v5 = vmin.f32 %v869_v34, 16.0  ;;  %vm1994_vm6 = vweird.f32 %v1988_v10 }
 0x162   : > { %v4509_v0 = vpop.eup %4508  ;;  %vm5687_vm7 = vcmp.eq.f32.partialorder %v1998_v26, 8.507059e+37  ;;  %v2012_v8 = vmul.f32 %v2011_v44, %v5620_v43  ;;  %v2025_v12 = vmul.f32 %v2024_v61, %v5620_v43  ;;  %v2001_v54 = vor.u32 1.1754944e-38, %v2000_v28 }
 0x163   : > { %v1990_v42 = vmul.f32 %v4509_v0, %v1988_v10  ;;  %v5695_v4 = vmul.f32 %v5678_v19, %v4971_v47  ;;  %v1215_v3 = vmul.f32 96.0, %v5665_v9  ;;  %v5699_v38 = vmul.f32 %v1153_v6, %v5547_v62 }
 0x164   : > { %v839_v46 = vmul.f32 %v838_v2, %v5571_v21  ;;  %v2013_v63 = vadd.f32 0.05243302, %v2012_v8  ;;  %v2026_v31 = vadd.f32 0.4994258, %v2025_v12  ;;  %vm1995_vm8 = vweird.f32 %v4509_v0 }
 0x165   : > { %v1991_v41 = vsub.f32 1.0, %v1990_v42  ;;  %v871_v33 = vmul.f32 2.1237322e-06, %v5685_v5  ;;  %v882_v52 = vmul.f32 3.8918573e-05, %v5685_v5  ;;  %v863_v37 = vand.u32 2147483648, %v5675_v13  ;;  %vm5711_vm9 = vmor %vm1994_vm6, %vm1995_vm8 }
 0x166   : > { %v861_v27 = vand.u32 2147483647, %v5675_v13  ;;  %v2014_v55 = vmul.f32 %v2013_v63, %v5620_v43  ;;  %v2027_v53 = vmul.f32 %v2026_v31, %v5620_v43  ;;  %v2046_v35 = vmul.f32 %v5695_v4, %v5695_v4 }
 0x167   : > { %v4511_v62 = vpop.eup %4510  ;;  %v1992_v14 = vmul.f32 %v4509_v0, %v1991_v41  ;;  %v872_v17 = vadd.f32 0.00028619796, %v871_v33  ;;  %v883_v21 = vadd.f32 0.001143296, %v882_v52  ;;  %v840_v26 = vadd.f32 1.1283791, %v839_v46 }
 0x168   : > { %v853_v59 = vmul.f32 %v4511_v62, %v5675_v13  ;;  %vm857_vm11 = vweird.f32 %v5675_v13  ;;  %v5717_v58 = vadd.f32 1.0, %v2027_v53  ;;  %v2015_v28 = vadd.f32 0.18741608, %v2014_v55 }
 0x169   : > { %v1993_v34 = vadd.f32 %v4509_v0, %v1992_v14  ;;  %3056 = vadd.xlane.f32.xlu2 %v3055_v48  ;;  %v873_v44 = vmul.f32 %v872_v17, %v5685_v5  ;;  %v884_v6 = vmul.f32 %v883_v21, %v5685_v5  ;;  %vm858_vm12 = vweird.f32 %v4511_v62  ;;  %v1533_v48 = vld [vmem:[%s8277_s5 + $0x58] sm:$0xff] }
 0x16a   : > { %v854_v2 = vsub.f32 1.0, %v853_v59  ;;  %vm5721_vm13 = vcmp.eq.f32.partialorder %v861_v27, 8.507059e+37  ;;  %4512 = vrcp.f32 %v5717_v58  ;;  %v864_v8 = vor.u32 1.1754944e-38, %v863_v37  ;;  %4394 = vmatpush.msrb.mxu3 %v1533_v48  ;;  %1579 = vmatpush.msra.mxu1 %v1533_v48  ;;  %vm5740_vm15 = vmor %vm857_vm11, %vm858_vm12 }
 0x16b   : > { %v1997_v61 = vsel %vm5711_vm9, %v4509_v0, %v1993_v34  ;;  %v874_v12 = vadd.f32 0.0036580483, %v873_v44  ;;  %v5728_v42 = vmin.f32 %v2046_v35, 16.0  ;;  %v885_v31 = vadd.f32 0.014752088, %v884_v6  ;;  %v578_v35 = vpop.f32.mrf.mxu0 }
 0x16c   : > { %v2002_v46 = vsel %vm5687_vm7, %v2001_v54, %v1997_v61  ;;  %v855_v63 = vmul.f32 %v4511_v62, %v854_v2  ;;  %v1216_v41 = vsub.f32 1.0, %v1215_v3  ;;  %vm1219_vm14 = vweird.f32 %v5665_v9 }
 0x16d   : > { %v841_v0 = vmul.f32 %v840_v26, %v5555_v32  ;;  %v2016_v52 = vmul.f32 %v2015_v28, %v5620_v43  ;;  %v875_v15 = vmul.f32 %v874_v12, %v5685_v5  ;;  %v1187_v54 = vsel %vm500_vm0, %v5699_v38, 0.0 }
 0x16e   : > { %v2003_v3 = vmul.f32 %v2002_v46, %v1978_v39  ;;  %v856_v27 = vadd.f32 %v4511_v62, %v855_v63  ;;  %v886_v37 = vmul.f32 %v885_v31, %v5685_v5  ;;  %v2048_v32 = vmul.f32 2.1237322e-06, %v5728_v42 }
 0x16f   : > { %vm2034_vm1 = vweird.f32 %v5717_v58  ;;  %v2038_v13 = vand.u32 2147483647, %v5717_v58  ;;  %v876_v55 = vadd.f32 0.05243302, %v875_v15  ;;  %v2059_v53 = vmul.f32 3.8918573e-05, %v5728_v42 }
 0x170   : > { %v4513_v14 = vpop.eup %4512  ;;  %v860_v43 = vsel %vm5740_vm15, %v4511_v62, %v856_v27  ;;  %v887_v17 = vadd.f32 0.112945676, %v886_v37  ;;  %v2049_v21 = vadd.f32 0.00028619796, %v2048_v32  ;;  %v1217_v39 = vmul.f32 %v5665_v9, %v1216_v41  ;;  %v1207_v27 = vpop.xlane.xlu0 %1206 }
 0x171   : > { %v865_v1 = vsel %vm5721_vm13, %v864_v8, %v860_v43  ;;  %v2030_v26 = vmul.f32 %v4513_v14, %v5717_v58  ;;  %v2040_v59 = vand.u32 2147483648, %v5717_v58  ;;  %1188 = vadd.xlane.f32.xlu2 %v1187_v54  ;;  %v5761_v34 = vadd.f32 %v5529_v36, %v578_v35 }
 0x172   : > { %v4294_v28 = vclamps-f32 %v2003_v3, 1.0  ;;  %v2017_v44 = vadd.f32 1.1283791, %v2016_v52  ;;  %v877_v62 = vmul.f32 %v876_v55, %v5685_v5  ;;  %v888_v6 = vmul.f32 %v887_v17, %v5685_v5 }
 0x173   : > { %v2031_v2 = vsub.f32 1.0, %v2030_v26  ;;  %vm2035_vm2 = vweird.f32 %v4513_v14  ;;  %v2050_v61 = vmul.f32 %v2049_v21, %v5728_v42  ;;  %v2060_v10 = vadd.f32 0.001143296, %v2059_v53 }
 0x174   : > { %v866_v8 = vmul.f32 %v865_v1, %v841_v0  ;;  %v878_v12 = vadd.f32 0.18741608, %v877_v62  ;;  %v889_v48 = vadd.f32 0.4994258, %v888_v6  ;;  %v1218_v46 = vadd.f32 %v5665_v9, %v1217_v39  ;;  %vm5776_vm3 = vmor %vm2034_vm1, %vm2035_vm2  ;;  %v1532_v1 = vld [vmem:[%s8277_s5 + $0x50] sm:$0xff] }
 0x175   : > { %v2032_v63 = vmul.f32 %v4513_v14, %v2031_v2  ;;  %v2051_v31 = vadd.f32 0.0036580483, %v2050_v61  ;;  %v2061_v41 = vmul.f32 %v2060_v10, %v5728_v42  ;;  %v5770_v33 = vmul.f32 %v4971_v47, %v5761_v34  ;;  %4395 = vmatpush.msrb.mxu3 %v1532_v1  ;;  %1580 = vmatpush.msra.mxu1 %v1532_v1  ;;  %v581_v1 = vpop.f32.mrf.mxu0 }
 0x176   : > { %v1152_v52 = vadd.f32 1.0, %v4254_v49  ;;  %vm5780_vm4 = vcmp.eq.f32.partialorder %v2038_v13, 8.507059e+37  ;;  %v2041_v54 = vor.u32 1.1754944e-38, %v2040_v59  ;;  %v890_v3 = vmul.f32 %v889_v48, %v5685_v5 }
 0x177   : > { %v2033_v37 = vadd.f32 %v4513_v14, %v2032_v63  ;;  %v2052_v32 = vmul.f32 %v2051_v31, %v5728_v42  ;;  %v2062_v55 = vadd.f32 0.014752088, %v2061_v41  ;;  %v5789_v30 = vsel %vm1219_vm14, %v5665_v9, %v1218_v46 }
 0x178   : > { %8373 = vst [vmem:[#allocation13_spill] sm:$0xff] %v5789_v30  ;;  %v2330_v49 = vadd.f32 1.0, %v4294_v28  ;;  %v2018_v58 = vmul.f32 %v2017_v44, %v5596_v23  ;;  %v5792_v13 = vadd.f32 1.0, %v890_v3  ;;  %v909_v53 = vmul.f32 %v5770_v33, %v5770_v33  ;;  %v1279_v0 = vpop.xlane.xlu0 %1278 }
 0x179   : > { %v4256_v43 = vclamps-f32 %v866_v8, 1.0  ;;  %v2037_v17 = vsel %vm5776_vm3, %v4513_v14, %v2033_v37  ;;  %v879_v21 = vmul.f32 %v878_v12, %v5685_v5  ;;  %v2063_v39 = vmul.f32 %v2062_v55, %v5728_v42  ;;  %v1530_v12 = vld [vmem:[%s8277_s5 + $0x40] sm:$0xff] }
 0x17a   : > { %v5801_v35 = vmul.f32 %v1152_v52, %v5499_v18  ;;  %v2042_v9 = vsel %vm5780_vm4, %v2041_v54, %v2037_v17  ;;  %4514 = vrcp.f32 %v5792_v13  ;;  %v5807_v23 = vmul.f32 %v5789_v30, %v1207_v27  ;;  %v1528_v17 = vld [vmem:[%s8277_s5 + $0x30] sm:$0xff] }
 0x17b   : > { %v601_v14 = vmul.f32 0.5, %v5532_v22  ;;  %v5814_v5 = vmul.f32 0.5, %v5574_v16  ;;  %v5817_v18 = vmul.f32 0.5, %v5634_v29  ;;  %v2053_v26 = vadd.f32 0.05243302, %v2052_v32  ;;  %v1531_v22 = vld [vmem:[%s8277_s5 + $0x48] sm:$0xff] }
 0x17c   : > { %v5820_v59 = vmul.f32 0.5, %v5678_v19  ;;  %v2064_v28 = vadd.f32 0.112945676, %v2063_v39  ;;  %v5822_v44 = vmin.f32 %v909_v53, 16.0  ;;  %v3192_v62 = vmul.f32 %v5663_v7, %v5663_v7  ;;  %4396 = vmatpush.msrb.mxu3 %v1531_v22  ;;  %1581 = vmatpush.msra.mxu1 %v1531_v22  ;;  %v1529_v32 = vld [vmem:[%s8277_s5 + $0x38] sm:$0xff] }
 0x17d   : > { %v5830_v16 = vmul.f32 %v2330_v49, %v5657_v40  ;;  %v1154_v29 = vadd.f32 1.0, %v4256_v43  ;;  %v2043_v6 = vmul.f32 %v2042_v9, %v2018_v58  ;;  %v880_v2 = vadd.f32 1.1283791, %v879_v21  ;;  %v1210_v43 = vpop.xlane.xlu1 %1209 }
 0x17e   : > { %v2065_v19 = vmul.f32 %v2064_v28, %v5728_v42  ;;  %v1309_v61 = vmul.f32 %v5807_v23, %v5807_v23  ;;  %v911_v10 = vmul.f32 2.1237322e-06, %v5822_v44  ;;  %v922_v8 = vmul.f32 3.8918573e-05, %v5822_v44  ;;  %4397 = vmatpush.msrb.mxu3 %v1530_v12  ;;  %1582 = vmatpush.msra.mxu1 %v1530_v12 }
 0x17f   : > { %8374 = vst [vmem:[#allocation14_spill] sm:$0xff] %v5830_v16  ;;  %vm897_vm5 = vweird.f32 %v5792_v13  ;;  %v2054_v40 = vmul.f32 %v2053_v26, %v5728_v42  ;;  %v3211_v48 = vsel %vm3045_vm10, %v3192_v62, 0.0  ;;  %v1175_v46 = vsel %vm500_vm0, %v5469_v25, 0.0 }
 0x180   : > { %v5845_v63 = vpop.eup %4514  ;;  %v2066_v31 = vadd.f32 0.4994258, %v2065_v19  ;;  %v912_v41 = vadd.f32 0.00028619796, %v911_v10  ;;  %v923_v52 = vadd.f32 0.001143296, %v922_v8  ;;  %3212 = vadd.xlane.f32.xlu2 %v3211_v48  ;;  %1176 = vadd.xlane.f32.xlu0 %v1175_v46  ;;  %v1234_v15 = vmul.f32 %v5469_v25, %v5469_v25 }
 0x181   : > { %v4295_v54 = vclamps-f32 %v2043_v6, 1.0  ;;  %v893_v3 = vmul.f32 %v5845_v63, %v5792_v13  ;;  %v901_v27 = vand.u32 2147483647, %v5792_v13  ;;  %v903_v37 = vand.u32 2147483648, %v5792_v13  ;;  %4398 = vmatpush.msrb.mxu3 %v1529_v32  ;;  %1583 = vmatpush.msra.mxu1 %v1529_v32  ;;  %v1527_v6 = vld [vmem:[%s8277_s5 + $0x28] sm:$0xff] }
 0x182   : > { %v2067_v55 = vmul.f32 %v2066_v31, %v5728_v42  ;;  %v913_v49 = vmul.f32 %v912_v41, %v5822_v44  ;;  %v924_v58 = vmul.f32 %v923_v52, %v5822_v44  ;;  %v1247_v53 = vsel %vm500_vm0, %v1234_v15, 0.0 }
 0x183   : > { %v894_v21 = vsub.f32 1.0, %v893_v3  ;;  %vm898_vm6 = vweird.f32 %v5845_v63  ;;  %v2055_v39 = vadd.f32 0.18741608, %v2054_v40  ;;  %1248 = vadd.xlane.f32.xlu1 %v1247_v53  ;;  %v1296_v9 = vmul.f32 %v1279_v0, %v5789_v30  ;;  %4399 = vmatpush.msrb.mxu3 %v1528_v17  ;;  %v1525_v0 = vld [vmem:[%s8277_s5 + $0x18] sm:$0xff] }
 0x184   : > { %v5865_v26 = vadd.f32 1.0, %v2067_v55  ;;  %v914_v28 = vadd.f32 0.0036580483, %v913_v49  ;;  %v925_v62 = vadd.f32 0.014752088, %v924_v58  ;;  %v5868_v22 = vadd.f32 %v5529_v36, %v581_v1  ;;  %1584 = vmatpush.msra.mxu1 %v1528_v17  ;;  %vm5881_vm7 = vmor %vm897_vm5, %vm898_vm6 }
 0x185   : > { %v5873_v19 = vmul.f32 %v1154_v29, %v601_v14  ;;  %v881_v10 = vmul.f32 %v880_v2, %v5654_v50  ;;  %v895_v8 = vmul.f32 %v5845_v63, %v894_v21  ;;  %v1322_v12 = vsub.f32 %v1296_v9, %v1309_v61  ;;  %4400 = vmatpush.msrb.mxu3 %v1527_v6  ;;  %v1526_v50 = vld [vmem:[%s8277_s5 + $0x20] sm:$0xff] }
 0x186   : > { %v2331_v40 = vadd.f32 1.0, %v4295_v54  ;;  %vm5885_vm8 = vcmp.eq.f32.partialorder %v901_v27, 8.507059e+37  ;;  %v904_v14 = vor.u32 1.1754944e-38, %v903_v37  ;;  %4516 = vrcp.f32 %v5865_v26  ;;  %1585 = vmatpush.msra.mxu1 %v1527_v6 }
 0x187   : > { %v896_v29 = vadd.f32 %v5845_v63, %v895_v8  ;;  %v915_v13 = vmul.f32 %v914_v28, %v5822_v44  ;;  %v926_v2 = vmul.f32 %v925_v62, %v5822_v44  ;;  %v5896_v61 = vadd.f32 1e-12, %v1322_v12  ;;  %4401 = vmatpush.msrb.mxu3 %v1526_v50  ;;  %v1282_v28 = vpop.xlane.xlu1 %1281  ;;  %v1213_v8 = vpop.xlane.xlu2 %1212 }
 0x188   : > { %v2056_v31 = vmul.f32 %v2055_v39, %v5728_v42  ;;  %v1335_v41 = vsub.f32 %v5194_v24, %v5807_v23  ;;  %v5903_v52 = vmul.f32 %v4971_v47, %v5868_v22  ;;  %v3058_v15 = vsel %vm3045_vm10, %v5830_v16, 0.0  ;;  %1586 = vmatpush.msra.mxu1 %v1526_v50 }
 0x189   : > { %v900_v42 = vsel %vm5881_vm7, %v5845_v63, %v896_v29  ;;  %v916_v54 = vadd.f32 0.05243302, %v915_v13  ;;  %v927_v3 = vadd.f32 0.112945676, %v926_v2  ;;  %4518 = vrsqrt.f32 %v5896_v61  ;;  %3059 = vadd.xlane.f32.xlu2 %v3058_v15  ;;  %4402 = vmatpush.msrb.mxu3 %v1525_v0  ;;  %v1524_v63 = vld [vmem:[%s8277_s5 + $0x10] sm:$0xff]  ;;  %v1522_v13 = vld [vmem:[%s8277_s5] sm:$0xff] }
 0x18a   : > { %v905_v27 = vsel %vm5885_vm8, %v904_v14, %v900_v42  ;;  %v5917_v37 = vmul.f32 0.5, %v5761_v34  ;;  %v949_v32 = vmul.f32 %v5903_v52, %v5903_v52  ;;  %v1181_v55 = vsel %vm500_vm0, %v5354_v57, 0.0  ;;  %1587 = vmatpush.msra.mxu1 %v1525_v0 }
 0x18b   : > { %v5927_v49 = vmul.f32 %v2331_v40, %v5814_v5  ;;  %v906_v58 = vmul.f32 %v905_v27, %v881_v10  ;;  %v917_v53 = vmul.f32 %v916_v54, %v5822_v44  ;;  %v928_v34 = vmul.f32 %v927_v3, %v5822_v44  ;;  %1182 = vadd.xlane.f32.xlu1 %v1181_v55  ;;  %v1523_v5 = vld [vmem:[%s8277_s5 + $0x8] sm:$0xff] }
 0x18c   : > { %v5931_v17 = vpop.eup %4516  ;;  %v2057_v21 = vadd.f32 1.1283791, %v2056_v31  ;;  %v5934_v39 = vmul.f32 %v5789_v30, %v1210_v43  ;;  %v5936_v9 = vmin.f32 %v949_v32, 16.0  ;;  %v1235_v1 = vmul.f32 %v5315_v11, %v5315_v11  ;;  %4403 = vmatpush.msrb.mxu3 %v1524_v63  ;;  %1588 = vmatpush.msra.mxu1 %v1524_v63  ;;  %v4615_v32 = vld [vmem:[%s8278_s6 + $0x58] sm:$0xff] }
 0x18d   : > { %8379 = vst [vmem:[#allocation15_spill] sm:$0xff] %v5927_v49  ;;  %v4257_v62 = vclamps-f32 %v906_v58, 1.0  ;;  %v2070_v6 = vmul.f32 %v5931_v17, %v5865_v26  ;;  %v2078_v10 = vand.u32 2147483647, %v5865_v26  ;;  %v918_v43 = vadd.f32 0.18741608, %v917_v53 }
 0x18e   : > { %vm2074_vm9 = vweird.f32 %v5865_v26  ;;  %v929_v12 = vadd.f32 0.4994258, %v928_v34  ;;  %v951_v40 = vmul.f32 2.1237322e-06, %v5936_v9  ;;  %v962_v48 = vmul.f32 3.8918573e-05, %v5936_v9  ;;  %4404 = vmatpush.msrb.mxu3 %v1523_v5  ;;  %1589 = vmatpush.msra.mxu1 %v1523_v5 }
 0x18f   : > { %v5949_v46 = vpop.eup %4518  ;;  %v2071_v14 = vsub.f32 1.0, %v2070_v6  ;;  %vm2075_vm11 = vweird.f32 %v5931_v17  ;;  %v1250_v50 = vsel %vm500_vm0, %v1235_v1, 0.0  ;;  %v1297_v29 = vmul.f32 %v1282_v28, %v5789_v30 }
 0x190   : > { %v2080_v2 = vand.u32 2147483648, %v5865_v26  ;;  %v930_v31 = vmul.f32 %v929_v12, %v5822_v44  ;;  %v1452_v15 = vmul.f32 %v5949_v46, %v5896_v61  ;;  %v952_v0 = vadd.f32 0.00028619796, %v951_v40  ;;  %1251 = vadd.xlane.f32.xlu0 %v1250_v50  ;;  %4405 = vmatpush.msrb.mxu3 %v1522_v13  ;;  %vm5972_vm12 = vmor %vm2074_vm9, %vm2075_vm11  ;;  %v4616_v26 = vld [vmem:[%s8278_s6 + $0x50] sm:$0xff]  ;;  %v4617_v50 = vld [vmem:[%s8278_s6 + $0x48] sm:$0xff] }
 0x191   : > { %v2072_v42 = vmul.f32 %v5931_v17, %v2071_v14  ;;  %v919_v54 = vmul.f32 %v918_v43, %v5822_v44  ;;  %v1310_v3 = vmul.f32 %v5934_v39, %v5934_v39  ;;  %v963_v27 = vadd.f32 0.001143296, %v962_v48  ;;  %1590 = vmatpush.msra.mxu1 %v1522_v13  ;;  %v584_v14 = vpop.f32.mrf.mxu0 }
 0x192   : > { %4406 = vmatpush.msra.mxu3 %v4615_v32  ;;  %v1155_v55 = vadd.f32 1.0, %v4257_v62  ;;  %v5976_v44 = vadd.f32 1.0, %v930_v31  ;;  %v953_v58 = vmul.f32 %v952_v0, %v5936_v9  ;;  %v5980_v53 = vmul.f32 %v5789_v30, %v1213_v8 }
 0x193   : > { %v2073_v34 = vadd.f32 %v5931_v17, %v2072_v42  ;;  %v1453_v1 = vmul.f32 %v5949_v46, %v1452_v15  ;;  %v964_v28 = vmul.f32 %v963_v27, %v5936_v9  ;;  %v1323_v5 = vsub.f32 %v1297_v29, %v1310_v3  ;;  %v1285_v15 = vpop.xlane.xlu2 %1284 }
 0x194   : > { %4407 = vmatpush.msra.mxu3 %v4616_v26  ;;  %v2058_v62 = vmul.f32 %v2057_v21, %v5695_v4  ;;  %vm5989_vm13 = vcmp.eq.f32.partialorder %v2078_v10, 8.507059e+37  ;;  %v2081_v43 = vor.u32 1.1754944e-38, %v2080_v2  ;;  %4520 = vrcp.f32 %v5976_v44 }
 0x195   : > { %v2077_v8 = vsel %vm5972_vm12, %v5931_v17, %v2073_v34  ;;  %v920_v12 = vadd.f32 1.1283791, %v919_v54  ;;  %v954_v40 = vadd.f32 0.0036580483, %v953_v58  ;;  %v965_v48 = vadd.f32 0.014752088, %v964_v28 }
 0x196   : > { %4408 = vmatpush.msra.mxu3 %v4617_v50  ;;  %v6001_v4 = vmul.f32 %v1155_v55, %v5817_v18  ;;  %v1336_v21 = vsub.f32 %v5225_v56, %v5934_v39  ;;  %v1311_v10 = vmul.f32 %v5980_v53, %v5980_v53  ;;  %v6007_v29 = vadd.f32 1e-12, %v1323_v5  ;;  %v4618_v18 = vld [vmem:[%s8278_s6 + $0x40] sm:$0xff]  ;;  %v4619_v55 = vld [vmem:[%s8278_s6 + $0x38] sm:$0xff]  ;;  %v4624_v5 = vld [vmem:[%s8278_s6 + $0x10] sm:$0xff] }
 0x197   : > { %v941_v17 = vand.u32 2147483647, %v5976_v44  ;;  %v1454_v13 = vmul.f32 0.5, %v1453_v1  ;;  %v955_v2 = vmul.f32 %v954_v40, %v5936_v9  ;;  %v966_v31 = vmul.f32 %v965_v48, %v5936_v9 }
 0x198   : > { %4409 = vmatpush.msra.mxu3 %v4618_v18  ;;  %v2082_v0 = vsel %vm5989_vm13, %v2081_v43, %v2077_v8  ;;  %4522 = vrsqrt.f32 %v6007_v29  ;;  %v6019_v42 = vadd.f32 %v5529_v36, %v584_v14  ;;  %v3193_v54 = vmul.f32 %v5830_v16, %v5830_v16 }
 0x199   : > { %v6024_v3 = vmul.f32 %v920_v12, %v5770_v33  ;;  %vm937_vm14 = vweird.f32 %v5976_v44  ;;  %vm1458_vm15 = vweird.f32 %v5949_v46  ;;  %v956_v27 = vadd.f32 0.05243302, %v955_v2  ;;  %v4620_v12 = vld [vmem:[%s8278_s6 + $0x30] sm:$0xff] }
 0x19a   : > { %v967_v32 = vadd.f32 0.112945676, %v966_v31  ;;  %4410 = vmatpush.msra.mxu3 %v4619_v55  ;;  %v4521_v63 = vpop.eup %4520  ;;  %v6033_v36 = vmul.f32 %v4971_v47, %v6019_v42  ;;  %v3214_v58 = vsel %vm3045_vm10, %v3193_v54, 0.0  ;;  %v3046_v33 = vsel %vm3045_vm10, %v5482_v60, 0.0 }
 0x19b   : > { %v1298_v34 = vmul.f32 %v1285_v15, %v5789_v30  ;;  %v2083_v1 = vmul.f32 %v2082_v0, %v2058_v62  ;;  %v933_v28 = vmul.f32 %v4521_v63, %v5976_v44  ;;  %vm6040_vm1 = vcmp.eq.f32.partialorder %v941_v17, 8.507059e+37  ;;  %3215 = vadd.xlane.f32.xlu2 %v3214_v58  ;;  %3047 = vadd.xlane.f32.xlu1 %v3046_v33  ;;  %v4621_v15 = vld [vmem:[%s8278_s6 + $0x28] sm:$0xff] }
 0x19c   : > { %v943_v26 = vand.u32 2147483648, %v5976_v44  ;;  %vm1457_vm2 = vweird.f32 %v5896_v61  ;;  %v1455_v6 = vsub.f32 1.5, %v1454_v13  ;;  %v957_v43 = vmul.f32 %v956_v27, %v5936_v9  ;;  %4411 = vmatpush.msra.mxu3 %v4620_v12 }
 0x19d   : > { %v968_v8 = vmul.f32 %v967_v32, %v5936_v9  ;;  %v989_v62 = vmul.f32 %v6033_v36, %v6033_v36  ;;  %v934_v40 = vsub.f32 1.0, %v933_v28  ;;  %vm938_vm3 = vweird.f32 %v4521_v63  ;;  %v4622_v28 = vld [vmem:[%s8278_s6 + $0x20] sm:$0xff]  ;;  %vm6103_vm5 = vmor %vm1457_vm2, %vm1458_vm15 }
 0x19e   : > { %v1324_v48 = vsub.f32 %v1298_v34, %v1311_v10  ;;  %v1239_v14 = vmul.f32 %v5873_v19, %v5873_v19  ;;  %v6055_v50 = vpop.eup %4522  ;;  %v958_v17 = vadd.f32 0.18741608, %v957_v43  ;;  %v1184_v31 = vsel %vm500_vm0, %v5801_v35, 0.0  ;;  %4412 = vmatpush.msra.mxu3 %v4621_v15  ;;  %vm6071_vm4 = vmor %vm937_vm14, %vm938_vm3  ;;  %v6078_v34 = vpop.xlane.xlu2 %1179 }
 0x19f   : > { %v969_v13 = vadd.f32 0.4994258, %v968_v8  ;;  %v6057_v2 = vmin.f32 %v989_v62, 16.0  ;;  %v935_v18 = vmul.f32 %v4521_v63, %v934_v40  ;;  %v944_v0 = vor.u32 1.1754944e-38, %v943_v26  ;;  %1185 = vadd.xlane.f32.xlu0 %v1184_v31  ;;  %v4623_v40 = vld [vmem:[%s8278_s6 + $0x18] sm:$0xff] }
 0x1a0   : > { %v1462_v10 = vmul.f32 %v6055_v50, %v6007_v29  ;;  %v6066_v54 = vadd.f32 1e-12, %v1324_v48  ;;  %v4296_v27 = vclamps-f32 %v2083_v1, 1.0  ;;  %4413 = vmatpush.msra.mxu3 %v4622_v28  ;;  %v1456_v44 = vmul.f32 %v5949_v46, %v1455_v6 }
 0x1a1   : > { %v970_v55 = vmul.f32 %v969_v13, %v5936_v9  ;;  %v991_v58 = vmul.f32 2.1237322e-06, %v6057_v2  ;;  %v1002_v33 = vmul.f32 3.8918573e-05, %v6057_v2  ;;  %v936_v1 = vadd.f32 %v4521_v63, %v935_v18 }
 0x1a2   : > { %v1463_v26 = vmul.f32 %v6055_v50, %v1462_v10  ;;  %4524 = vrsqrt.f32 %v6066_v54  ;;  %v959_v43 = vmul.f32 %v958_v17, %v5936_v9  ;;  %v1262_v12 = vsel %vm500_vm0, %v1239_v14, 0.0  ;;  %4414 = vmatpush.msra.mxu3 %v4623_v40 }
 0x1a3   : > { %v6087_v8 = vadd.f32 1.0, %v970_v55  ;;  %v992_v62 = vadd.f32 0.00028619796, %v991_v58  ;;  %v940_v48 = vsel %vm6071_vm4, %v4521_v63, %v936_v1  ;;  %v1003_v13 = vadd.f32 0.001143296, %v1002_v33  ;;  %1263 = vadd.xlane.f32.xlu2 %v1262_v12 }
 0x1a4   : > { %v1464_v6 = vmul.f32 0.5, %v1463_v26  ;;  %v1237_v31 = vmul.f32 %v5801_v35, %v5801_v35  ;;  %v945_v9 = vsel %vm6040_vm1, %v944_v0, %v940_v48  ;;  %v1337_v63 = vsub.f32 %v5249_v51, %v5980_v53  ;;  %4415 = vmatpush.msra.mxu3 %v4624_v5  ;;  %v6151_v48 = vld [vmem:[%s8319_s4 + $0x2] ss:$0 sm:$0xff]  ;;  %v2359_v51 = vld [vmem:[%s8279_s7 + $0x38] sm:$0xff] }
 0x1a5   : > { %4526 = vrcp.f32 %v6087_v8  ;;  %vm1467_vm6 = vweird.f32 %v6007_v29  ;;  %v6114_v17 = vadd.f32 1.0, %v4296_v27  ;;  %v946_v61 = vmul.f32 %v945_v9, %v6024_v3  ;;  %v6127_v27 = vld [vmem:[%s8319_s4 + $0x1] ss:$0 sm:$0xff]  ;;  %v4625_v3 = vld [vmem:[%s8278_s6 + $0x8] sm:$0xff] }
 0x1a6   : > { %v1460_v15 = vsel %vm6103_vm5, %v5949_v46, %v1456_v44  ;;  %v1465_v18 = vsub.f32 1.5, %v1464_v6  ;;  %vm1468_vm7 = vweird.f32 %v6055_v50  ;;  %v993_v0 = vmul.f32 %v992_v62, %v6057_v2  ;;  %4416 = vmatpush.msra.mxu3 %v4625_v3  ;;  %v4626_v62 = vld [vmem:[%s8278_s6] sm:$0xff]  ;;  %v6159_v5 = vpop.xlane.xlu2 %1254 }
 0x1a7   : > { %v1004_v10 = vmul.f32 %v1003_v13, %v6057_v2  ;;  %v1256_v32 = vsel %vm500_vm0, %v1237_v31, 0.0  ;;  %v4258_v55 = vclamps-f32 %v946_v61, 1.0  ;;  %v960_v58 = vadd.f32 1.1283791, %v959_v43  ;;  %vm1469_vm11 = vmor %vm1467_vm6, %vm1468_vm7 }
 0x1a8   : > { %v6132_v46 = vpop.eup %4524  ;;  %vm977_vm8 = vweird.f32 %v6087_v8  ;;  %v981_v33 = vand.u32 2147483647, %v6087_v8  ;;  %1257 = vadd.xlane.f32.xlu1 %v1256_v32  ;;  %v994_v28 = vadd.f32 0.0036580483, %v993_v0  ;;  %v3061_v26 = vsel %vm3045_vm10, %v5927_v49, 0.0  ;;  %4417 = vmatpush.msra.mxu3 %v4626_v62 }
 0x1a9   : > { %v1005_v1 = vadd.f32 0.014752088, %v1004_v10  ;;  %v1472_v44 = vmul.f32 %v6132_v46, %v6066_v54  ;;  %v983_v43 = vand.u32 2147483648, %v6087_v8  ;;  %v1466_v12 = vmul.f32 %v6055_v50, %v1465_v18 }
 0x1aa   : > { %v1491_v40 = vmul.f32 %v1460_v15, %v1335_v41  ;;  %v1238_v6 = vmul.f32 %v5699_v38, %v5699_v38  ;;  %v995_v31 = vmul.f32 %v994_v28, %v6057_v2  ;;  %vm1478_vm9 = vweird.f32 %v6132_v46  ;;  %v2363_v28 = vld [vmem:[%s8279_s7 + $0x58] sm:$0xff] }
 0x1ab   : > { %v4527_v13 = vpop.eup %4526  ;;  %v1006_v9 = vmul.f32 %v1005_v1, %v6057_v2  ;;  %v1473_v14 = vmul.f32 %v6132_v46, %v1472_v44  ;;  %v1156_v24 = vadd.f32 1.0, %v4258_v55  ;;  %3062 = vadd.xlane.f32.xlu2 %v3061_v26  ;;  %v3194_v61 = vmul.f32 %v5927_v49, %v5927_v49 }
 0x1ac   : > { %v973_v23 = vmul.f32 %v4527_v13, %v6087_v8  ;;  %v1505_v41 = vmul.f32 %v6127_v27, %v1491_v40  ;;  %v1259_v0 = vsel %vm500_vm0, %v1238_v6, 0.0  ;;  %v1190_v10 = vsel %vm500_vm0, %v5873_v19, 0.0 }
 0x1ad   : > { %v1007_v15 = vadd.f32 0.112945676, %v1006_v9  ;;  %v1474_v18 = vmul.f32 0.5, %v1473_v14  ;;  %vm978_vm12 = vweird.f32 %v4527_v13  ;;  %1260 = vadd.xlane.f32.xlu0 %v1259_v0  ;;  %v1470_v55 = vsel %vm1469_vm11, %v6055_v50, %v1466_v12  ;;  %v2362_v50 = vld [vmem:[%s8279_s7 + $0x50] sm:$0xff] }
 0x1ae   : > { %v974_v32 = vsub.f32 1.0, %v973_v23  ;;  %v1519_v3 = vadd.f32 %v6151_v48, %v1505_v41  ;;  %v996_v29 = vadd.f32 0.05243302, %v995_v31  ;;  %v1492_v26 = vmul.f32 %v1470_v55, %v1336_v21  ;;  %vm6190_vm14 = vmor %vm977_vm8, %vm978_vm12  ;;  %v2360_v41 = vld [vmem:[%s8279_s7 + $0x40] sm:$0xff] }
 0x1af   : > { %v1008_v1 = vmul.f32 %v1007_v15, %v6057_v2  ;;  %v1475_v44 = vsub.f32 1.5, %v1474_v18  ;;  %v961_v62 = vmul.f32 %v960_v58, %v5903_v52  ;;  %v984_v6 = vor.u32 1.1754944e-38, %v983_v43  ;;  %v2361_v43 = vld [vmem:[%s8279_s7 + $0x48] sm:$0xff] }
 0x1b0   : > { %v975_v40 = vmul.f32 %v4527_v13, %v974_v32  ;;  %vm1477_vm13 = vweird.f32 %v6066_v54  ;;  %4274 = vmatmul.msk.f32.vlgmr.msrb.gmra.mxu3 %vm500_vm0, %v1519_v3  ;;  %1191 = vadd.xlane.f32.xlu1 %v1190_v10  ;;  %v3217_v39 = vsel %vm3045_vm10, %v3194_v61, 0.0  ;;  %v1506_v21 = vmul.f32 %v6127_v27, %v1492_v26  ;;  %v2358_v32 = vld [vmem:[%s8279_s7 + $0x30] sm:$0xff]  ;;  %v2356_v26 = vld [vmem:[%s8279_s7 + $0x20] sm:$0xff] }
 0x1b1   : > { %v1009_v56 = vadd.f32 0.4994258, %v1008_v1  ;;  %v1476_v52 = vmul.f32 %v6132_v46, %v1475_v44  ;;  %2408 = vmatpush.msrb.mxu3 %v2363_v28  ;;  %v6198_v54 = vmul.f32 %v1156_v24, %v5917_v37  ;;  %vm982_vm15 = vcmp.eq.f32.partialorder %v981_v33, 8.507059e+37  ;;  %vm1479_vm1 = vmor %vm1477_vm13, %vm1478_vm9  ;;  %v2357_v28 = vld [vmem:[%s8279_s7 + $0x28] sm:$0xff] }
 0x1b2   : > { %v976_v58 = vadd.f32 %v4527_v13, %v975_v40  ;;  %v1240_v8 = vmul.f32 %v6001_v4, %v6001_v4  ;;  %v997_v31 = vmul.f32 %v996_v29, %v6057_v2  ;;  %v1193_v37 = vsel %vm500_vm0, %v6001_v4, 0.0 }
 0x1b3   : > { %v1010_v9 = vmul.f32 %v1009_v56, %v6057_v2  ;;  %v1480_v14 = vsel %vm1479_vm1, %v6132_v46, %v1476_v52  ;;  %2409 = vmatpush.msrb.mxu3 %v2362_v50  ;;  %3218 = vadd.xlane.f32.xlu2 %v3217_v39  ;;  %v1520_v24 = vadd.f32 %v6151_v48, %v1506_v21  ;;  %v2354_v21 = vld [vmem:[%s8279_s7 + $0x10] sm:$0xff] }
 0x1b4   : > { %v980_v33 = vsel %vm6190_vm14, %v4527_v13, %v976_v58  ;;  %v1493_v23 = vmul.f32 %v1480_v14, %v1337_v63  ;;  %v6223_v61 = vmul.f32 %v6114_v17, %v5820_v59  ;;  %v1265_v18 = vsel %vm500_vm0, %v1240_v8, 0.0  ;;  %v6226_v13 = vpop.xlane.xlu2 %3203  ;;  %v2352_v14 = vld [vmem:[%s8279_s7] sm:$0xff] }
 0x1b5   : > { %v985_v46 = vsel %vm982_vm15, %v984_v6, %v980_v33  ;;  %v1011_v15 = vadd.f32 1.0, %v1010_v9  ;;  %8392 = vst [vmem:[#allocation16_spill] sm:$0xff] %v6226_v13  ;;  %2410 = vmatpush.msrb.mxu3 %v2361_v43  ;;  %1194 = vadd.xlane.f32.xlu0 %v1193_v37  ;;  %v998_v53 = vadd.f32 0.18741608, %v997_v31  ;;  %v1241_v63 = vmul.f32 %v6198_v54, %v6198_v54  ;;  %v2353_v43 = vld [vmem:[%s8279_s7 + $0x8] sm:$0xff]  ;;  %v1654_v33 = vld [vmem:[%s4935_s26 + $0x50] sm:$0xff] }
 0x1b6   : > { %v986_v0 = vmul.f32 %v985_v46, %v961_v62  ;;  %v604_v59 = vmul.f32 0.5, %v5868_v22  ;;  %v1507_v10 = vmul.f32 %v6127_v27, %v1493_v23  ;;  %v3064_v3 = vsel %vm3045_vm10, %v6223_v61, 0.0 }
 0x1b7   : > { %4528 = vrcp.f32 %v1011_v15  ;;  %2411 = vmatpush.msrb.mxu3 %v2360_v41  ;;  %v999_v22 = vmul.f32 %v998_v53, %v6057_v2  ;;  %v1268_v29 = vsel %vm500_vm0, %v1241_v63, 0.0  ;;  %v2355_v2 = vld [vmem:[%s8279_s7 + $0x18] sm:$0xff]  ;;  %v1023_v12 = vand.u32 2147483648, %v1011_v15 }
 0x1b8   : > { %v4259_v17 = vclamps-f32 %v986_v0, 1.0  ;;  %4275 = vmatmul.msk.f32.gmra.mxu3 %vm500_vm0, %v1520_v24  ;;  %1266 = vadd.xlane.f32.xlu1 %v1265_v18  ;;  %v1521_v44 = vadd.f32 %v6151_v48, %v1507_v10  ;;  %vm1017_vm2 = vweird.f32 %v1011_v15  ;;  %v1021_v39 = vand.u32 2147483647, %v1011_v15  ;;  %v1655_v63 = vld [vmem:[%s4935_s26 + $0x58] sm:$0xff] }
 0x1b9   : > { %2412 = vmatpush.msrb.mxu3 %v2359_v51  ;;  %v1000_v50 = vadd.f32 1.1283791, %v999_v22  ;;  %v1196_v58 = vsel %vm500_vm0, %v6198_v54, 0.0  ;;  %v1024_v31 = vor.u32 1.1754944e-38, %v1023_v12  ;;  %v605_v0 = vmul.f32 0.5, %v6019_v42  ;;  %v1656_v42 = vld [vmem:[%s4935_s26 + $0x60] sm:$0xff] }
 0x1ba   : > { %v1157_v55 = vadd.f32 1.0, %v4259_v17  ;;  %vm1022_vm5 = vcmp.eq.f32.partialorder %v1021_v39, 8.507059e+37 }
 0x1bb   : > { %2413 = vmatpush.msrb.mxu3 %v2358_v32  ;;  %3065 = vadd.xlane.f32.xlu2 %v3064_v3  ;;  %v1001_v9 = vmul.f32 %v1000_v50, %v6033_v36  ;;  %v1651_v36 = vld [vmem:[%s4935_s26 + $0x38] sm:$0xff] }
 0x1bc   : > { %v6246_v1 = vmul.f32 %v1157_v55, %v604_v59  ;;  %v6257_v56 = vpop.xlane.xlu2 %3050  ;;  %4284 = vmatmul.msk.f32.gmra.mxu2 %vm500_vm0, %v1651_v36  ;;  %v1652_v55 = vld [vmem:[%s4935_s26 + $0x40] sm:$0xff]  ;;  %v1662_v36 = vld [vmem:[%s6301_s23 + $0x28] sm:$0xff] }
 0x1bd   : > { %v4529_v62 = vpop.eup %4528  ;;  %2414 = vmatpush.msrb.mxu3 %v2357_v28  ;;  %1269 = vadd.xlane.f32.xlu0 %v1268_v29  ;;  %8393 = vst [vmem:[#allocation17_spill] sm:$0xff] %v6257_v56  ;;  %v1657_v28 = vld [vmem:[%s6301_s23] sm:$0xff]  ;;  %v1658_v29 = vld [vmem:[%s6301_s23 + $0x8] sm:$0xff] }
 0x1be   : > { %v1013_v40 = vmul.f32 %v4529_v62, %v1011_v15  ;;  %v1199_v6 = vsel %vm500_vm0, %v6246_v1, 0.0  ;;  %vm1018_vm3 = vweird.f32 %v4529_v62  ;;  %v1242_v24 = vmul.f32 %v6246_v1, %v6246_v1 }
 0x1bf   : > { %2415 = vmatpush.msrb.mxu3 %v2356_v26  ;;  %vm1019_vm4 = vmor %vm1017_vm2, %vm1018_vm3  ;;  %v1659_v26 = vld [vmem:[%s6301_s23 + $0x10] sm:$0xff] }
 0x1c0   : > { %v1014_v52 = vsub.f32 1.0, %v1013_v40  ;;  %4276 = vmatmul.msk.f32.gmra.mxu3 %vm500_vm0, %v1521_v44  ;;  %1200 = vadd.xlane.f32.xlu1 %v1199_v6  ;;  %v1271_v15 = vsel %vm500_vm0, %v1242_v24, 0.0 }
 0x1c1   : > { %2416 = vmatpush.msrb.mxu3 %v2355_v2  ;;  %v1660_v2 = vld [vmem:[%s6301_s23 + $0x18] sm:$0xff] }
 0x1c2   : > { %v1015_v8 = vmul.f32 %v4529_v62, %v1014_v52 }
 0x1c3   : > { %2417 = vmatpush.msrb.mxu3 %v2354_v21  ;;  %1197 = vadd.xlane.f32.xlu2 %v1196_v58 }
 0x1c4   : > { %v1016_v37 = vadd.f32 %v4529_v62, %v1015_v8  ;;  %v6278_v18 = vpop.xlane.xlu2 %3206  ;;  %4285 = vmatmul.msk.f32.gmra.mxu2 %vm500_vm0, %v1652_v55  ;;  %v1663_v55 = vld [vmem:[%s6301_s23 + $0x30] sm:$0xff] }
 0x1c5   : > { %2418 = vmatpush.msrb.mxu3 %v2353_v43  ;;  %8394 = vst [vmem:[#allocation18_spill] sm:$0xff] %v6278_v18  ;;  %v1661_v43 = vld [vmem:[%s6301_s23 + $0x20] sm:$0xff] }
 0x1c6   : > { %v1020_v23 = vsel %vm1019_vm4, %v4529_v62, %v1016_v37  ;;  %v1653_v62 = vld [vmem:[%s4935_s26 + $0x48] sm:$0xff]  ;;  %v1288_v37 = vmul.f32 %v6159_v5, %v5789_v30  ;;  %s4418_s26 = smul.u32 104, %s6404_s29 }
 0x1c7   : > { %v1025_v41 = vsel %vm1022_vm5, %v1024_v31, %v1020_v23  ;;  %2419 = vmatpush.msrb.mxu3 %v2352_v14  ;;  %v6326_v31 = vmul.f32 %v5789_v30, %v6078_v34 }
 0x1c8   : > { %v1026_v46 = vmul.f32 %v1025_v41, %v1001_v9  ;;  %4287 = vmatmul.msk.f32.vlgmr.msra.gmra.mxu3 %vm500_vm0, %v1654_v33  ;;  %s6429_s19 = scalar_lea.vmem [#allocation2], %s4418_s26  ;;  %s8109_s17 = scalar_lea.vmem [#allocation4], %s4418_s26 }
 0x1c9   : > { %v1300_v24 = vmul.f32 %v6326_v31, %v6326_v31  ;;  %s4092_s30 = sshll.u32 %s6429_s19, 4  ;;  %s4075_s26 = scalar_lea.sflag [#allocation3], %s6404_s29  ;;  %s4093_s30 = int_to_ptr.vmem [resolvable:$true] %s4092_s30 }
 0x1ca   : > { %v4260_v51 = vclamps-f32 %v1026_v46, 1.0 }
 0x1cb   : > { %1272 = vadd.xlane.f32.xlu2 %v1271_v15 }
 0x1cc   : > { %v1158_v53 = vadd.f32 1.0, %v4260_v51  ;;  %v6290_v32 = vpop.xlane.xlu2 %3053  ;;  %4286 = vmatmul.msk.f32.gmra.mxu2 %vm500_vm0, %v1653_v62 }
 0x1cd   : > { %8395 = vst [vmem:[#allocation19_spill] sm:$0xff] %v6290_v32 }
 0x1ce   : > { %v6283_v59 = vmul.f32 %v1158_v53, %v605_v0 }
 0x1d0   : > { %4288 = vmatmul.msk.f32.gmra.mxu3 %vm500_vm0, %v1655_v63  ;;  %v1202_v17 = vsel %vm500_vm0, %v6283_v59, 0.0  ;;  %v1243_v10 = vmul.f32 %v6283_v59, %v6283_v59 }
 0x1d1   : > { %1203 = vadd.xlane.f32.xlu0 %v1202_v17 }
 0x1d2   : > { %v1274_v3 = vsel %vm500_vm0, %v1243_v10, 0.0 }
 0x1d4   : > { %v6304_v22 = vpop.xlane.xlu2 %3209 }
 0x1d5   : > { %8397 = vst [vmem:[#allocation20_spill] sm:$0xff] %v6304_v22 }
 0x1d8   : > { %4289 = vmatmul.msk.f32.gmra.mxu3 %vm500_vm0, %v1656_v42 }
 0x1d9   : > { %1275 = vadd.xlane.f32.xlu0 %v1274_v3 }
 0x1dc   : > { %v6308_v44 = vpop.xlane.xlu2 %3056 }
 0x1dd   : > { %8398 = vst [vmem:[#allocation21_spill] sm:$0xff] %v6308_v44 }
 0x1e0   : > { %4303 = vmatmul.msk.f32.vlgmr.msrb.gmra.mxu3 %vm500_vm0, %v1657_v28 }
 0x1e4   : > { %v6314_v40 = vpop.xlane.xlu2 %1188 }
 0x1e8   : > { %4304 = vmatmul.msk.f32.gmra.mxu3 %vm500_vm0, %v1658_v29 }
 0x1f0   : > { %4305 = vmatmul.msk.f32.gmra.mxu3 %vm500_vm0, %v1659_v26 }
 0x1f3   : > { %v1177_v6 = vpop.xlane.xlu0 %1176  ;;  %v6321_v58 = vpop.xlane.xlu2 %3212 }
 0x1f4   : > { %v1221_v50 = vmul.f32 %v5789_v30, %v1177_v6  ;;  %8399 = vst [vmem:[#allocation22_spill] sm:$0xff] %v6321_v58 }
 0x1f6   : > { %v1299_v12 = vmul.f32 %v1221_v50, %v1221_v50  ;;  %v1249_v52 = vpop.xlane.xlu1 %1248  ;;  %v1325_v42 = vsub.f32 %v5469_v25, %v1221_v50 }
 0x1f7   : > { %v1286_v39 = vmul.f32 %v1249_v52, %v5789_v30 }
 0x1f8   : > { %4306 = vmatmul.msk.f32.gmra.mxu3 %vm500_vm0, %v1660_v2 }
 0x1f9   : > { %v1312_v21 = vsub.f32 %v1286_v39, %v1299_v12 }
 0x1fb   : > { %v1338_v8 = vadd.f32 1e-12, %v1312_v21 }
 0x1fc   : > { %v6339_v15 = vpop.xlane.xlu2 %3059 }
 0x1fd   : > { %4530 = vrsqrt.f32 %v1338_v8  ;;  %8400 = vst [vmem:[#allocation23_spill] sm:$0xff] %v6339_v15  ;;  %vm1357_vm6 = vweird.f32 %v1338_v8 }
 0x1fe   : > { %v1183_v9 = vpop.xlane.xlu1 %1182 }
 0x1ff   : > { %v6332_v14 = vmul.f32 %v5789_v30, %v1183_v9 }
 0x200   : > { %4307 = vmatmul.msk.f32.gmra.mxu3 %vm500_vm0, %v1661_v43 }
 0x201   : > { %v1301_v33 = vmul.f32 %v6332_v14, %v6332_v14 }
 0x203   : > { %v4531_v23 = vpop.eup %4530  ;;  %v1314_v41 = vsub.f32 %v1288_v37, %v1301_v33  ;;  %v1252_v46 = vpop.xlane.xlu0 %1251  ;;  %v1664_v37 = vld [vmem:[%s6301_s23 + $0x38] sm:$0xff] }
 0x204   : > { %v1352_v34 = vmul.f32 %v4531_v23, %v1338_v8  ;;  %v1287_v5 = vmul.f32 %v1252_v46, %v5789_v30  ;;  %vm1358_vm7 = vweird.f32 %v4531_v23 }
 0x205   : > { %v1340_v0 = vadd.f32 1e-12, %v1314_v41  ;;  %vm1359_vm8 = vmor %vm1357_vm6, %vm1358_vm7 }
 0x206   : > { %v1353_v51 = vmul.f32 %v4531_v23, %v1352_v34  ;;  %v1313_v53 = vsub.f32 %v1287_v5, %v1300_v24 }
 0x207   : > { %4532 = vrsqrt.f32 %v1340_v0  ;;  %vm1377_vm9 = vweird.f32 %v1340_v0 }
 0x208   : > { %4308 = vmatmul.msk.f32.gmra.mxu3 %vm500_vm0, %v1662_v36  ;;  %v1354_v63 = vmul.f32 0.5, %v1353_v51  ;;  %v1339_v17 = vadd.f32 1e-12, %v1313_v53  ;;  %v1326_v36 = vsub.f32 %v5315_v11, %v6326_v31  ;;  %v1327_v51 = vsub.f32 %v5354_v57, %v6332_v14  ;;  %v1665_v11 = vld [vmem:[%s6301_s23 + $0x40] sm:$0xff] }
 0x20a   : > { %v1355_v10 = vsub.f32 1.5, %v1354_v63  ;;  %4534 = vrsqrt.f32 %v1339_v17  ;;  %vm1367_vm12 = vweird.f32 %v1339_v17  ;;  %v6370_v63 = vmul.f32 %v5789_v30, %v6314_v40 }
 0x20c   : > { %v1356_v3 = vmul.f32 %v4531_v23, %v1355_v10  ;;  %v1303_v14 = vmul.f32 %v6370_v63, %v6370_v63 }
 0x20d   : > { %v4533_v28 = vpop.eup %4532 }
 0x20e   : > { %v1372_v29 = vmul.f32 %v4533_v28, %v1340_v0  ;;  %v6345_v26 = vpop.xlane.xlu2 %3215  ;;  %v1360_v62 = vsel %vm1359_vm8, %v4531_v23, %v1356_v3  ;;  %v6348_v52 = vpop.xlane.xlu1 %3047  ;;  %vm1378_vm11 = vweird.f32 %v4533_v28 }
 0x20f   : > { %8401 = vst [vmem:[#allocation24_spill] sm:$0xff] %v6345_v26  ;;  %v1481_v6 = vmul.f32 %v1360_v62, %v1325_v42  ;;  %vm6357_vm14 = vmor %vm1377_vm9, %vm1378_vm11 }
 0x210   : > { %4309 = vmatmul.msk.f32.gmra.mxu3 %vm500_vm0, %v1663_v55  ;;  %v4535_v2 = vpop.eup %4534  ;;  %v1373_v12 = vmul.f32 %v4533_v28, %v1372_v29  ;;  %8402 = vst [vmem:[#allocation25_spill] sm:$0xff] %v6348_v52 }
 0x211   : > { %v1362_v39 = vmul.f32 %v4535_v2, %v1339_v17  ;;  %v1495_v21 = vmul.f32 %v6127_v27, %v1481_v6  ;;  %vm1368_vm13 = vweird.f32 %v4535_v2 }
 0x212   : > { %v1374_v25 = vmul.f32 0.5, %v1373_v12  ;;  %v1186_v50 = vpop.xlane.xlu0 %1185  ;;  %vm1369_vm15 = vmor %vm1367_vm12, %vm1368_vm13 }
 0x213   : > { %v1363_v8 = vmul.f32 %v4535_v2, %v1362_v39  ;;  %v1509_v43 = vadd.f32 %v6151_v48, %v1495_v21  ;;  %v6354_v24 = vmul.f32 %v5789_v30, %v1186_v50  ;;  %v1666_v50 = vld [vmem:[%s6301_s23 + $0x48] sm:$0xff] }
 0x214   : > { %v1375_v9 = vsub.f32 1.5, %v1374_v25 }
 0x215   : > { %v1364_v33 = vmul.f32 0.5, %v1363_v8  ;;  %4264 = vmatmul.msk.f32.vlgmr.msra.gmra.mxu1 %vm500_vm0, %v1509_v43  ;;  %v1302_v0 = vmul.f32 %v6354_v24, %v6354_v24 }
 0x216   : > { %v1264_v23 = vpop.xlane.xlu2 %1263  ;;  %v1376_v41 = vmul.f32 %v4533_v28, %v1375_v9 }
 0x217   : > { %v1365_v34 = vsub.f32 1.5, %v1364_v33  ;;  %v1291_v39 = vmul.f32 %v1264_v23, %v5789_v30 }
 0x218   : > { %4310 = vmatmul.msk.f32.gmra.mxu3 %vm500_vm0, %v1664_v37  ;;  %v1380_v17 = vsel %vm6357_vm14, %v4533_v28, %v1376_v41 }
 0x219   : > { %v1366_v5 = vmul.f32 %v4535_v2, %v1365_v34  ;;  %v1483_v55 = vmul.f32 %v1380_v17, %v1327_v51  ;;  %v1667_v17 = vld [vmem:[%s6301_s23 + $0x50] sm:$0xff] }
 0x21b   : > { %v1258_v53 = vpop.xlane.xlu1 %1257  ;;  %v1370_v42 = vsel %vm1369_vm15, %v4535_v2, %v1366_v5  ;;  %v1497_v12 = vmul.f32 %v6127_v27, %v1483_v55 }
 0x21c   : > { %v1289_v10 = vmul.f32 %v1258_v53, %v5789_v30  ;;  %v1482_v31 = vmul.f32 %v1370_v42, %v1326_v36 }
 0x21d   : > { %v1511_v37 = vadd.f32 %v6151_v48, %v1497_v12 }
 0x21e   : > { %v1315_v3 = vsub.f32 %v1289_v10, %v1302_v0  ;;  %v6376_v29 = vpop.xlane.xlu2 %3062  ;;  %v1496_v57 = vmul.f32 %v6127_v27, %v1482_v31 }
 0x21f   : > { %8405 = vst [vmem:[#allocation26_spill] sm:$0xff] %v6376_v29 }
 0x220   : > { %v1341_v40 = vadd.f32 1e-12, %v1315_v3  ;;  %4311 = vmatmul.msk.f32.gmra.mxu3 %vm500_vm0, %v1665_v11  ;;  %v1261_v62 = vpop.xlane.xlu0 %1260  ;;  %v1510_v28 = vadd.f32 %v6151_v48, %v1496_v57  ;;  %v6415_v57 = vld [vmem:[%s8282_s10] ss:$0 sm:$0xff] }
 0x221   : > { %v1290_v6 = vmul.f32 %v1261_v62, %v5789_v30 }
 0x222   : > { %4536 = vrsqrt.f32 %v1341_v40  ;;  %4265 = vmatmul.msk.f32.gmra.mxu1 %vm500_vm0, %v1510_v28  ;;  %vm1387_vm1 = vweird.f32 %v1341_v40 }
 0x223   : > { %v1192_v2 = vpop.xlane.xlu1 %1191  ;;  %v1316_v21 = vsub.f32 %v1290_v6, %v1303_v14  ;;  %v1328_v14 = vsub.f32 %v5801_v35, %v6354_v24 }
 0x224   : > { %v6388_v25 = vmul.f32 %v5789_v30, %v1192_v2 }
 0x225   : > { %v1342_v8 = vadd.f32 1e-12, %v1316_v21 }
 0x226   : > { %v1304_v43 = vmul.f32 %v6388_v25, %v6388_v25  ;;  %v6393_v9 = vpop.xlane.xlu2 %3218 }
 0x227   : > { %8406 = vst [vmem:[#allocation27_spill] sm:$0xff] %v6393_v9  ;;  %4538 = vrsqrt.f32 %v1342_v8  ;;  %vm1397_vm4 = vweird.f32 %v1342_v8 }
 0x228   : > { %v4537_v33 = vpop.eup %4536  ;;  %4312 = vmatmul.msk.f32.gmra.mxu3 %vm500_vm0, %v1666_v50  ;;  %v1317_v23 = vsub.f32 %v1291_v39, %v1304_v43  ;;  %v1195_v46 = vpop.xlane.xlu0 %1194 }
 0x229   : > { %v1382_v41 = vmul.f32 %v4537_v33, %v1341_v40  ;;  %v6398_v36 = vmul.f32 %v5789_v30, %v1195_v46  ;;  %vm1388_vm2 = vweird.f32 %v4537_v33 }
 0x22a   : > { %v1343_v34 = vadd.f32 1e-12, %v1317_v23  ;;  %4266 = vmatmul.msk.f32.gmra.mxu1 %vm500_vm0, %v1511_v37  ;;  %vm1389_vm3 = vmor %vm1387_vm1, %vm1388_vm2  ;;  %v1668_v23 = vld [vmem:[%s6301_s23 + $0x58] sm:$0xff] }
 0x22b   : > { %v1383_v5 = vmul.f32 %v4537_v33, %v1382_v41  ;;  %v1267_v0 = vpop.xlane.xlu1 %1266  ;;  %v1305_v51 = vmul.f32 %v6398_v36, %v6398_v36  ;;  %v1329_v41 = vsub.f32 %v5699_v38, %v6370_v63 }
 0x22c   : > { %4540 = vrsqrt.f32 %v1343_v34  ;;  %v1292_v10 = vmul.f32 %v1267_v0, %v5789_v30  ;;  %vm1407_vm7 = vweird.f32 %v1343_v34 }
 0x22d   : > { %v1384_v53 = vmul.f32 0.5, %v1383_v5  ;;  %v4539_v42 = vpop.eup %4538 }
 0x22e   : > { %v1392_v31 = vmul.f32 %v4539_v42, %v1342_v8  ;;  %v6408_v3 = vpop.xlane.xlu2 %3065  ;;  %v1318_v55 = vsub.f32 %v1292_v10, %v1305_v51  ;;  %vm1398_vm5 = vweird.f32 %v4539_v42 }
 0x22f   : > { %v1385_v11 = vsub.f32 1.5, %v1384_v53  ;;  %8407 = vst [vmem:[#allocation28_spill] sm:$0xff] %v6408_v3  ;;  %vm6423_vm6 = vmor %vm1397_vm4, %vm1398_vm5 }
 0x230   : > { %4313 = vmatmul.msk.f32.gmra.mxu3 %vm500_vm0, %v1667_v17  ;;  %v1393_v40 = vmul.f32 %v4539_v42, %v1392_v31  ;;  %v1344_v28 = vadd.f32 1e-12, %v1318_v55  ;;  %v1270_v24 = vpop.xlane.xlu0 %1269 }
 0x231   : > { %v1386_v62 = vmul.f32 %v4537_v33, %v1385_v11  ;;  %v1293_v63 = vmul.f32 %v1270_v24, %v5789_v30 }
 0x232   : > { %v4541_v6 = vpop.eup %4540  ;;  %v1394_v2 = vmul.f32 0.5, %v1393_v40  ;;  %4542 = vrsqrt.f32 %v1344_v28  ;;  %v1330_v40 = vsub.f32 %v5873_v19, %v6388_v25  ;;  %vm1417_vm11 = vweird.f32 %v1344_v28 }
 0x233   : > { %v1402_v12 = vmul.f32 %v4541_v6, %v1343_v34  ;;  %v1622_v39 = vpop.f32.mrf.mxu3  ;;  %v1390_v50 = vsel %vm1389_vm3, %v4537_v33, %v1386_v62  ;;  %vm1408_vm8 = vweird.f32 %v4541_v6  ;;  %v1201_v51 = vpop.xlane.xlu1 %1200 }
 0x234   : > { %v1623_v21 = vadd.f32 %v6415_v57, %v1622_v39  ;;  %v1395_v43 = vsub.f32 1.5, %v1394_v2  ;;  %v1484_v35 = vmul.f32 %v1390_v50, %v1328_v14  ;;  %vm6442_vm9 = vmor %vm1407_vm7, %vm1408_vm8  ;;  %v6449_v62 = vmul.f32 %v5789_v30, %v1201_v51 }
 0x235   : > { %v1403_v37 = vmul.f32 %v4541_v6, %v1402_v12 }
 0x236   : > { %1641 = vst [vmem:[%s6429_s19 + $0x50] sm:$0xff] %v1623_v21  ;;  %v1396_v8 = vmul.f32 %v4539_v42, %v1395_v43  ;;  %v1198_v5 = vpop.xlane.xlu2 %1197  ;;  %v1498_v0 = vmul.f32 %v6127_v27, %v1484_v35  ;;  %v1669_v43 = vld [vmem:[%s6301_s23 + $0x60] sm:$0xff]  ;;  %v1307_v25 = vmul.f32 %v6449_v62, %v6449_v62  ;;  %s4094_s23 = sshll.u32 %s4091_s15, 4  ;;  %s4095_s23 = int_to_ptr.hbm [resolvable:$true] %s4094_s23 }
 0x237   : > { %v1404_v33 = vmul.f32 0.5, %v1403_v37  ;;  %v6435_v38 = vmul.f32 %v5789_v30, %v1198_v5  ;;  %s4650_s18 = sshra.s32 %s4095_s23, 4  ;;  %s4651_s18 = int_to_ptr.hbm [resolvable:$true] %s4650_s18 }
 0x238   : > { %4314 = vmatmul.msk.f32.gmra.mxu3 %vm500_vm0, %v1668_v23  ;;  %v4543_v53 = vpop.eup %4542  ;;  %v1512_v10 = vadd.f32 %v6151_v48, %v1498_v0  ;;  %v1400_v11 = vsel %vm6423_vm6, %v4539_v42, %v1396_v8  ;;  %v1331_v0 = vsub.f32 %v6001_v4, %v6398_v36  ;;  %s4652_s20 = scalar_lea.hbm %s4651_s18, 104  ;;  %p4657_p0 = scmp.lt.s32.totalorder %s4651_s18, %s8283_s11 }
 0x239   : > { %v1405_v17 = vsub.f32 1.5, %v1404_v33  ;;  %v1412_v55 = vmul.f32 %v4543_v53, %v1344_v28  ;;  %v1306_v14 = vmul.f32 %v6435_v38, %v6435_v38  ;;  %v1485_v34 = vmul.f32 %v1400_v11, %v1329_v41  ;;  %p4653_p11 = scmp.ne.s32.totalorder %s4651_s18, %s4652_s20 }
 0x23a   : > { %4267 = vmatmul.msk.f32.gmra.mxu1 %vm500_vm0, %v1512_v10  ;;  %vm1418_vm12 = vweird.f32 %v4543_v53 }
 0x23b   : > { %v1406_v2 = vmul.f32 %v4541_v6, %v1405_v17  ;;  %v1625_v42 = vpop.f32.mrf.mxu3  ;;  %v1413_v12 = vmul.f32 %v4543_v53, %v1412_v55  ;;  %v1319_v21 = vsub.f32 %v1293_v63, %v1306_v14  ;;  %v1499_v37 = vmul.f32 %v6127_v27, %v1485_v34  ;;  %vm6466_vm13 = vmor %vm1417_vm11, %vm1418_vm12  ;;  %p4654_p12 = pnand %p4653_p11, %p4839_p5 }
 0x23c   : > { %v1626_v39 = vadd.f32 %v6415_v57, %v1625_v42 }
 0x23d   : > { %v1410_v50 = vsel %vm6442_vm9, %v4541_v6, %v1406_v2  ;;  %v1414_v23 = vmul.f32 0.5, %v1413_v12  ;;  %v1345_v19 = vadd.f32 1e-12, %v1319_v21  ;;  %v1513_v24 = vadd.f32 %v6151_v48, %v1499_v37  ;;  %p4655_p13 = pneg %p4654_p12 }
 0x23e   : > { %1642 = vst [vmem:[%s6429_s19 + $0x58] sm:$0xff] %v1626_v39  ;;  %v1486_v35 = vmul.f32 %v1410_v50, %v1330_v40  ;;  %v1273_v41 = vpop.xlane.xlu2 %1272  ;;  %v1332_v37 = vsub.f32 %v6198_v54, %v6435_v38  ;;  %v1333_v54 = vsub.f32 %v6246_v1, %v6449_v62 }
 0x23f   : > { %v1415_v46 = vsub.f32 1.5, %v1414_v23  ;;  %4544 = vrsqrt.f32 %v1345_v19  ;;  %v1294_v6 = vmul.f32 %v1273_v41, %v5789_v30  ;;  %vm1427_vm14 = vweird.f32 %v1345_v19 }
 0x240   : > { %4315 = vmatmul.msk.f32.gmra.mxu3 %vm500_vm0, %v1669_v43  ;;  %v1500_v63 = vmul.f32 %v6127_v27, %v1486_v35 }
 0x241   : > { %v1416_v33 = vmul.f32 %v4543_v53, %v1415_v46  ;;  %v1320_v5 = vsub.f32 %v1294_v6, %v1307_v25 }
 0x242   : > { %4268 = vmatmul.msk.f32.gmra.mxu1 %vm500_vm0, %v1513_v24  ;;  %v1514_v4 = vadd.f32 %v6151_v48, %v1500_v63 }
 0x243   : > { %v1628_v51 = vpop.f32.mrf.mxu3  ;;  %v1346_v10 = vadd.f32 1e-12, %v1320_v5  ;;  %v1420_v28 = vsel %vm6466_vm13, %v4543_v53, %v1416_v33 }
 0x244   : > { %v1629_v17 = vadd.f32 %v6415_v57, %v1628_v51  ;;  %v1204_v11 = vpop.xlane.xlu0 %1203  ;;  %v1487_v36 = vmul.f32 %v1420_v28, %v1331_v0 }
 0x245   : > { %v4545_v31 = vpop.eup %4544  ;;  %4546 = vrsqrt.f32 %v1346_v10  ;;  %v1230_v14 = vmul.f32 %v5789_v30, %v1204_v11  ;;  %vm1437_vm2 = vweird.f32 %v1346_v10 }
 0x246   : > { %1643 = vst [vmem:[%s6429_s19 + $0x60] sm:$0xff] %v1629_v17  ;;  %v1422_v55 = vmul.f32 %v4545_v31, %v1345_v19  ;;  %vm1428_vm15 = vweird.f32 %v4545_v31  ;;  %v1501_v53 = vmul.f32 %v6127_v27, %v1487_v36 }
 0x247   : > { %v1308_v42 = vmul.f32 %v1230_v14, %v1230_v14  ;;  %vm1429_vm1 = vmor %vm1427_vm14, %vm1428_vm15 }
 0x248   : > { %v1423_v40 = vmul.f32 %v4545_v31, %v1422_v55  ;;  %v1515_v35 = vadd.f32 %v6151_v48, %v1501_v53 }
 0x24a   : > { %v1424_v2 = vmul.f32 0.5, %v1423_v40  ;;  %4269 = vmatmul.msk.f32.gmra.mxu1 %vm500_vm0, %v1514_v4  ;;  %v6503_v4 = vld [vmem:[%s8280_s8 + $0x1] ss:$0 sm:$0xff]  ;;  %v1334_v40 = vsub.f32 %v6283_v59, %v1230_v14 }
 0x24b   : > { %v6481_v34 = vpop.f32.mrf.mxu3  ;;  %v4547_v12 = vpop.eup %4546 }
 0x24c   : > { %v1276_v39 = vpop.xlane.xlu0 %1275  ;;  %v1425_v21 = vsub.f32 1.5, %v1424_v2  ;;  %v1432_v50 = vmul.f32 %v4547_v12, %v1346_v10  ;;  %vm1438_vm3 = vweird.f32 %v4547_v12 }
 0x24d   : > { %v1295_v43 = vmul.f32 %v1276_v39, %v5789_v30  ;;  %vm1439_vm4 = vmor %vm1437_vm2, %vm1438_vm3 }
 0x24e   : > { %v1426_v23 = vmul.f32 %v4545_v31, %v1425_v21  ;;  %v1433_v19 = vmul.f32 %v4547_v12, %v1432_v50 }
 0x24f   : > { %v1321_v25 = vsub.f32 %v1295_v43, %v1308_v42 }
 0x250   : > { %v1434_v24 = vmul.f32 0.5, %v1433_v19  ;;  %v1430_v46 = vsel %vm1429_vm1, %v4545_v31, %v1426_v23 }
 0x251   : > { %v1347_v41 = vadd.f32 1e-12, %v1321_v25  ;;  %v1488_v6 = vmul.f32 %v1430_v46, %v1332_v37 }
 0x252   : > { %v1435_v8 = vsub.f32 1.5, %v1434_v24  ;;  %4270 = vmatmul.msk.f32.gmra.mxu1 %vm500_vm0, %v1515_v35 }
 0x253   : > { %4548 = vrsqrt.f32 %v1347_v41  ;;  %v6489_v33 = vpop.f32.mrf.mxu3  ;;  %v1502_v38 = vmul.f32 %v6127_v27, %v1488_v6  ;;  %vm1447_vm5 = vweird.f32 %v1347_v41 }
 0x254   : > { %v1436_v5 = vmul.f32 %v4547_v12, %v1435_v8 }
 0x255   : > { %v1516_v0 = vadd.f32 %v6151_v48, %v1502_v38 }
 0x256   : > { %v1440_v51 = vsel %vm1439_vm4, %v4547_v12, %v1436_v5 }
 0x257   : > { %v1489_v63 = vmul.f32 %v1440_v51, %v1333_v54 }
 0x259   : > { %v4549_v17 = vpop.eup %4548  ;;  %v1503_v28 = vmul.f32 %v6127_v27, %v1489_v63 }
 0x25a   : > { %v1442_v10 = vmul.f32 %v4549_v17, %v1347_v41  ;;  %4271 = vmatmul.msk.f32.gmra.mxu1 %vm500_vm0, %v1516_v0  ;;  %vm1448_vm6 = vweird.f32 %v4549_v17 }
 0x25b   : > { %v6496_v11 = vpop.f32.mrf.mxu3  ;;  %v1517_v1 = vadd.f32 %v6151_v48, %v1503_v28  ;;  %vm1449_vm7 = vmor %vm1447_vm5, %vm1448_vm6 }
 0x25c   : > { %v1443_v31 = vmul.f32 %v4549_v17, %v1442_v10 }
 0x25e   : > { %v1444_v55 = vmul.f32 0.5, %v1443_v31 }
 0x260   : > { %v1445_v62 = vsub.f32 1.5, %v1444_v55 }
 0x262   : > { %v1446_v36 = vmul.f32 %v4549_v17, %v1445_v62  ;;  %4272 = vmatmul.msk.f32.gmra.mxu1 %vm500_vm0, %v1517_v1 }
 0x263   : > { %v2421_v2 = vpop.f32.mrf.mxu3 }
 0x264   : > { %v6508_v42 = vadd.f32 %v6503_v4, %v2421_v2  ;;  %v1450_v53 = vsel %vm1449_vm7, %v4549_v17, %v1446_v36 }
 0x265   : > { %v1490_v39 = vmul.f32 %v1450_v53, %v1334_v40 }
 0x266   : > { %v6512_v12 = vmul.f32 %v6508_v42, %v4971_v47 }
 0x267   : > { %v1504_v50 = vmul.f32 %v6127_v27, %v1490_v39  ;;  %v1762_v27 = vpop.f32.mrf.mxu2 }
 0x268   : > { %v2486_v21 = vmul.f32 %v6512_v12, %v6512_v12 }
 0x269   : > { %v1518_v59 = vadd.f32 %v6151_v48, %v1504_v50  ;;  %v6530_v48 = vld [vmem:[%s8280_s8] ss:$0 sm:$0xff] }
 0x26a   : > { %v6517_v43 = vmin.f32 %v2486_v21, 16.0  ;;  %v6534_v46 = vadd.f32 %v6530_v48, %v6481_v34  ;;  %v6541_v8 = vadd.f32 %v6530_v48, %v1762_v27  ;;  %v6574_v50 = vadd.f32 %v6530_v48, %v6489_v33 }
 0x26b   : > { %4273 = vmatmul.msk.f32.gmra.mxu1 %vm500_vm0, %v1518_v59  ;;  %v2424_v25 = vpop.f32.mrf.mxu3 }
 0x26c   : > { %v2499_v14 = vmul.f32 3.8918573e-05, %v6517_v43  ;;  %v6525_v24 = vadd.f32 %v6503_v4, %v2424_v25  ;;  %v6546_v38 = vmul.f32 %v6534_v46, %v4971_v47  ;;  %v6552_v34 = vmul.f32 %v6541_v8, %v4971_v47  ;;  %8414 = vst [vmem:[#allocation29_spill] sm:$0xff] %v6574_v50 }
 0x26d   : > { %v2488_v51 = vmul.f32 2.1237322e-06, %v6517_v43 }
 0x26e   : > { %v2500_v37 = vadd.f32 0.001143296, %v2499_v14  ;;  %v6538_v6 = vmul.f32 %v6525_v24, %v4971_v47  ;;  %v2206_v63 = vmul.f32 %v6546_v38, %v6546_v38  ;;  %v2086_v10 = vmul.f32 %v6552_v34, %v6552_v34 }
 0x26f   : > { %v2489_v31 = vadd.f32 0.00028619796, %v2488_v51  ;;  %v1765_v27 = vpop.f32.mrf.mxu2 }
 0x270   : > { %v2501_v23 = vmul.f32 %v2500_v37, %v6517_v43  ;;  %v2526_v5 = vmul.f32 %v6538_v6, %v6538_v6  ;;  %v6562_v55 = vmin.f32 %v2206_v63, 16.0  ;;  %v6565_v62 = vmin.f32 %v2086_v10, 16.0 }
 0x271   : > { %v2490_v40 = vmul.f32 %v2489_v31, %v6517_v43  ;;  %v6599_v31 = vadd.f32 %v6530_v48, %v1765_v27 }
 0x272   : > { %v2502_v19 = vadd.f32 0.014752088, %v2501_v23  ;;  %v6557_v17 = vmin.f32 %v2526_v5, 16.0  ;;  %v2208_v2 = vmul.f32 2.1237322e-06, %v6562_v55 }
 0x273   : > { %v2427_v39 = vpop.f32.mrf.mxu3  ;;  %v2219_v21 = vmul.f32 3.8918573e-05, %v6562_v55  ;;  %v2099_v59 = vmul.f32 3.8918573e-05, %v6565_v62  ;;  %v2491_v14 = vadd.f32 0.0036580483, %v2490_v40 }
 0x274   : > { %v2503_v35 = vmul.f32 %v2502_v19, %v6517_v43  ;;  %v2539_v1 = vmul.f32 3.8918573e-05, %v6557_v17  ;;  %v6579_v37 = vadd.f32 %v6503_v4, %v2427_v39  ;;  %v2209_v23 = vadd.f32 0.00028619796, %v2208_v2 }
 0x275   : > { %v2220_v25 = vadd.f32 0.001143296, %v2219_v21  ;;  %v2492_v33 = vmul.f32 %v2491_v14, %v6517_v43  ;;  %v6608_v21 = vmul.f32 %v6599_v31, %v4971_v47 }
 0x276   : > { %v2504_v41 = vadd.f32 0.112945676, %v2503_v35  ;;  %v2540_v53 = vadd.f32 0.001143296, %v2539_v1  ;;  %v6584_v35 = vmul.f32 %v6574_v50, %v4971_v47 }
 0x277   : > { %v2221_v63 = vmul.f32 %v2220_v25, %v6562_v55  ;;  %v2493_v1 = vadd.f32 0.05243302, %v2492_v33 }
 0x278   : > { %v2505_v54 = vmul.f32 %v2504_v41, %v6517_v43  ;;  %v2541_v19 = vmul.f32 %v2540_v53, %v6557_v17  ;;  %v2100_v41 = vadd.f32 0.001143296, %v2099_v59  ;;  %v2246_v10 = vmul.f32 %v6584_v35, %v6584_v35 }
 0x279   : > { %v2222_v59 = vadd.f32 0.014752088, %v2221_v63 }
 0x27a   : > { %v2506_v0 = vadd.f32 0.4994258, %v2505_v54  ;;  %v6589_v54 = vmul.f32 %v6579_v37, %v4971_v47  ;;  %v2542_v51 = vadd.f32 0.014752088, %v2541_v19  ;;  %v6610_v14 = vmin.f32 %v2246_v10, 16.0 }
 0x27b   : > { %v2494_v19 = vmul.f32 %v2493_v1, %v6517_v43  ;;  %v2528_v1 = vmul.f32 2.1237322e-06, %v6557_v17 }
 0x27c   : > { %v2507_v28 = vmul.f32 %v2506_v0, %v6517_v43  ;;  %v2210_v0 = vmul.f32 %v2209_v23, %v6562_v55  ;;  %v2566_v2 = vmul.f32 %v6589_v54, %v6589_v54  ;;  %v2543_v39 = vmul.f32 %v2542_v51, %v6557_v17 }
 0x27d   : > { %v2223_v51 = vmul.f32 %v2222_v59, %v6562_v55  ;;  %v2248_v3 = vmul.f32 2.1237322e-06, %v6610_v14  ;;  %v2259_v10 = vmul.f32 3.8918573e-05, %v6610_v14  ;;  %v2529_v58 = vadd.f32 0.00028619796, %v2528_v1 }
 0x27e   : > { %v6567_v36 = vadd.f32 1.0, %v2507_v28  ;;  %v2101_v28 = vmul.f32 %v2100_v41, %v6565_v62  ;;  %v2211_v53 = vadd.f32 0.0036580483, %v2210_v0  ;;  %v6613_v41 = vmin.f32 %v2566_v2, 16.0 }
 0x27f   : > { %v2544_v33 = vadd.f32 0.112945676, %v2543_v39  ;;  %v2126_v0 = vmul.f32 %v6608_v21, %v6608_v21  ;;  %v2224_v29 = vadd.f32 0.112945676, %v2223_v51  ;;  %v2260_v15 = vadd.f32 0.001143296, %v2259_v10 }
 0x280   : > { %4550 = vrcp.f32 %v6567_v36  ;;  %v2102_v23 = vadd.f32 0.014752088, %v2101_v28  ;;  %v2212_v27 = vmul.f32 %v2211_v53, %v6562_v55  ;;  %v6624_v28 = vadd.f32 %v6530_v48, %v6496_v11 }
 0x281   : > { %v2579_v53 = vmul.f32 3.8918573e-05, %v6613_v41  ;;  %v2545_v59 = vmul.f32 %v2544_v33, %v6557_v17  ;;  %v6630_v9 = vmin.f32 %v2126_v0, 16.0  ;;  %v2520_v33 = vand.u32 2147483648, %v6567_v36 }
 0x282   : > { %v2103_v63 = vmul.f32 %v2102_v23, %v6565_v62  ;;  %8415 = vst [vmem:[#allocation30_spill] sm:$0xff] %v6624_v28  ;;  %v2213_v39 = vadd.f32 0.05243302, %v2212_v27  ;;  %v2249_v23 = vadd.f32 0.00028619796, %v2248_v3  ;;  %v6634_v11 = vmul.f32 %v6624_v28, %v4971_v47 }
 0x283   : > { %v2580_v27 = vadd.f32 0.001143296, %v2579_v53  ;;  %v2546_v0 = vadd.f32 0.4994258, %v2545_v59  ;;  %v2139_v3 = vmul.f32 3.8918573e-05, %v6630_v9  ;;  %vm2514_vm8 = vweird.f32 %v6567_v36 }
 0x284   : > { %v2104_v26 = vadd.f32 0.112945676, %v2103_v63  ;;  %8416 = vst [vmem:[#allocation31_spill] sm:$0xff] %v6634_v11  ;;  %v2214_v51 = vmul.f32 %v2213_v39, %v6562_v55  ;;  %v2518_v63 = vand.u32 2147483647, %v6567_v36  ;;  %v2250_v1 = vmul.f32 %v2249_v23, %v6610_v14  ;;  %v2430_v39 = vpop.f32.mrf.mxu3 }
 0x285   : > { %v2521_v22 = vor.u32 1.1754944e-38, %v2520_v33  ;;  %v2530_v23 = vmul.f32 %v2529_v58, %v6557_v17  ;;  %v2140_v32 = vadd.f32 0.001143296, %v2139_v3  ;;  %v6662_v56 = vadd.f32 %v6503_v4, %v2430_v39 }
 0x286   : > { %v6591_v5 = vpop.eup %4550  ;;  %v2105_v10 = vmul.f32 %v2104_v26, %v6565_v62  ;;  %vm2519_vm11 = vcmp.eq.f32.partialorder %v2518_v63, 8.507059e+37  ;;  %v2215_v13 = vadd.f32 0.18741608, %v2214_v51  ;;  %v2251_v30 = vadd.f32 0.0036580483, %v2250_v1 }
 0x287   : > { %v2510_v40 = vmul.f32 %v6591_v5, %v6567_v36  ;;  %vm2515_vm0 = vweird.f32 %v6591_v5  ;;  %v6674_v51 = vmul.f32 %v6662_v56, %v4971_v47 }
 0x288   : > { %vm6651_vm9 = vmor %vm2514_vm8, %vm2515_vm0  ;;  %v2106_v18 = vadd.f32 0.4994258, %v2105_v10  ;;  %v2252_v10 = vmul.f32 %v2251_v30, %v6610_v14 }
 0x289   : > { %v2511_v25 = vsub.f32 1.0, %v2510_v40  ;;  %v2495_v40 = vadd.f32 0.18741608, %v2494_v19  ;;  %v2088_v19 = vmul.f32 2.1237322e-06, %v6565_v62  ;;  %v2606_v30 = vmul.f32 %v6674_v51, %v6674_v51 }
 0x28a   : > { %v2107_v63 = vmul.f32 %v2106_v18, %v6565_v62 }
 0x28b   : > { %v2512_v2 = vmul.f32 %v6591_v5, %v2511_v25  ;;  %v2496_v25 = vmul.f32 %v2495_v40, %v6517_v43  ;;  %v2225_v43 = vmul.f32 %v2224_v29, %v6562_v55  ;;  %v2261_v40 = vmul.f32 %v2260_v15, %v6610_v14 }
 0x28c   : > { %v2089_v26 = vadd.f32 0.00028619796, %v2088_v19  ;;  %v2581_v29 = vmul.f32 %v2580_v27, %v6613_v41  ;;  %v2547_v15 = vmul.f32 %v2546_v0, %v6557_v17  ;;  %v2531_v27 = vadd.f32 0.0036580483, %v2530_v23 }
 0x28d   : > { %v2513_v44 = vadd.f32 %v6591_v5, %v2512_v2  ;;  %v2286_v2 = vmul.f32 %v6634_v11, %v6634_v11  ;;  %v2497_v59 = vadd.f32 1.1283791, %v2496_v25  ;;  %v2226_v25 = vadd.f32 0.4994258, %v2225_v43 }
 0x28e   : > { %v2262_v53 = vadd.f32 0.014752088, %v2261_v40  ;;  %v2582_v19 = vadd.f32 0.014752088, %v2581_v29  ;;  %v6667_v58 = vadd.f32 1.0, %v2547_v15  ;;  %v2090_v33 = vmul.f32 %v2089_v26, %v6565_v62 }
 0x28f   : > { %v2517_v36 = vsel %vm6651_vm9, %v6591_v5, %v2513_v44  ;;  %v6664_v44 = vmin.f32 %v2286_v2, 16.0  ;;  %v2498_v5 = vmul.f32 %v2497_v59, %v6512_v12  ;;  %v2141_v0 = vmul.f32 %v2140_v32, %v6630_v9 }
 0x290   : > { %v2522_v52 = vsel %vm2519_vm11, %v2521_v22, %v2517_v36  ;;  %v2216_v22 = vmul.f32 %v2215_v13, %v6562_v55  ;;  %v2227_v12 = vmul.f32 %v2226_v25, %v6562_v55  ;;  %v2263_v43 = vmul.f32 %v2262_v53, %v6610_v14  ;;  %v1768_v55 = vpop.f32.mrf.mxu2 }
 0x291   : > { %v2523_v3 = vmul.f32 %v2522_v52, %v2498_v5  ;;  %v2288_v1 = vmul.f32 2.1237322e-06, %v6664_v44  ;;  %v2583_v40 = vmul.f32 %v2582_v19, %v6613_v41  ;;  %v2532_v32 = vmul.f32 %v2531_v27, %v6557_v17 }
 0x292   : > { %4552 = vrcp.f32 %v6667_v58  ;;  %v2091_v18 = vadd.f32 0.0036580483, %v2090_v33  ;;  %v2142_v52 = vadd.f32 0.014752088, %v2141_v0  ;;  %v6684_v39 = vadd.f32 1.0, %v2107_v63 }
 0x293   : > { %v4316_v2 = vclamps-f32 %v2523_v3, 1.0  ;;  %v2568_v13 = vmul.f32 2.1237322e-06, %v6613_v41  ;;  %v2217_v59 = vadd.f32 1.1283791, %v2216_v22  ;;  %v6691_v29 = vmul.f32 0.5, %v6534_v46 }
 0x294   : > { %v2253_v36 = vadd.f32 0.05243302, %v2252_v10  ;;  %v2299_v26 = vmul.f32 3.8918573e-05, %v6664_v44  ;;  %v6693_v23 = vadd.f32 1.0, %v2227_v12  ;;  %v2092_v5 = vmul.f32 %v2091_v18, %v6565_v62 }
 0x295   : > { %8419 = vst [vmem:[#allocation32_spill] sm:$0xff] %v6691_v29  ;;  %v2264_v15 = vadd.f32 0.112945676, %v2263_v43  ;;  %v2584_v25 = vadd.f32 0.112945676, %v2583_v40  ;;  %v2143_v19 = vmul.f32 %v2142_v52, %v6630_v9  ;;  %v6698_v27 = vadd.f32 %v6530_v48, %v1768_v55 }
 0x296   : > { %v2533_v53 = vadd.f32 0.05243302, %v2532_v32  ;;  %v3006_v33 = vadd.f32 1.0, %v4316_v2  ;;  %4554 = vrcp.f32 %v6684_v39  ;;  %v2569_v0 = vadd.f32 0.00028619796, %v2568_v13  ;;  %v2433_v2 = vpop.f32.mrf.mxu3 }
 0x297   : > { %8420 = vst [vmem:[#allocation33_spill] sm:$0xff] %v6698_v27  ;;  %v6701_v3 = vmin.f32 %v2606_v30, 16.0  ;;  %v6706_v63 = vmul.f32 %v2217_v59, %v6546_v38  ;;  %v2254_v22 = vmul.f32 %v2253_v36, %v6610_v14  ;;  %v2289_v10 = vadd.f32 0.00028619796, %v2288_v1 }
 0x298   : > { %v6703_v46 = vpop.eup %4552  ;;  %v2460_v12 = vmul.f32 0.5, %v6508_v42  ;;  %4556 = vrcp.f32 %v6693_v23  ;;  %v2265_v48 = vmul.f32 %v2264_v15, %v6610_v14  ;;  %v2300_v43 = vadd.f32 0.001143296, %v2299_v26 }
 0x299   : > { %v2585_v40 = vmul.f32 %v2584_v25, %v6613_v41  ;;  %v2534_v32 = vmul.f32 %v2533_v53, %v6557_v17  ;;  %v2093_v18 = vadd.f32 0.05243302, %v2092_v5  ;;  %v2144_v52 = vadd.f32 0.112945676, %v2143_v19 }
 0x29a   : > { %v6716_v38 = vmul.f32 %v6698_v27, %v4971_v47  ;;  %v6718_v13 = vmul.f32 %v3006_v33, %v2460_v12  ;;  %v2550_v42 = vmul.f32 %v6703_v46, %v6667_v58  ;;  %v2570_v1 = vmul.f32 %v2569_v0, %v6613_v41 }
 0x29b   : > { %v2619_v30 = vmul.f32 3.8918573e-05, %v6701_v3  ;;  %v2240_v59 = vand.u32 2147483648, %v6693_v23  ;;  %v2255_v36 = vadd.f32 0.18741608, %v2254_v22  ;;  %v2290_v26 = vmul.f32 %v2289_v10, %v6664_v44 }
 0x29c   : > { %v6727_v15 = vpop.eup %4554  ;;  %v2266_v25 = vadd.f32 0.4994258, %v2265_v48  ;;  %v2301_v53 = vmul.f32 %v2300_v43, %v6664_v44  ;;  %v2586_v5 = vadd.f32 0.4994258, %v2585_v40  ;;  %v6731_v19 = vadd.f32 %v6503_v4, %v2433_v2 }
 0x29d   : > { %v2535_v33 = vadd.f32 0.18741608, %v2534_v32  ;;  %v2094_v0 = vmul.f32 %v2093_v18, %v6565_v62  ;;  %v2145_v12 = vmul.f32 %v2144_v52, %v6630_v9  ;;  %v2166_v55 = vmul.f32 %v6716_v38, %v6716_v38 }
 0x29e   : > { %8421 = vst [vmem:[#allocation34_spill] sm:$0xff] %v6731_v19  ;;  %v6737_v22 = vpop.eup %4556  ;;  %v2551_v10 = vsub.f32 1.0, %v2550_v42  ;;  %v2571_v28 = vadd.f32 0.0036580483, %v2570_v1  ;;  %v2620_v49 = vadd.f32 0.001143296, %v2619_v30  ;;  %v2110_v40 = vmul.f32 %v6727_v15, %v6684_v39 }
 0x29f   : > { %v3085_v48 = vsel %vm3045_vm10, %v6718_v13, 0.0  ;;  %v2291_v43 = vadd.f32 0.0036580483, %v2290_v26  ;;  %v2128_v32 = vmul.f32 2.1237322e-06, %v6630_v9  ;;  %v6744_v18 = vmin.f32 %v2166_v55, 16.0 }
 0x2a0   : > { %3086 = vadd.xlane.f32.xlu2 %v3085_v48  ;;  %v6746_v52 = vor.u32 1.1754944e-38, %v2240_v59  ;;  %v2256_v2 = vmul.f32 %v2255_v36, %v6610_v14  ;;  %v2587_v42 = vmul.f32 %v2586_v5, %v6613_v41  ;;  %v6752_v1 = vmul.f32 %v6731_v19, %v4971_v47 }
 0x2a1   : > { %v6755_v30 = vmul.f32 %v2266_v25, %v6610_v14  ;;  %v2536_v26 = vmul.f32 %v2535_v33, %v6557_v17  ;;  %v2095_v11 = vadd.f32 0.18741608, %v2094_v0  ;;  %v2146_v50 = vadd.f32 0.4994258, %v2145_v12 }
 0x2a2   : > { %8422 = vst [vmem:[#allocation35_spill] sm:$0xff] %v6752_v1  ;;  %v6758_v55 = vadd.f32 0.014752088, %v2301_v53  ;;  %v2552_v59 = vmul.f32 %v6703_v46, %v2551_v10  ;;  %v2572_v48 = vmul.f32 %v2571_v28, %v6613_v41  ;;  %v2621_v36 = vmul.f32 %v2620_v49, %v6701_v3 }
 0x2a3   : > { %v2292_v5 = vmul.f32 %v2291_v43, %v6664_v44  ;;  %v2111_v16 = vsub.f32 1.0, %v2110_v40  ;;  %v2129_v29 = vadd.f32 0.00028619796, %v2128_v32  ;;  %v2179_v19 = vmul.f32 3.8918573e-05, %v6744_v18 }
 0x2a4   : > { %v6767_v14 = vmul.f32 %v6737_v22, %v6693_v23  ;;  %v6769_v17 = vadd.f32 1.1283791, %v2256_v2  ;;  %v6771_v25 = vadd.f32 1.0, %v2587_v42  ;;  %v2646_v53 = vmul.f32 %v6752_v1, %v6752_v1 }
 0x2a5   : > { %v2537_v28 = vadd.f32 1.1283791, %v2536_v26  ;;  %vm2554_vm12 = vweird.f32 %v6667_v58  ;;  %v2096_v49 = vmul.f32 %v2095_v11, %v6565_v62  ;;  %v2147_v33 = vmul.f32 %v2146_v50, %v6630_v9 }
 0x2a6   : > { %v2553_v0 = vadd.f32 %v6703_v46, %v2552_v59  ;;  %vm2555_vm13 = vweird.f32 %v6703_v46  ;;  %v2573_v12 = vadd.f32 0.05243302, %v2572_v48  ;;  %v2622_v10 = vadd.f32 0.014752088, %v2621_v36  ;;  %v2436_v48 = vpop.f32.mrf.mxu3 }
 0x2a7   : > { %v2560_v43 = vand.u32 2147483648, %v6667_v58  ;;  %v2112_v40 = vmul.f32 %v6727_v15, %v2111_v16  ;;  %v2130_v32 = vmul.f32 %v2129_v29, %v6630_v9  ;;  %v2180_v2 = vadd.f32 0.001143296, %v2179_v19  ;;  %vm6790_vm14 = vmor %vm2554_vm12, %vm2555_vm13 }
 0x2a8   : > { %v2558_v42 = vand.u32 2147483647, %v6667_v58  ;;  %v2118_v26 = vand.u32 2147483647, %v6684_v39  ;;  %4558 = vrcp.f32 %v6771_v25  ;;  %v6786_v62 = vmin.f32 %v2646_v53, 16.0 }
 0x2a9   : > { %vm2114_vm15 = vweird.f32 %v6684_v39  ;;  %vm2115_vm1 = vweird.f32 %v6727_v15  ;;  %v2120_v16 = vand.u32 2147483648, %v6684_v39  ;;  %v6797_v11 = vadd.f32 1.0, %v2147_v33 }
 0x2aa   : > { %v2557_v29 = vsel %vm6790_vm14, %v6703_v46, %v2553_v0  ;;  %v2574_v19 = vmul.f32 %v2573_v12, %v6613_v41  ;;  %v2608_v58 = vmul.f32 2.1237322e-06, %v6701_v3  ;;  %v2623_v59 = vmul.f32 %v2622_v10, %v6701_v3  ;;  %vm6809_vm3 = vmor %vm2114_vm15, %vm2115_vm1 }
 0x2ab   : > { %v2561_v36 = vor.u32 1.1754944e-38, %v2560_v43  ;;  %v2113_v53 = vadd.f32 %v6727_v15, %v2112_v40  ;;  %v2131_v7 = vadd.f32 0.0036580483, %v2130_v32  ;;  %v2181_v27 = vmul.f32 %v2180_v2, %v6744_v18 }
 0x2ac   : > { %vm2559_vm2 = vcmp.eq.f32.partialorder %v2558_v42, 8.507059e+37  ;;  %v2097_v33 = vadd.f32 1.1283791, %v2096_v49  ;;  %vm6813_vm4 = vcmp.eq.f32.partialorder %v2118_v26, 8.507059e+37  ;;  %v2659_v0 = vmul.f32 3.8918573e-05, %v6786_v62 }
 0x2ad   : > { %v2562_v12 = vsel %vm2559_vm2, %v2561_v36, %v2557_v29  ;;  %v2121_v10 = vor.u32 1.1754944e-38, %v2120_v16  ;;  %4560 = vrcp.f32 %v6797_v11  ;;  %v6820_v43 = vadd.f32 %v6503_v4, %v2436_v48 }
 0x2ae   : > { %v6822_v49 = vpop.eup %4558  ;;  %v2538_v39 = vmul.f32 %v2537_v28, %v6538_v6  ;;  %v2575_v40 = vadd.f32 0.18741608, %v2574_v19  ;;  %v2609_v32 = vadd.f32 0.00028619796, %v2608_v58  ;;  %v2624_v2 = vadd.f32 0.112945676, %v2623_v59 }
 0x2af   : > { %v2117_v42 = vsel %vm6809_vm3, %v6727_v15, %v2113_v53  ;;  %v2132_v26 = vmul.f32 %v2131_v7, %v6630_v9  ;;  %v2182_v29 = vadd.f32 0.014752088, %v2181_v27  ;;  %v6831_v16 = vmul.f32 %v6718_v13, %v5482_v60 }
 0x2b0   : > { %v6834_v48 = vadd.f32 1.0, %v6755_v30  ;;  %v2293_v36 = vadd.f32 0.05243302, %v2292_v5  ;;  %v2563_v1 = vmul.f32 %v2562_v12, %v2538_v39  ;;  %v2660_v6 = vadd.f32 0.001143296, %v2659_v0 }
 0x2b1   : > { %v6838_v28 = vmul.f32 %v6758_v55, %v6664_v44  ;;  %v2098_v19 = vmul.f32 %v2097_v33, %v6552_v34  ;;  %v2590_v7 = vmul.f32 %v6822_v49, %v6771_v25  ;;  %v6845_v27 = vmul.f32 %v6820_v43, %v4971_v47 }
 0x2b2   : > { %v2122_v15 = vsel %vm6813_vm4, %v2121_v10, %v2117_v42  ;;  %v2576_v30 = vmul.f32 %v2575_v40, %v6613_v41  ;;  %v2610_v5 = vmul.f32 %v2609_v32, %v6701_v3  ;;  %v2625_v58 = vmul.f32 %v2624_v2, %v6701_v3 }
 0x2b3   : > { %v6852_v55 = vpop.eup %4560  ;;  %v2133_v59 = vadd.f32 0.05243302, %v2132_v26  ;;  %v2183_v34 = vmul.f32 %v2182_v29, %v6744_v18  ;;  %v3137_v53 = vsel %vm3045_vm10, %v6831_v16, 0.0  ;;  %v3241_v33 = vmul.f32 %v6718_v13, %v6718_v13 }
 0x2b4   : > { %v2231_v50 = vsub.f32 1.0, %v6767_v14  ;;  %v6862_v41 = vmul.f32 %v6769_v17, %v6584_v35  ;;  %v4317_v46 = vclamps-f32 %v2563_v1, 1.0  ;;  %v2661_v0 = vmul.f32 %v2660_v6, %v6786_v62  ;;  %3138 = vadd.xlane.f32.xlu1 %v3137_v53  ;;  %v1592_v35 = vpop.f32.mrf.mxu1 }
 0x2b5   : > { %4562 = vrcp.f32 %v6834_v48  ;;  %v2591_v10 = vsub.f32 1.0, %v2590_v7  ;;  %v2686_v39 = vmul.f32 %v6845_v27, %v6845_v27  ;;  %v2123_v40 = vmul.f32 %v2122_v15, %v2098_v19 }
 0x2b6   : > { %v2577_v32 = vadd.f32 1.1283791, %v2576_v30  ;;  %v2611_v2 = vadd.f32 0.0036580483, %v2610_v5  ;;  %v2150_v42 = vmul.f32 %v6852_v55, %v6797_v11  ;;  %v2626_v17 = vadd.f32 0.4994258, %v2625_v58 }
 0x2b7   : > { %v2134_v1 = vmul.f32 %v2133_v59, %v6630_v9  ;;  %v2184_v26 = vadd.f32 0.112945676, %v2183_v34  ;;  %v3254_v29 = vsel %vm3045_vm10, %v3241_v33, 0.0  ;;  %v6874_v6 = vmul.f32 %v2293_v36, %v6664_v44 }
 0x2b8   : > { %v2461_v7 = vmul.f32 0.5, %v6525_v24  ;;  %v3007_v53 = vadd.f32 1.0, %v4317_v46  ;;  %v2662_v12 = vadd.f32 0.014752088, %v2661_v0  ;;  %3255 = vadd.xlane.f32.xlu0 %v3254_v29  ;;  %v2592_v19 = vmul.f32 %v6822_v49, %v2591_v10 }
 0x2b9   : > { %v2600_v15 = vand.u32 2147483648, %v6771_v25  ;;  %v6879_v30 = vmin.f32 %v2686_v39, 16.0  ;;  %v1593_v5 = vadd.f32 %v6415_v57, %v1592_v35  ;;  %v1787_v58 = vmul.f32 0.5, %v6541_v8  ;;  %v2439_v39 = vpop.f32.mrf.mxu3 }
 0x2ba   : > { %v4297_v59 = vclamps-f32 %v2123_v40, 1.0  ;;  %v6884_v36 = vmul.f32 %v2577_v32, %v6589_v54  ;;  %v2151_v34 = vsub.f32 1.0, %v2150_v42  ;;  %v2612_v33 = vmul.f32 %v2611_v2, %v6701_v3 }
 0x2bb   : > { %v6886_v24 = vpop.eup %4562  ;;  %v2627_v46 = vmul.f32 %v2626_v17, %v6701_v3  ;;  %v2135_v0 = vadd.f32 0.18741608, %v2134_v1  ;;  %v2185_v10 = vmul.f32 %v2184_v26, %v6744_v18  ;;  %1631 = vst [vmem:[%s6429_s19] sm:$0xff] %v1593_v5  ;;  %v6892_v29 = vmul.f32 %v3007_v53, %v2461_v7 }
 0x2bc   : > { %vm2594_vm5 = vweird.f32 %v6771_v25  ;;  %v2598_v57 = vand.u32 2147483647, %v6771_v25  ;;  %v2663_v8 = vmul.f32 %v2662_v12, %v6786_v62  ;;  %v2593_v54 = vadd.f32 %v6822_v49, %v2592_v19 }
 0x2bd   : > { %vm2595_vm6 = vweird.f32 %v6822_v49  ;;  %v2601_v40 = vor.u32 1.1754944e-38, %v2600_v15  ;;  %v2699_v32 = vmul.f32 3.8918573e-05, %v6879_v30  ;;  %v2333_v2 = vadd.f32 1.0, %v4297_v59 }
 0x2be   : > { %v2152_v42 = vmul.f32 %v6852_v55, %v2151_v34  ;;  %v2168_v35 = vmul.f32 2.1237322e-06, %v6744_v18  ;;  %v6903_v17 = vadd.f32 %v6503_v4, %v2439_v39  ;;  %v6905_v1 = vadd.f32 1.0, %v2627_v46  ;;  %vm6912_vm7 = vmor %vm2594_vm5, %vm2595_vm6 }
 0x2bf   : > { %v2136_v26 = vmul.f32 %v2135_v0, %v6630_v9  ;;  %v2186_v12 = vadd.f32 0.4994258, %v2185_v10  ;;  %v3195_v7 = vmul.f32 %v6223_v61, %v6223_v61  ;;  %vm2154_vm0 = vweird.f32 %v6797_v11 }
 0x2c0   : > { %vm2155_vm8 = vweird.f32 %v6852_v55  ;;  %v2664_v19 = vadd.f32 0.112945676, %v2663_v8  ;;  %v3306_v15 = vmul.f32 %v6831_v16, %v6831_v16  ;;  %v2597_v9 = vsel %vm6912_vm7, %v6822_v49, %v2593_v54  ;;  %v1595_v54 = vpop.f32.mrf.mxu1 }
 0x2c1   : > { %v2158_v5 = vand.u32 2147483647, %v6797_v11  ;;  %v2160_v25 = vand.u32 2147483648, %v6797_v11  ;;  %v2700_v59 = vadd.f32 0.001143296, %v2699_v32  ;;  %v2153_v34 = vadd.f32 %v6852_v55, %v2152_v42  ;;  %vm6933_vm11 = vmor %vm2154_vm0, %vm2155_vm8 }
 0x2c2   : > { %v2169_v46 = vadd.f32 0.00028619796, %v2168_v35  ;;  %v6928_v0 = vmul.f32 %v6903_v17, %v4971_v47  ;;  %v3220_v10 = vsel %vm3045_vm10, %v3195_v7, 0.0  ;;  %v6931_v39 = vmul.f32 %v2333_v2, %v1787_v58 }
 0x2c3   : > { %vm2599_vm9 = vcmp.eq.f32.partialorder %v2598_v57, 8.507059e+37  ;;  %v2648_v49 = vmul.f32 2.1237322e-06, %v6786_v62  ;;  %v2187_v11 = vmul.f32 %v2186_v12, %v6744_v18  ;;  %3221 = vadd.xlane.f32.xlu2 %v3220_v10  ;;  %v2137_v42 = vadd.f32 1.1283791, %v2136_v26 }
 0x2c4   : > { %v2602_v32 = vsel %vm2599_vm9, %v2601_v40, %v2597_v9  ;;  %v2665_v35 = vmul.f32 %v2664_v19, %v6786_v62  ;;  %v3319_v53 = vsel %vm3045_vm10, %v3306_v15, 0.0  ;;  %vm2235_vm12 = vweird.f32 %v6737_v22 }
 0x2c5   : > { %4564 = vrcp.f32 %v6905_v1  ;;  %v2161_v58 = vor.u32 1.1754944e-38, %v2160_v25  ;;  %v2701_v57 = vmul.f32 %v2700_v59, %v6879_v30  ;;  %3320 = vadd.xlane.f32.xlu1 %v3319_v53  ;;  %v3088_v2 = vsel %vm3045_vm10, %v6892_v29, 0.0  ;;  %v6964_v59 = vld [vmem:[%s8282_s10] ss:$0 sm:$0xff] }
 0x2c6   : > { %v2157_v40 = vsel %vm6933_vm11, %v6852_v55, %v2153_v34  ;;  %vm2159_vm13 = vcmp.eq.f32.partialorder %v2158_v5, 8.507059e+37  ;;  %v2170_v26 = vmul.f32 %v2169_v46, %v6744_v18  ;;  %v2726_v12 = vmul.f32 %v6928_v0, %v6928_v0  ;;  %3089 = vadd.xlane.f32.xlu0 %v3088_v2 }
 0x2c7   : > { %v2232_v7 = vmul.f32 %v6737_v22, %v2231_v50  ;;  %vm2234_vm14 = vweird.f32 %v6693_v23  ;;  %v2304_v19 = vadd.f32 0.112945676, %v6838_v28  ;;  %v2603_v15 = vmul.f32 %v2602_v32, %v6884_v36 }
 0x2c8   : > { %v6958_v9 = vadd.f32 1.0, %v2187_v11  ;;  %v2613_v55 = vadd.f32 0.05243302, %v2612_v33  ;;  %v2138_v5 = vmul.f32 %v2137_v42, %v6608_v21  ;;  %v2666_v25 = vadd.f32 0.4994258, %v2665_v35  ;;  %vm7014_vm1 = vmor %vm2234_vm14, %vm2235_vm12 }
 0x2c9   : > { %v1596_v14 = vadd.f32 %v6964_v59, %v1595_v54  ;;  %v2162_v50 = vsel %vm2159_vm13, %v2161_v58, %v2157_v40  ;;  %v2649_v34 = vadd.f32 0.00028619796, %v2648_v49  ;;  %v2702_v46 = vadd.f32 0.014752088, %v2701_v57 }
 0x2ca   : > { %v3067_v28 = vsel %vm3045_vm10, %v6931_v39, 0.0  ;;  %v2295_v36 = vadd.f32 0.18741608, %v6874_v6  ;;  %v2171_v10 = vadd.f32 0.0036580483, %v2170_v26  ;;  %v6970_v33 = vmin.f32 %v2726_v12, 16.0 }
 0x2cb   : > { %1632 = vst [vmem:[%s6429_s19 + $0x8] sm:$0xff] %v1596_v14  ;;  %v6975_v21 = vmul.f32 %v6892_v29, %v5536_v45  ;;  %v6977_v8 = vpop.eup %4564  ;;  %v4318_v54 = vclamps-f32 %v2603_v15, 1.0  ;;  %4566 = vrcp.f32 %v6958_v9  ;;  %3068 = vadd.xlane.f32.xlu2 %v3067_v28  ;;  %v3242_v49 = vmul.f32 %v6892_v29, %v6892_v29  ;;  %v1598_v15 = vpop.f32.mrf.mxu1 }
 0x2cc   : > { %v8433_v6 = vand.u32 2147483647, %v6693_v23  ;;  %v8436_v42 = vand.u32 2147483648, %v6834_v48  ;;  %v2163_v53 = vmul.f32 %v2162_v50, %v2138_v5  ;;  %v2667_v58 = vmul.f32 %v2666_v25, %v6786_v62  ;;  %v2442_v50 = vpop.f32.mrf.mxu3 }
 0x2cd   : > { %v3140_v57 = vsel %vm3045_vm10, %v6975_v21, 0.0  ;;  %v2233_v2 = vadd.f32 %v6737_v22, %v2232_v7  ;;  %v2614_v40 = vmul.f32 %v2613_v55, %v6701_v3  ;;  %v2650_v26 = vmul.f32 %v2649_v34, %v6786_v62 }
 0x2ce   : > { %vm6985_vm15 = vcmp.eq.f32.partialorder %v8433_v6, 8.507059e+37  ;;  %v6991_v35 = vor.u32 1.1754944e-38, %v8436_v42  ;;  %v2703_v12 = vmul.f32 %v2702_v46, %v6879_v30  ;;  %3141 = vadd.xlane.f32.xlu1 %v3140_v57  ;;  %v2296_v14 = vmul.f32 %v2295_v36, %v6664_v44 }
 0x2cf   : > { %v2305_v28 = vmul.f32 %v2304_v19, %v6664_v44  ;;  %v2172_v5 = vmul.f32 %v2171_v10, %v6744_v18  ;;  %v2739_v25 = vmul.f32 3.8918573e-05, %v6970_v33  ;;  %v3008_v6 = vadd.f32 1.0, %v4318_v54 }
 0x2d0   : > { %v2630_v7 = vmul.f32 %v6977_v8, %v6905_v1  ;;  %v7007_v55 = vadd.f32 %v6503_v4, %v2442_v50  ;;  %v3257_v34 = vsel %vm3045_vm10, %v3242_v49, 0.0  ;;  %v2462_v46 = vmul.f32 0.5, %v6579_v37 }
 0x2d1   : > { %v1788_v36 = vmul.f32 0.5, %v6599_v31  ;;  %v4298_v10 = vclamps-f32 %v2163_v53, 1.0  ;;  %v7020_v54 = vadd.f32 1.0, %v2667_v58  ;;  %3258 = vadd.xlane.f32.xlu0 %v3257_v34  ;;  %v7022_v42 = vpop.eup %4566  ;;  %v2237_v49 = vsel %vm7014_vm1, %v6737_v22, %v2233_v2 }
 0x2d2   : > { %v2615_v23 = vadd.f32 0.18741608, %v2614_v40  ;;  %v2651_v57 = vadd.f32 0.0036580483, %v2650_v26  ;;  %v2704_v50 = vadd.f32 0.112945676, %v2703_v12  ;;  %v1599_v31 = vadd.f32 %v6964_v59, %v1598_v15 }
 0x2d3   : > { %v2688_v11 = vmul.f32 2.1237322e-06, %v6879_v30  ;;  %v2173_v45 = vadd.f32 0.05243302, %v2172_v5  ;;  %v2740_v37 = vadd.f32 0.001143296, %v2739_v25  ;;  %v7029_v53 = vmul.f32 %v3008_v6, %v2462_v46 }
 0x2d4   : > { %v2631_v58 = vsub.f32 1.0, %v2630_v7  ;;  %v7033_v34 = vmul.f32 %v7007_v55, %v4971_v47  ;;  %v3196_v19 = vmul.f32 %v6931_v39, %v6931_v39  ;;  %v2334_v22 = vadd.f32 1.0, %v4298_v10  ;;  %1633 = vst [vmem:[%s6429_s19 + $0x10] sm:$0xff] %v1599_v31 }
 0x2d5   : > { %8439 = vst [vmem:[#allocation36_spill] sm:$0xff] %v7029_v53  ;;  %4568 = vrcp.f32 %v7020_v54  ;;  %v2190_v2 = vmul.f32 %v7022_v42, %v6958_v9  ;;  %v3307_v40 = vmul.f32 %v6975_v21, %v6975_v21  ;;  %v2242_v26 = vsel %vm6985_vm15, %v6746_v52, %v2237_v49 }
 0x2d6   : > { %v2306_v12 = vadd.f32 0.4994258, %v2305_v28  ;;  %v2705_v15 = vmul.f32 %v2704_v50, %v6879_v30  ;;  %v3223_v5 = vsel %vm3045_vm10, %v3196_v19, 0.0  ;;  %v2616_v25 = vmul.f32 %v2615_v23, %v6701_v3  ;;  %v1601_v28 = vpop.f32.mrf.mxu1 }
 0x2d7   : > { %v2174_v6 = vmul.f32 %v2173_v45, %v6744_v18  ;;  %v2741_v7 = vmul.f32 %v2740_v37, %v6970_v33  ;;  %3224 = vadd.xlane.f32.xlu2 %v3223_v5  ;;  %v3322_v46 = vsel %vm3045_vm10, %v3307_v40, 0.0  ;;  %v7054_v10 = vmul.f32 %v6886_v24, %v6834_v48 }
 0x2d8   : > { %v2632_v52 = vmul.f32 %v6977_v8, %v2631_v58  ;;  %v2766_v32 = vmul.f32 %v7033_v34, %v7033_v34  ;;  %3323 = vadd.xlane.f32.xlu1 %v3322_v46  ;;  %v3091_v3 = vsel %vm3045_vm10, %v7029_v53, 0.0  ;;  %v7061_v45 = vmul.f32 %v2334_v22, %v1788_v36 }
 0x2d9   : > { %v2652_v49 = vmul.f32 %v2651_v57, %v6786_v62  ;;  %v2689_v23 = vadd.f32 0.00028619796, %v2688_v11  ;;  %v2191_v50 = vsub.f32 1.0, %v2190_v2  ;;  %3092 = vadd.xlane.f32.xlu0 %v3091_v3  ;;  %v7065_v37 = vmul.f32 %v2242_v26, %v6706_v63 }
 0x2da   : > { %v7067_v31 = vadd.f32 1.1283791, %v2296_v14  ;;  %v2640_v58 = vand.u32 2147483648, %v6905_v1  ;;  %v2706_v19 = vadd.f32 0.4994258, %v2705_v15  ;;  %v1602_v22 = vadd.f32 %v6964_v59, %v1601_v28  ;;  %v2445_v28 = vpop.f32.mrf.mxu3 }
 0x2db   : > { %v7070_v40 = vpop.eup %4568  ;;  %v2617_v5 = vadd.f32 1.1283791, %v2616_v25  ;;  %v2175_v46 = vadd.f32 0.18741608, %v2174_v6  ;;  %v2742_v36 = vadd.f32 0.014752088, %v2741_v7  ;;  %v2633_v11 = vadd.f32 %v6977_v8, %v2632_v52 }
 0x2dc   : > { %vm2634_vm2 = vweird.f32 %v6905_v1  ;;  %vm2635_vm3 = vweird.f32 %v6977_v8  ;;  %v7076_v63 = vmin.f32 %v2766_v32, 16.0  ;;  %v2653_v14 = vadd.f32 0.05243302, %v2652_v49  ;;  %1634 = vst [vmem:[%s6429_s19 + $0x18] sm:$0xff] %v1602_v22 }
 0x2dd   : > { %v2690_v57 = vmul.f32 %v2689_v23, %v6879_v30  ;;  %v2192_v2 = vmul.f32 %v7022_v42, %v2191_v50  ;;  %v3070_v26 = vsel %vm3045_vm10, %v7061_v45, 0.0  ;;  %v2638_v15 = vand.u32 2147483647, %v6905_v1  ;;  %vm7087_vm4 = vmor %vm2634_vm2, %vm2635_vm3 }
 0x2de   : > { %v2641_v25 = vor.u32 1.1754944e-38, %v2640_v58  ;;  %v2670_v6 = vmul.f32 %v7070_v40, %v7020_v54  ;;  %v2707_v7 = vmul.f32 %v2706_v19, %v6879_v30  ;;  %v2176_v32 = vmul.f32 %v2175_v46, %v6744_v18 }
 0x2df   : > { %vm2194_vm5 = vweird.f32 %v6958_v9  ;;  %vm2195_vm6 = vweird.f32 %v7022_v42  ;;  %v2743_v3 = vmul.f32 %v2742_v36, %v6970_v33  ;;  %3071 = vadd.xlane.f32.xlu2 %v3070_v26  ;;  %v2637_v1 = vsel %vm7087_vm4, %v6977_v8, %v2633_v11 }
 0x2e0   : > { %v2200_v49 = vand.u32 2147483648, %v6958_v9  ;;  %v2779_v23 = vmul.f32 3.8918573e-05, %v7076_v63  ;;  %v7101_v50 = vadd.f32 %v6503_v4, %v2445_v28  ;;  %v2654_v18 = vmul.f32 %v2653_v14, %v6786_v62  ;;  %vm7114_vm0 = vmor %vm2194_vm5, %vm2195_vm6  ;;  %v1604_v28 = vpop.f32.mrf.mxu1 }
 0x2e1   : > { %v2691_v58 = vadd.f32 0.0036580483, %v2690_v57  ;;  %v2193_v19 = vadd.f32 %v7022_v42, %v2192_v2  ;;  %v2198_v46 = vand.u32 2147483647, %v6958_v9  ;;  %v2271_v36 = vsub.f32 1.0, %v7054_v10 }
 0x2e2   : > { %v2307_v22 = vmul.f32 %v2306_v12, %v6664_v44  ;;  %vm2639_vm7 = vcmp.eq.f32.partialorder %v2638_v15, 8.507059e+37  ;;  %v7108_v8 = vadd.f32 1.0, %v2707_v7  ;;  %v2671_v14 = vsub.f32 1.0, %v2670_v6 }
 0x2e3   : > { %v2642_v11 = vsel %vm2639_vm7, %v2641_v25, %v2637_v1  ;;  %v2177_v57 = vadd.f32 1.1283791, %v2176_v32  ;;  %v2744_v2 = vadd.f32 0.112945676, %v2743_v3  ;;  %v2618_v26 = vmul.f32 %v2617_v5, %v6674_v51 }
 0x2e4   : > { %v2201_v10 = vor.u32 1.1754944e-38, %v2200_v49  ;;  %v2780_v52 = vadd.f32 0.001143296, %v2779_v23  ;;  %v7121_v44 = vmul.f32 %v7101_v50, %v4971_v47  ;;  %v2655_v12 = vadd.f32 0.18741608, %v2654_v18 }
 0x2e5   : > { %v2692_v15 = vmul.f32 %v2691_v58, %v6879_v30  ;;  %v2197_v9 = vsel %vm7114_vm0, %v7022_v42, %v2193_v19  ;;  %vm2199_vm8 = vcmp.eq.f32.partialorder %v2198_v46, 8.507059e+37  ;;  %v2643_v25 = vmul.f32 %v2642_v11, %v2618_v26 }
 0x2e6   : > { %4570 = vrcp.f32 %v7108_v8  ;;  %v2728_v6 = vmul.f32 2.1237322e-06, %v6970_v33  ;;  %v7131_v51 = vmul.f32 %v7029_v53, %v5576_v20  ;;  %v7133_v5 = vadd.f32 1.0, %v2307_v22 }
 0x2e7   : > { %v2672_v7 = vmul.f32 %v7070_v40, %v2671_v14  ;;  %v2178_v32 = vmul.f32 %v2177_v57, %v6716_v38  ;;  %v2745_v3 = vmul.f32 %v2744_v2, %v6970_v33  ;;  %v2202_v42 = vsel %vm2199_vm8, %v2201_v10, %v2197_v9 }
 0x2e8   : > { %v2781_v1 = vmul.f32 %v2780_v52, %v7076_v63  ;;  %v2806_v49 = vmul.f32 %v7121_v44, %v7121_v44  ;;  %v3243_v23 = vmul.f32 %v7029_v53, %v7029_v53  ;;  %v2656_v18 = vmul.f32 %v2655_v12, %v6786_v62 }
 0x2e9   : > { %vm2674_vm9 = vweird.f32 %v7020_v54  ;;  %vm2675_vm11 = vweird.f32 %v7070_v40  ;;  %v2693_v58 = vadd.f32 0.05243302, %v2692_v15  ;;  %v4319_v38 = vclamps-f32 %v2643_v25, 1.0 }
 0x2ea   : > { %v2680_v19 = vand.u32 2147483648, %v7020_v54  ;;  %v2729_v46 = vadd.f32 0.00028619796, %v2728_v6  ;;  %v3143_v22 = vsel %vm3045_vm10, %v7131_v51, 0.0  ;;  %4572 = vrcp.f32 %v7133_v5  ;;  %vm7154_vm12 = vmor %vm2674_vm9, %vm2675_vm11 }
 0x2eb   : > { %v2673_v4 = vadd.f32 %v7070_v40, %v2672_v7  ;;  %v2678_v11 = vand.u32 2147483647, %v7020_v54  ;;  %v2203_v14 = vmul.f32 %v2202_v42, %v2178_v32  ;;  %3144 = vadd.xlane.f32.xlu1 %v3143_v22  ;;  %v2746_v2 = vadd.f32 0.4994258, %v2745_v3 }
 0x2ec   : > { %v7152_v62 = vpop.eup %4570  ;;  %v2782_v26 = vadd.f32 0.014752088, %v2781_v1  ;;  %v7158_v10 = vmin.f32 %v2806_v49, 16.0  ;;  %v3260_v52 = vsel %vm3045_vm10, %v3243_v23, 0.0  ;;  %v4300_v12 = vclamps-f32 %v7065_v37, 1.0  ;;  %v2448_v1 = vpop.f32.mrf.mxu3 }
 0x2ed   : > { %v2272_v15 = vmul.f32 %v6886_v24, %v2271_v36  ;;  %v2657_v9 = vadd.f32 1.1283791, %v2656_v18  ;;  %v2694_v54 = vmul.f32 %v2693_v58, %v6879_v30  ;;  %3261 = vadd.xlane.f32.xlu0 %v3260_v52  ;;  %v2463_v25 = vmul.f32 0.5, %v6662_v56 }
 0x2ee   : > { %v3009_v6 = vadd.f32 1.0, %v4319_v38  ;;  %v2681_v7 = vor.u32 1.1754944e-38, %v2680_v19  ;;  %v2730_v32 = vmul.f32 %v2729_v46, %v6970_v33  ;;  %v2677_v3 = vsel %vm7154_vm12, %v7070_v40, %v2673_v4  ;;  %v7182_v40 = vld [vmem:[%s8280_s8 + $0x1] ss:$0 sm:$0xff]  ;;  %v8448_v38 = vld [vmem:[#allocation35_spill] sm:$0xff] }
 0x2ef   : > { %vm7169_vm13 = vcmp.eq.f32.partialorder %v2678_v11, 8.507059e+37  ;;  %v2710_v37 = vmul.f32 %v7152_v62, %v7108_v8  ;;  %v4299_v36 = vclamps-f32 %v2203_v14, 1.0  ;;  %vm2275_vm14 = vweird.f32 %v6886_v24  ;;  %v1607_v11 = vpop.f32.mrf.mxu1 }
 0x2f0   : > { %v2747_v56 = vmul.f32 %v2746_v2, %v6970_v33  ;;  %v2783_v49 = vmul.f32 %v2782_v26, %v7076_v63  ;;  %v2819_v23 = vmul.f32 3.8918573e-05, %v7158_v10  ;;  %v7185_v18 = vadd.f32 %v7182_v40, %v2448_v1  ;;  %v7187_v58 = vpop.eup %4572  ;;  %v8449_v2 = vld [vmem:[#allocation33_spill] sm:$0xff] }
 0x2f1   : > { %v2658_v19 = vmul.f32 %v2657_v9, %v8448_v38  ;;  %v2695_v46 = vadd.f32 0.18741608, %v2694_v54  ;;  %v1605_v22 = vadd.f32 %v6964_v59, %v1604_v28  ;;  %v3197_v4 = vmul.f32 %v7061_v45, %v7061_v45 }
 0x2f2   : > { %vm2274_vm15 = vweird.f32 %v6834_v48  ;;  %v7194_v14 = vmul.f32 %v3009_v6, %v2463_v25  ;;  %v2682_v57 = vsel %vm7169_vm13, %v2681_v7, %v2677_v3  ;;  %v1789_v26 = vmul.f32 0.5, %v8449_v2 }
 0x2f3   : > { %v2731_v52 = vadd.f32 0.0036580483, %v2730_v32  ;;  %v2711_v1 = vsub.f32 1.0, %v2710_v37  ;;  %v2335_v20 = vadd.f32 1.0, %v4299_v36  ;;  %1635 = vst [vmem:[%s6429_s19 + $0x20] sm:$0xff] %v1605_v22  ;;  %v3226_v9 = vsel %vm3045_vm10, %v3197_v4, 0.0  ;;  %vm7248_vm4 = vmor %vm2274_vm15, %vm2275_vm14 }
 0x2f4   : > { %v3308_v28 = vmul.f32 %v7131_v51, %v7131_v51  ;;  %v7203_v54 = vadd.f32 1.0, %v2747_v56  ;;  %v2784_v38 = vadd.f32 0.112945676, %v2783_v49  ;;  %v2820_v53 = vadd.f32 0.001143296, %v2819_v23  ;;  %3227 = vadd.xlane.f32.xlu2 %v3226_v9 }
 0x2f5   : > { %v7207_v25 = vmul.f32 %v7185_v18, %v4971_v47  ;;  %v7209_v6 = vadd.f32 1.0, %v4300_v12  ;;  %v7212_v7 = vadd.f32 %v6886_v24, %v2272_v15  ;;  %v7216_v32 = vmul.f32 %v7187_v58, %v7133_v5 }
 0x2f6   : > { %v2683_v3 = vmul.f32 %v2682_v57, %v2658_v19  ;;  %v2732_v42 = vmul.f32 %v2731_v52, %v6970_v33  ;;  %v2768_v37 = vmul.f32 2.1237322e-06, %v7076_v63  ;;  %v3325_v36 = vsel %vm3045_vm10, %v3308_v28, 0.0  ;;  %v8456_v28 = vld [vmem:[#allocation12_spill] sm:$0xff] }
 0x2f7   : > { %v3094_v56 = vsel %vm3045_vm10, %v7194_v14, 0.0  ;;  %v2696_v49 = vmul.f32 %v2695_v46, %v6879_v30  ;;  %v2712_v15 = vmul.f32 %v7152_v62, %v2711_v1  ;;  %v7226_v23 = vmul.f32 %v2335_v20, %v1789_v26  ;;  %3326 = vadd.xlane.f32.xlu1 %v3325_v36 }
 0x2f8   : > { %3095 = vadd.xlane.f32.xlu0 %v3094_v56  ;;  %4574 = vrcp.f32 %v7203_v54  ;;  %v2785_v19 = vmul.f32 %v2784_v38, %v7076_v63  ;;  %v2821_v22 = vmul.f32 %v2820_v53, %v7158_v10  ;;  %v2846_v4 = vmul.f32 %v7207_v25, %v7207_v25 }
 0x2f9   : > { %8450 = vst [vmem:[#allocation35_spill] sm:$0xff] %v7226_v23  ;;  %vm2714_vm1 = vweird.f32 %v7108_v8  ;;  %vm2715_vm2 = vweird.f32 %v7152_v62  ;;  %v2718_v30 = vand.u32 2147483647, %v7108_v8  ;;  %v1608_v20 = vadd.f32 %v6964_v59, %v1607_v11 }
 0x2fa   : > { %v8451_v46 = vand.u32 2147483647, %v6834_v48  ;;  %v4320_v2 = vclamps-f32 %v2683_v3, 1.0  ;;  %v2720_v53 = vand.u32 2147483648, %v7108_v8  ;;  %v2733_v26 = vadd.f32 0.05243302, %v2732_v42  ;;  %v1610_v42 = vpop.f32.mrf.mxu1  ;;  %vm7266_vm5 = vmor %vm2714_vm1, %vm2715_vm2 }
 0x2fb   : > { %v2769_v52 = vadd.f32 0.00028619796, %v2768_v37  ;;  %v2713_v11 = vadd.f32 %v7152_v62, %v2712_v15  ;;  %1636 = vst [vmem:[%s6429_s19 + $0x28] sm:$0xff] %v1608_v20  ;;  %v3073_v9 = vsel %vm3045_vm10, %v7226_v23, 0.0  ;;  %v7258_v38 = vmul.f32 %v7194_v14, %v8456_v28 }
 0x2fc   : > { %vm7239_vm3 = vcmp.eq.f32.partialorder %v8451_v46, 8.507059e+37  ;;  %v3244_v3 = vmul.f32 %v7194_v14, %v7194_v14  ;;  %v2786_v37 = vadd.f32 0.4994258, %v2785_v19  ;;  %v2822_v36 = vadd.f32 0.014752088, %v2821_v22  ;;  %3074 = vadd.xlane.f32.xlu2 %v3073_v9  ;;  %v2451_v9 = vpop.f32.mrf.mxu3 }
 0x2fd   : > { %8457 = vst [vmem:[#allocation33_spill] sm:$0xff] %v7258_v38  ;;  %v7270_v56 = vmin.f32 %v2846_v4, 16.0  ;;  %v1611_v15 = vadd.f32 %v6964_v59, %v1610_v42  ;;  %v2277_v20 = vsel %vm7248_vm4, %v6886_v24, %v7212_v7  ;;  %v2311_v46 = vsub.f32 1.0, %v7216_v32 }
 0x2fe   : > { %v2320_v8 = vand.u32 2147483648, %v7133_v5  ;;  %v2697_v12 = vadd.f32 1.1283791, %v2696_v49  ;;  %v7279_v28 = vpop.eup %4574  ;;  %vm7281_vm6 = vcmp.eq.f32.partialorder %v2718_v30, 8.507059e+37  ;;  %v2721_v22 = vor.u32 1.1754944e-38, %v2720_v53 }
 0x2ff   : > { %v2770_v4 = vmul.f32 %v2769_v52, %v7076_v63  ;;  %v3146_v42 = vsel %vm3045_vm10, %v7258_v38, 0.0  ;;  %1637 = vst [vmem:[%s6429_s19 + $0x30] sm:$0xff] %v1611_v15  ;;  %v3010_v24 = vadd.f32 1.0, %v4320_v2  ;;  %v2717_v7 = vsel %vm7266_vm5, %v7152_v62, %v2713_v11  ;;  %v8462_v2 = vld [vmem:[#allocation34_spill] sm:$0xff] }
 0x300   : > { %v2734_v32 = vmul.f32 %v2733_v26, %v6970_v33  ;;  %3147 = vadd.xlane.f32.xlu1 %v3146_v42  ;;  %v3263_v49 = vsel %vm3045_vm10, %v3244_v3, 0.0  ;;  %v2787_v30 = vmul.f32 %v2786_v37, %v7076_v63  ;;  %v2823_v53 = vmul.f32 %v2822_v36, %v7158_v10 }
 0x301   : > { %v2859_v52 = vmul.f32 3.8918573e-05, %v7270_v56  ;;  %3264 = vadd.xlane.f32.xlu0 %v3263_v49  ;;  %v3198_v1 = vmul.f32 %v7226_v23, %v7226_v23  ;;  %v2464_v15 = vmul.f32 0.5, %v8462_v2  ;;  %v2698_v48 = vmul.f32 %v2697_v12, %v6845_v27 }
 0x302   : > { %v2750_v62 = vmul.f32 %v7279_v28, %v7203_v54  ;;  %v7304_v26 = vadd.f32 %v7182_v40, %v2451_v9  ;;  %v2722_v11 = vsel %vm7281_vm6, %v2721_v22, %v2717_v7  ;;  %v2771_v3 = vadd.f32 0.0036580483, %v2770_v4  ;;  %v8464_v4 = vld [vmem:[#allocation32_spill] sm:$0xff] }
 0x303   : > { %v3229_v37 = vsel %vm3045_vm10, %v3198_v1, 0.0  ;;  %v3309_v36 = vmul.f32 %v7258_v38, %v7258_v38  ;;  %v2282_v42 = vsel %vm7239_vm3, %v6991_v35, %v2277_v20  ;;  %v2312_v27 = vmul.f32 %v7187_v58, %v2311_v46 }
 0x304   : > { %v7315_v12 = vmul.f32 %v3010_v24, %v2464_v15  ;;  %v2735_v49 = vadd.f32 0.18741608, %v2734_v32  ;;  %vm2314_vm7 = vweird.f32 %v7133_v5  ;;  %v7318_v9 = vadd.f32 1.0, %v2787_v30  ;;  %3230 = vadd.xlane.f32.xlu2 %v3229_v37 }
 0x305   : > { %v2824_v19 = vadd.f32 0.112945676, %v2823_v53  ;;  %v2860_v22 = vadd.f32 0.001143296, %v2859_v52  ;;  %v7322_v7 = vmul.f32 %v7209_v6, %v8464_v4  ;;  %v2723_v1 = vmul.f32 %v2722_v11, %v2698_v48  ;;  %v1613_v53 = vpop.f32.mrf.mxu1  ;;  %v8476_v48 = vld [vmem:[#allocation31_spill] sm:$0xff] }
 0x306   : > { %8463 = vst [vmem:[#allocation34_spill] sm:$0xff] %v7315_v12  ;;  %v2751_v2 = vsub.f32 1.0, %v2750_v62  ;;  %v7326_v35 = vmul.f32 %v7304_v26, %v4971_v47  ;;  %v2283_v57 = vmul.f32 %v2282_v42, %v6862_v41  ;;  %v7329_v20 = vor.u32 1.1754944e-38, %v2320_v8 }
 0x307   : > { %v2772_v46 = vmul.f32 %v2771_v3, %v7076_v63  ;;  %v3328_v24 = vsel %vm3045_vm10, %v3309_v36, 0.0  ;;  %v2313_v32 = vadd.f32 %v7187_v58, %v2312_v27  ;;  %vm2315_vm0 = vweird.f32 %v7187_v58 }
 0x308   : > { %v2736_v6 = vmul.f32 %v2735_v49, %v6970_v33  ;;  %3329 = vadd.xlane.f32.xlu1 %v3328_v24  ;;  %v3097_v30 = vsel %vm3045_vm10, %v7315_v12, 0.0  ;;  %4576 = vrcp.f32 %v7318_v9  ;;  %v2825_v41 = vmul.f32 %v2824_v19, %v7158_v10  ;;  %vm7360_vm11 = vmor %vm2314_vm7, %vm2315_vm0  ;;  %v8470_v19 = vld [vmem:[#allocation14_spill] sm:$0xff] }
 0x309   : > { %v2861_v8 = vmul.f32 %v2860_v22, %v7270_v56  ;;  %3098 = vadd.xlane.f32.xlu0 %v3097_v30  ;;  %v1614_v52 = vadd.f32 %v6964_v59, %v1613_v53  ;;  %v8465_v15 = vand.u32 2147483647, %v7133_v5  ;;  %v4321_v33 = vclamps-f32 %v2723_v1, 1.0 }
 0x30a   : > { %v2752_v62 = vmul.f32 %v7279_v28, %v2751_v2  ;;  %v2808_v11 = vmul.f32 2.1237322e-06, %v7158_v10  ;;  %v2886_v3 = vmul.f32 %v7326_v35, %v7326_v35  ;;  %vm2754_vm9 = vweird.f32 %v7203_v54 }
 0x30b   : > { %vm7344_vm8 = vcmp.eq.f32.partialorder %v8465_v15, 8.507059e+37  ;;  %v2758_v37 = vand.u32 2147483647, %v7203_v54  ;;  %v2760_v36 = vand.u32 2147483648, %v7203_v54  ;;  %v2773_v42 = vadd.f32 0.05243302, %v2772_v46  ;;  %v2454_v15 = vpop.f32.mrf.mxu3 }
 0x30c   : > { %1638 = vst [vmem:[%s6429_s19 + $0x38] sm:$0xff] %v1614_v52  ;;  %vm2755_vm12 = vweird.f32 %v7279_v28  ;;  %v3076_v49 = vsel %vm3045_vm10, %v7322_v7, 0.0  ;;  %v7369_v22 = vmul.f32 %v7315_v12, %v8470_v19  ;;  %v3245_v4 = vmul.f32 %v7315_v12, %v7315_v12 }
 0x30d   : > { %v4301_v1 = vclamps-f32 %v2283_v57, 1.0  ;;  %v2317_v5 = vsel %vm7360_vm11, %v7187_v58, %v2313_v32  ;;  %v2826_v2 = vadd.f32 0.4994258, %v2825_v41  ;;  %v2862_v46 = vadd.f32 0.014752088, %v2861_v8  ;;  %3077 = vadd.xlane.f32.xlu2 %v3076_v49  ;;  %vm7386_vm13 = vmor %vm2754_vm9, %vm2755_vm12  ;;  %v1616_v8 = vpop.f32.mrf.mxu1  ;;  %v8475_v49 = vld [vmem:[#allocation29_spill] sm:$0xff] }
 0x30e   : > { %v2465_v24 = vmul.f32 0.5, %v6820_v43  ;;  %v2753_v30 = vadd.f32 %v7279_v28, %v2752_v62  ;;  %v2809_v53 = vadd.f32 0.00028619796, %v2808_v11  ;;  %v7378_v52 = vmin.f32 %v2886_v3, 16.0  ;;  %v7380_v19 = vpop.eup %4576 }
 0x30f   : > { %v3011_v38 = vadd.f32 1.0, %v4321_v33  ;;  %v2737_v12 = vadd.f32 1.1283791, %v2736_v6  ;;  %v2774_v43 = vmul.f32 %v2773_v42, %v7076_v63  ;;  %v3149_v57 = vsel %vm3045_vm10, %v7369_v22, 0.0 }
 0x310   : > { %vm7393_vm14 = vcmp.eq.f32.partialorder %v2758_v37, 8.507059e+37  ;;  %v2761_v41 = vor.u32 1.1754944e-38, %v2760_v36  ;;  %3150 = vadd.xlane.f32.xlu1 %v3149_v57  ;;  %v3266_v6 = vsel %vm3045_vm10, %v3245_v4, 0.0  ;;  %v3199_v54 = vmul.f32 %v7322_v7, %v7322_v7 }
 0x311   : > { %v2827_v33 = vmul.f32 %v2826_v2, %v7158_v10  ;;  %v2863_v62 = vmul.f32 %v2862_v46, %v7270_v56  ;;  %v7403_v11 = vadd.f32 %v7182_v40, %v2454_v15  ;;  %3267 = vadd.xlane.f32.xlu0 %v3266_v6  ;;  %v1617_v3 = vadd.f32 %v6964_v59, %v1616_v8 }
 0x312   : > { %v2757_v37 = vsel %vm7386_vm13, %v7279_v28, %v2753_v30  ;;  %v2790_v36 = vmul.f32 %v7380_v19, %v7318_v9  ;;  %v2810_v42 = vmul.f32 %v2809_v53, %v7158_v10  ;;  %v2899_v27 = vmul.f32 3.8918573e-05, %v7378_v52 }
 0x313   : > { %v1791_v4 = vmul.f32 0.5, %v8475_v49  ;;  %v2337_v2 = vadd.f32 1.0, %v4301_v1  ;;  %v2322_v46 = vsel %vm7344_vm8, %v7329_v20, %v2317_v5  ;;  %1639 = vst [vmem:[%s6429_s19 + $0x40] sm:$0xff] %v1617_v3  ;;  %v3310_v15 = vmul.f32 %v7369_v22, %v7369_v22 }
 0x314   : > { %v7420_v58 = vmul.f32 %v3011_v38, %v2465_v24  ;;  %v2738_v28 = vmul.f32 %v2737_v12, %v6928_v0  ;;  %v2775_v30 = vadd.f32 0.18741608, %v2774_v43  ;;  %v3232_v53 = vsel %vm3045_vm10, %v3199_v54, 0.0 }
 0x315   : > { %v2762_v57 = vsel %vm7393_vm14, %v2761_v41, %v2757_v37  ;;  %v7426_v6 = vadd.f32 1.0, %v2827_v33  ;;  %v2864_v1 = vadd.f32 0.112945676, %v2863_v62  ;;  %v7430_v20 = vmul.f32 %v7403_v11, %v4971_v47  ;;  %3233 = vadd.xlane.f32.xlu2 %v3232_v53  ;;  %v1619_v54 = vpop.f32.mrf.mxu1 }
 0x316   : > { %v2298_v38 = vmul.f32 %v7067_v31, %v8476_v48  ;;  %v2791_v5 = vsub.f32 1.0, %v2790_v36  ;;  %v2811_v24 = vadd.f32 0.0036580483, %v2810_v42  ;;  %v2900_v0 = vadd.f32 0.001143296, %v2899_v27 }
 0x317   : > { %v3331_v12 = vsel %vm3045_vm10, %v3310_v15, 0.0  ;;  %v7435_v43 = vmul.f32 %v2337_v2, %v1791_v4  ;;  %v2763_v41 = vmul.f32 %v2762_v57, %v2738_v28  ;;  %v3100_v8 = vsel %vm3045_vm10, %v7420_v58, 0.0  ;;  %v8477_v4 = vld [vmem:[#allocation15_spill] sm:$0xff] }
 0x318   : > { %v2323_v32 = vmul.f32 %v2322_v46, %v2298_v38  ;;  %3332 = vadd.xlane.f32.xlu1 %v3331_v12  ;;  %4578 = vrcp.f32 %v7426_v6  ;;  %v2865_v33 = vmul.f32 %v2864_v1, %v7270_v56  ;;  %v2926_v31 = vmul.f32 %v7430_v20, %v7430_v20  ;;  %v2457_v38 = vpop.f32.mrf.mxu3 }
 0x319   : > { %3101 = vadd.xlane.f32.xlu0 %v3100_v8  ;;  %v1620_v62 = vadd.f32 %v6964_v59, %v1619_v54  ;;  %v2776_v3 = vmul.f32 %v2775_v30, %v7076_v63  ;;  %v2792_v37 = vmul.f32 %v7380_v19, %v2791_v5  ;;  %v2812_v36 = vmul.f32 %v2811_v24, %v7158_v10 }
 0x31a   : > { %v2901_v42 = vmul.f32 %v2900_v0, %v7378_v52  ;;  %vm2794_vm15 = vweird.f32 %v7318_v9  ;;  %v2798_v27 = vand.u32 2147483647, %v7318_v9  ;;  %v2848_v49 = vmul.f32 2.1237322e-06, %v7270_v56 }
 0x31b   : > { %1640 = vst [vmem:[%s6429_s19 + $0x48] sm:$0xff] %v1620_v62  ;;  %v7454_v2 = vmul.f32 %v7420_v58, %v8477_v4  ;;  %v4322_v59 = vclamps-f32 %v2763_v41, 1.0  ;;  %vm2795_vm1 = vweird.f32 %v7380_v19  ;;  %v3079_v63 = vsel %vm3045_vm10, %v7435_v43, 0.0  ;;  %s4656_s19 = scalar_lea.hbm %s8283_s11, 208 }
 0x31c   : > { %v3246_v46 = vmul.f32 %v7420_v58, %v7420_v58  ;;  %v2800_v15 = vand.u32 2147483648, %v7318_v9  ;;  %v2866_v28 = vadd.f32 0.4994258, %v2865_v33  ;;  %v7462_v30 = vmin.f32 %v2926_v31, 16.0  ;;  %vm7472_vm2 = vmor %vm2794_vm15, %vm2795_vm1  ;;  %p4658_p1 = scmp.lt.s32.totalorder %s4656_s19, %s4652_s20 }
 0x31d   : > { %3080 = vadd.xlane.f32.xlu2 %v3079_v63  ;;  %v4302_v53 = vclamps-f32 %v2323_v32, 1.0  ;;  %v2793_v57 = vadd.f32 %v7380_v19, %v2792_v37  ;;  %v2813_v1 = vadd.f32 0.05243302, %v2812_v36  ;;  %v2902_v48 = vadd.f32 0.014752088, %v2901_v42 }
 0x31e   : > { %v7465_v5 = vpop.eup %4578  ;;  %v2466_v24 = vmul.f32 0.5, %v6903_v17  ;;  %v2777_v0 = vadd.f32 1.1283791, %v2776_v3  ;;  %v2849_v41 = vadd.f32 0.00028619796, %v2848_v49  ;;  %v3152_v32 = vsel %vm3045_vm10, %v7454_v2, 0.0  ;;  %p4659_p2 = por %p4658_p1, %p4657_p0 }
 0x31f   : > { %v3012_v8 = vadd.f32 1.0, %v4322_v59  ;;  %vm7478_vm3 = vcmp.eq.f32.partialorder %v2798_v27, 8.507059e+37  ;;  %v3269_v17 = vsel %vm3045_vm10, %v3246_v46, 0.0  ;;  %v3200_v33 = vmul.f32 %v7435_v43, %v7435_v43 }
 0x320   : > { %3153 = vadd.xlane.f32.xlu1 %v3152_v32  ;;  %v2801_v9 = vor.u32 1.1754944e-38, %v2800_v15  ;;  %v2867_v31 = vmul.f32 %v2866_v28, %v7270_v56  ;;  %v2939_v62 = vmul.f32 3.8918573e-05, %v7462_v30  ;;  %v7488_v3 = vadd.f32 %v7182_v40, %v2457_v38  ;;  %p4660_p3 = pnand %p4659_p2, %p4655_p13 }
 0x321   : > { %3270 = vadd.xlane.f32.xlu0 %v3269_v17  ;;  %v2797_v37 = vsel %vm7472_vm2, %v7380_v19, %v2793_v57  ;;  %v2814_v36 = vmul.f32 %v2813_v1, %v7158_v10  ;;  %v2830_v42 = vmul.f32 %v7465_v5, %v7426_v6  ;;  %v2903_v27 = vmul.f32 %v2902_v48, %v7378_v52  ;;  %v8482_v48 = vld [vmem:[#allocation30_spill] sm:$0xff] }
 0x322   : > { %v2850_v49 = vmul.f32 %v2849_v41, %v7270_v56  ;;  %v3311_v59 = vmul.f32 %v7454_v2, %v7454_v2  ;;  %v2338_v63 = vadd.f32 1.0, %v4302_v53  ;;  %v7500_v40 = vmul.f32 %v3012_v8, %v2466_v24 }
 0x323   : > { %v2778_v46 = vmul.f32 %v2777_v0, %v7033_v34  ;;  %v3235_v15 = vsel %vm3045_vm10, %v3200_v33, 0.0  ;;  %v2802_v19 = vsel %vm7478_vm3, %v2801_v9, %v2797_v37  ;;  %v7506_v28 = vadd.f32 1.0, %v2867_v31 }
 0x324   : > { %v2940_v57 = vadd.f32 0.001143296, %v2939_v62  ;;  %v7510_v1 = vmul.f32 %v7488_v3, %v4971_v47  ;;  %v1792_v38 = vmul.f32 0.5, %v8482_v48  ;;  %v2815_v53 = vadd.f32 0.18741608, %v2814_v36 }
 0x325   : > { %3236 = vadd.xlane.f32.xlu2 %v3235_v15  ;;  %v2831_v24 = vsub.f32 1.0, %v2830_v42  ;;  %v2904_v12 = vadd.f32 0.112945676, %v2903_v27  ;;  %v2851_v41 = vadd.f32 0.0036580483, %v2850_v49  ;;  %v3334_v34 = vsel %vm3045_vm10, %v3311_v59, 0.0 }
 0x326   : > { %v7514_v0 = vmul.f32 %v2338_v63, %v1792_v38  ;;  %v2803_v32 = vmul.f32 %v2802_v19, %v2778_v46  ;;  %v3103_v8 = vsel %vm3045_vm10, %v7500_v40, 0.0  ;;  %4580 = vrcp.f32 %v7506_v28 }
 0x327   : > { %v2941_v47 = vmul.f32 %v2940_v57, %v7462_v30  ;;  %v2966_v54 = vmul.f32 %v7510_v1, %v7510_v1  ;;  %v2816_v17 = vmul.f32 %v2815_v53, %v7158_v10  ;;  %v2832_v33 = vmul.f32 %v7465_v5, %v2831_v24  ;;  %v3087_v57 = vpop.xlane.xlu2 %3086 }
 0x328   : > { %3335 = vadd.xlane.f32.xlu1 %v3334_v34  ;;  %v2888_v9 = vmul.f32 2.1237322e-06, %v7378_v52  ;;  %v2905_v31 = vmul.f32 %v2904_v12, %v7378_v52  ;;  %vm2834_vm4 = vweird.f32 %v7426_v6  ;;  %v2838_v62 = vand.u32 2147483647, %v7426_v6 }
 0x329   : > { %3104 = vadd.xlane.f32.xlu0 %v3103_v8  ;;  %v2852_v37 = vmul.f32 %v2851_v41, %v7270_v56  ;;  %v7531_v36 = vmul.f32 %v7500_v40, %v6223_v61  ;;  %v4323_v42 = vclamps-f32 %v2803_v32, 1.0  ;;  %vm2835_vm5 = vweird.f32 %v7465_v5 }
 0x32a   : > { %v3082_v10 = vsel %vm3045_vm10, %v7514_v0, 0.0  ;;  %v3247_v27 = vmul.f32 %v7500_v40, %v7500_v40  ;;  %v2840_v49 = vand.u32 2147483648, %v7426_v6  ;;  %v2942_v59 = vadd.f32 0.014752088, %v2941_v47  ;;  %vm7547_vm6 = vmor %vm2834_vm4, %vm2835_vm5  ;;  %v3139_v6 = vpop.xlane.xlu1 %3138 }
 0x32b   : > { %v7539_v63 = vmin.f32 %v2966_v54, 16.0  ;;  %v2833_v46 = vadd.f32 %v7465_v5, %v2832_v33  ;;  %v2889_v15 = vadd.f32 0.00028619796, %v2888_v9  ;;  %v2906_v19 = vadd.f32 0.4994258, %v2905_v31  ;;  %v8487_v33 = vld [vmem:[#allocation25_spill] sm:$0xff]  ;;  %v3256_v24 = vpop.xlane.xlu0 %3255 }
 0x32c   : > { %v7542_v48 = vpop.eup %4580  ;;  %v2467_v38 = vmul.f32 0.5, %v7007_v55  ;;  %v2817_v53 = vadd.f32 1.1283791, %v2816_v17  ;;  %v2853_v12 = vadd.f32 0.05243302, %v2852_v37  ;;  %v3155_v41 = vsel %vm3045_vm10, %v7531_v36, 0.0 }
 0x32d   : > { %3083 = vadd.xlane.f32.xlu2 %v3082_v10  ;;  %v3013_v34 = vadd.f32 1.0, %v4323_v42  ;;  %vm7553_vm7 = vcmp.eq.f32.partialorder %v2838_v62, 8.507059e+37  ;;  %v3272_v8 = vsel %vm3045_vm10, %v3247_v27, 0.0  ;;  %v3201_v55 = vmul.f32 %v7514_v0, %v7514_v0 }
 0x32e   : > { %v2841_v47 = vor.u32 1.1754944e-38, %v2840_v49  ;;  %v2943_v54 = vmul.f32 %v2942_v59, %v7462_v30  ;;  %v2979_v17 = vmul.f32 3.8918573e-05, %v7539_v63  ;;  %v3124_v9 = vadd.f32 %v3087_v57, %v8487_v33 }
 0x32f   : > { %v2837_v31 = vsel %vm7547_vm6, %v7465_v5, %v2833_v46  ;;  %v2870_v62 = vmul.f32 %v7542_v48, %v7506_v28  ;;  %v2890_v37 = vmul.f32 %v2889_v15, %v7378_v52  ;;  %v2907_v42 = vmul.f32 %v2906_v19, %v7378_v52 }
 0x330   : > { %3156 = vadd.xlane.f32.xlu1 %v3155_v41  ;;  %v2854_v10 = vmul.f32 %v2853_v12, %v7270_v56  ;;  %v3312_v27 = vmul.f32 %v7531_v36, %v7531_v36  ;;  %v7573_v49 = vmul.f32 %v3013_v34, %v2467_v38  ;;  %v2818_v59 = vmul.f32 %v2817_v53, %v7121_v44 }
 0x331   : > { %3273 = vadd.xlane.f32.xlu0 %v3272_v8  ;;  %v3238_v57 = vsel %vm3045_vm10, %v3201_v55, 0.0  ;;  %v2842_v5 = vsel %vm7553_vm7, %v2841_v47, %v2837_v31  ;;  %v2944_v46 = vadd.f32 0.112945676, %v2943_v54  ;;  %v2980_v41 = vadd.f32 0.001143296, %v2979_v17  ;;  %v8488_v55 = vld [vmem:[#allocation13_spill] sm:$0xff] }
 0x332   : > { %v3176_v15 = vadd.f32 %v3139_v6, %v3124_v9  ;;  %v2871_v19 = vsub.f32 1.0, %v2870_v62  ;;  %v2891_v8 = vadd.f32 0.0036580483, %v2890_v37  ;;  %v7579_v12 = vadd.f32 1.0, %v2907_v42  ;;  %v8489_v6 = vld [vmem:[#allocation16_spill] sm:$0xff] }
 0x333   : > { %v2855_v33 = vadd.f32 0.18741608, %v2854_v10  ;;  %v3337_v38 = vsel %vm3045_vm10, %v3312_v27, 0.0  ;;  %v2843_v34 = vmul.f32 %v2842_v5, %v2818_v59  ;;  %v3106_v44 = vsel %vm3045_vm10, %v7573_v49, 0.0 }
 0x334   : > { %v2945_v53 = vmul.f32 %v2944_v46, %v7462_v30  ;;  %v2981_v32 = vmul.f32 %v2980_v41, %v7539_v63  ;;  %v7587_v47 = vmul.f32 %v3176_v15, %v8488_v55  ;;  %v3293_v54 = vadd.f32 %v3256_v24, %v8489_v6 }
 0x335   : > { %3239 = vadd.xlane.f32.xlu2 %v3238_v57  ;;  %v2872_v17 = vmul.f32 %v7542_v48, %v2871_v19  ;;  %v2892_v9 = vmul.f32 %v2891_v8, %v7378_v52  ;;  %4582 = vrcp.f32 %v7579_v12  ;;  %v2928_v31 = vmul.f32 2.1237322e-06, %v7462_v30 }
 0x336   : > { %v2856_v37 = vmul.f32 %v2855_v33, %v7270_v56  ;;  %vm2874_vm0 = vweird.f32 %v7506_v28  ;;  %v7598_v42 = vmul.f32 %v7573_v49, %v6931_v39  ;;  %v4324_v27 = vclamps-f32 %v2843_v34, 1.0 }
 0x337   : > { %vm2875_vm8 = vweird.f32 %v7542_v48  ;;  %v2880_v59 = vand.u32 2147483648, %v7506_v28  ;;  %v3248_v57 = vmul.f32 %v7573_v49, %v7573_v49  ;;  %v2946_v24 = vadd.f32 0.4994258, %v2945_v53 }
 0x338   : > { %3338 = vadd.xlane.f32.xlu1 %v3337_v38  ;;  %v3321_v62 = vpop.xlane.xlu1 %3320  ;;  %v2982_v5 = vadd.f32 0.014752088, %v2981_v32  ;;  %v3397_v56 = vmul.f32 %v7587_v47, %v7587_v47  ;;  %v2873_v41 = vadd.f32 %v7542_v48, %v2872_v17  ;;  %v2878_v15 = vand.u32 2147483647, %v7506_v28  ;;  %vm7611_vm9 = vmor %vm2874_vm0, %vm2875_vm8 }
 0x339   : > { %3107 = vadd.xlane.f32.xlu0 %v3106_v44  ;;  %v3358_v10 = vadd.f32 %v3321_v62, %v3293_v54  ;;  %v2893_v19 = vadd.f32 0.05243302, %v2892_v9  ;;  %v2929_v8 = vadd.f32 0.00028619796, %v2928_v31  ;;  %v3090_v33 = vpop.xlane.xlu0 %3089  ;;  %v3158_v34 = vsel %vm3045_vm10, %v7598_v42, 0.0 }
 0x33a   : > { %v2468_v32 = vmul.f32 0.5, %v7101_v50  ;;  %v3014_v6 = vadd.f32 1.0, %v4324_v27  ;;  %v2857_v54 = vadd.f32 1.1283791, %v2856_v37  ;;  %v3275_v17 = vsel %vm3045_vm10, %v3248_v57, 0.0 }
 0x33b   : > { %v3384_v46 = vmul.f32 %v3358_v10, %v8488_v55  ;;  %v7617_v53 = vpop.eup %4582  ;;  %v2881_v9 = vor.u32 1.1754944e-38, %v2880_v59  ;;  %v2947_v28 = vmul.f32 %v2946_v24, %v7462_v30  ;;  %v2983_v31 = vmul.f32 %v2982_v5, %v7539_v63 }
 0x33c   : > { %v2877_v10 = vsel %vm7611_vm9, %v7542_v48, %v2873_v41  ;;  %vm2879_vm11 = vcmp.eq.f32.partialorder %v2878_v15, 8.507059e+37  ;;  %v2894_v50 = vmul.f32 %v2893_v19, %v7378_v52  ;;  %v2930_v37 = vmul.f32 %v2929_v8, %v7462_v30  ;;  %v4332_v48 = vld [vmem:[%s8281_s9 + $0x38] sm:$0xff] }
 0x33d   : > { %v3410_v44 = vsub.f32 %v3384_v46, %v3397_v56  ;;  %v2910_v59 = vmul.f32 %v7617_v53, %v7579_v12  ;;  %v3313_v57 = vmul.f32 %v7598_v42, %v7598_v42  ;;  %v7635_v24 = vmul.f32 %v3014_v6, %v2468_v32  ;;  %v3737_v56 = vld [vmem:[%s8281_s9 + $0x18] sm:$0xff]  ;;  %3794 = vmatpush.msrb.mxu0 %v4332_v48  ;;  %v4329_v48 = vld [vmem:[%s8281_s9 + $0x20] sm:$0xff] }
 0x33e   : > { %v2858_v5 = vmul.f32 %v2857_v54, %v7207_v25  ;;  %v4362_v46 = vld [vmem:[%s8281_s9 + $0x58] sm:$0xff]  ;;  %v2882_v41 = vsel %vm2879_vm11, %v2881_v9, %v2877_v10  ;;  %v7647_v15 = vadd.f32 1.0, %v2947_v28  ;;  %v2984_v19 = vadd.f32 0.112945676, %v2983_v31  ;;  %3889 = vmatpush.msrb.mxu1 %v3737_v56  ;;  %v4331_v25 = vld [vmem:[%s8281_s9 + $0x30] sm:$0xff]  ;;  %v3734_v56 = vld [vmem:[%s8281_s9] sm:$0xff] }
 0x33f   : > { %v7623_v62 = vadd.f32 1e-12, %v3410_v44  ;;  %v8492_v8 = vld [vmem:[#allocation17_spill] sm:$0xff]  ;;  %v4361_v44 = vld [vmem:[%s8281_s9 + $0x50] sm:$0xff]  ;;  %v2895_v32 = vadd.f32 0.18741608, %v2894_v50  ;;  %3989 = vmatpush.msrb.mxu2 %v4362_v46  ;;  %3795 = vmatpush.msrb.mxu0 %v4331_v25  ;;  %vm2914_vm12 = vweird.f32 %v7579_v12  ;;  %vm2915_vm13 = vweird.f32 %v7617_v53 }
 0x340   : > { %3159 = vadd.xlane.f32.xlu1 %v3158_v34  ;;  %v3125_v38 = vadd.f32 %v3090_v33, %v8492_v8  ;;  %v3736_v34 = vld [vmem:[%s8281_s9 + $0x10] sm:$0xff]  ;;  %v2931_v6 = vadd.f32 0.0036580483, %v2930_v37  ;;  %v2911_v54 = vsub.f32 1.0, %v2910_v59  ;;  %v3340_v33 = vsel %vm3045_vm10, %v3313_v57, 0.0  ;;  %v4330_v37 = vld [vmem:[%s8281_s9 + $0x28] sm:$0xff]  ;;  %vm7715_vm14 = vmor %vm2914_vm12, %vm2915_vm13 }
 0x341   : > { %3276 = vadd.xlane.f32.xlu0 %v3275_v17  ;;  %v3142_v27 = vpop.xlane.xlu1 %3141  ;;  %4584 = vrsqrt.f32 %v7623_v62  ;;  %3890 = vmatpush.msrb.mxu1 %v3736_v34  ;;  %v2883_v9 = vmul.f32 %v2882_v41, %v2858_v5  ;;  %v3109_v28 = vsel %vm3045_vm10, %v7635_v24, 0.0  ;;  %v2985_v50 = vmul.f32 %v2984_v19, %v7539_v63  ;;  %v4360_v59 = vld [vmem:[%s8281_s9 + $0x48] sm:$0xff]  ;;  %v4359_v46 = vld [vmem:[%s8281_s9 + $0x40] sm:$0xff] }
 0x342   : > { %v3177_v17 = vadd.f32 %v3142_v27, %v3125_v38  ;;  %3990 = vmatpush.msrb.mxu2 %v4361_v44  ;;  %4586 = vrcp.f32 %v7647_v15  ;;  %v3735_v27 = vld [vmem:[%s8281_s9 + $0x8] sm:$0xff]  ;;  %v2896_v57 = vmul.f32 %v2895_v32, %v7378_v52  ;;  %v2932_v5 = vmul.f32 %v2931_v6, %v7462_v30  ;;  %3796 = vmatpush.msrb.mxu0 %v4330_v37  ;;  %v8493_v8 = vld [vmem:[#allocation18_spill] sm:$0xff] }
 0x343   : > { %3891 = vmatpush.msrb.mxu1 %v3735_v27  ;;  %v2912_v41 = vmul.f32 %v7617_v53, %v2911_v54  ;;  %v7689_v52 = vmul.f32 %v7635_v24, %v7061_v45  ;;  %v4325_v25 = vclamps-f32 %v2883_v9, 1.0  ;;  %v2968_v34 = vmul.f32 2.1237322e-06, %v7539_v63 }
 0x344   : > { %v3259_v31 = vpop.xlane.xlu0 %3258  ;;  %v7692_v19 = vmul.f32 %v3177_v17, %v8488_v55  ;;  %3991 = vmatpush.msrb.mxu2 %v4360_v59  ;;  %v3249_v32 = vmul.f32 %v7635_v24, %v7635_v24  ;;  %3797 = vmatpush.msrb.mxu0 %v4329_v48  ;;  %v2986_v54 = vadd.f32 0.4994258, %v2985_v50  ;;  %v2469_v17 = vmul.f32 0.5, %v7185_v18 }
 0x345   : > { %v3294_v38 = vadd.f32 %v3259_v31, %v8493_v8  ;;  %3892 = vmatpush.msrb.mxu1 %v3734_v56  ;;  %v2918_v9 = vand.u32 2147483647, %v7579_v12  ;;  %v2933_v31 = vadd.f32 0.05243302, %v2932_v5  ;;  %v2913_v27 = vadd.f32 %v7617_v53, %v2912_v41 }
 0x346   : > { %3992 = vmatpush.msrb.mxu2 %v4359_v46  ;;  %v3161_v59 = vsel %vm3045_vm10, %v7689_v52, 0.0  ;;  %v3398_v50 = vmul.f32 %v7692_v19, %v7692_v19  ;;  %v3015_v56 = vadd.f32 1.0, %v4325_v25  ;;  %v2969_v5 = vadd.f32 0.00028619796, %v2968_v34 }
 0x347   : > { %v7662_v10 = vpop.eup %4584  ;;  %v3278_v41 = vsel %vm3045_vm10, %v3249_v32, 0.0  ;;  %v2897_v8 = vadd.f32 1.1283791, %v2896_v57  ;;  %v2934_v25 = vmul.f32 %v2933_v31, %v7462_v30  ;;  %v2917_v34 = vsel %vm7715_vm14, %v7617_v53, %v2913_v27 }
 0x348   : > { %3341 = vadd.xlane.f32.xlu1 %v3340_v33  ;;  %v3437_v44 = vmul.f32 %v7662_v10, %v7623_v62  ;;  %v7705_v37 = vpop.eup %4586  ;;  %vm2919_vm15 = vcmp.eq.f32.partialorder %v2918_v9, 8.507059e+37  ;;  %v7732_v57 = vmul.f32 %v3015_v56, %v2469_v17  ;;  %vm2954_vm1 = vweird.f32 %v7647_v15 }
 0x349   : > { %3110 = vadd.xlane.f32.xlu0 %v3109_v28  ;;  %v2920_v28 = vand.u32 2147483648, %v7579_v12  ;;  %v2950_v12 = vmul.f32 %v7705_v37, %v7647_v15  ;;  %v2898_v31 = vmul.f32 %v2897_v8, %v7326_v35  ;;  %vm2955_vm2 = vweird.f32 %v7705_v37 }
 0x34a   : > { %v3438_v46 = vmul.f32 %v7662_v10, %v3437_v44  ;;  %v3314_v44 = vmul.f32 %v7689_v52, %v7689_v52  ;;  %v3112_v17 = vsel %vm3045_vm10, %v7732_v57, 0.0  ;;  %v7750_v8 = vmul.f32 %v7732_v57, %v7226_v23  ;;  %vm7760_vm4 = vmor %vm2954_vm1, %vm2955_vm2 }
 0x34b   : > { %v3324_v6 = vpop.xlane.xlu1 %3323  ;;  %vm3443_vm3 = vweird.f32 %v7662_v10  ;;  %vm3442_vm5 = vweird.f32 %v7623_v62 }
 0x34c   : > { %v3359_v33 = vadd.f32 %v3324_v6, %v3294_v38  ;;  %v2987_v38 = vmul.f32 %v2986_v54, %v7539_v63  ;;  %v2970_v54 = vmul.f32 %v2969_v5, %v7539_v63  ;;  %v3343_v53 = vsel %vm3045_vm10, %v3314_v44, 0.0  ;;  %v3093_v9 = vpop.xlane.xlu0 %3092  ;;  %8496 = vst [vmem:[#allocation32_spill] sm:$0xff] %v7750_v8  ;;  %vm3444_vm6 = vmor %vm3442_vm5, %vm3443_vm3 }
 0x34d   : > { %v2960_v44 = vand.u32 2147483648, %v7647_v15 }
 0x34e   : > { %v3385_v48 = vmul.f32 %v3359_v33, %v8488_v55  ;;  %v2921_v33 = vor.u32 1.1754944e-38, %v2920_v28  ;;  %v3439_v28 = vmul.f32 0.5, %v3438_v46  ;;  %v2971_v27 = vadd.f32 0.0036580483, %v2970_v54 }
 0x34f   : > { %v2958_v46 = vand.u32 2147483647, %v7647_v15 }
 0x350   : > { %3162 = vadd.xlane.f32.xlu1 %v3161_v59  ;;  %v3411_v6 = vsub.f32 %v3385_v48, %v3398_v50  ;;  %v7736_v59 = vadd.f32 1.0, %v2987_v38  ;;  %v2922_v48 = vsel %vm2919_vm15, %v2921_v33, %v2917_v34  ;;  %v2935_v50 = vadd.f32 0.18741608, %v2934_v25 }
 0x351   : > { %3279 = vadd.xlane.f32.xlu0 %v3278_v41  ;;  %v2951_v41 = vsub.f32 1.0, %v2950_v12  ;;  %v3440_v18 = vsub.f32 1.5, %v3439_v28  ;;  %v2923_v56 = vmul.f32 %v2922_v48, %v2898_v31  ;;  %v2470_v28 = vmul.f32 0.5, %v7304_v26 }
 0x352   : > { %v7730_v32 = vadd.f32 1e-12, %v3411_v6  ;;  %v2936_v35 = vmul.f32 %v2935_v50, %v7462_v30  ;;  %v2972_v6 = vmul.f32 %v2971_v27, %v7539_v63  ;;  %v3250_v30 = vmul.f32 %v7732_v57, %v7732_v57 }
 0x353   : > { %v2952_v5 = vmul.f32 %v7705_v37, %v2951_v41  ;;  %v3441_v33 = vmul.f32 %v7662_v10, %v3440_v18  ;;  %v4326_v25 = vclamps-f32 %v2923_v56, 1.0  ;;  %v3164_v50 = vsel %vm3045_vm10, %v7750_v8, 0.0 }
 0x354   : > { %4588 = vrsqrt.f32 %v7730_v32  ;;  %v2937_v31 = vadd.f32 1.1283791, %v2936_v35  ;;  %vm7773_vm7 = vcmp.eq.f32.partialorder %v2958_v46, 8.507059e+37  ;;  %v3281_v62 = vsel %vm3045_vm10, %v3250_v30, 0.0 }
 0x355   : > { %4590 = vrcp.f32 %v7736_v59  ;;  %v2953_v12 = vadd.f32 %v7705_v37, %v2952_v5  ;;  %v3445_v15 = vsel %vm3444_vm6, %v7662_v10, %v3441_v33  ;;  %v3016_v27 = vadd.f32 1.0, %v4326_v25  ;;  %v7806_v33 = vld [vmem:[%s8280_s8 + $0x2] ss:$0 sm:$0xff] }
 0x356   : > { %v3566_v26 = vsub.f32 %v5482_v60, %v7587_v47  ;;  %v3622_v18 = vsub.f32 %v6718_v13, %v7587_v47  ;;  %v2961_v5 = vor.u32 1.1754944e-38, %v2960_v44  ;;  %v3315_v60 = vmul.f32 %v7750_v8, %v7750_v8  ;;  %v7813_v44 = vld [vmem:[%s8280_s8 + $0x5] ss:$0 sm:$0xff] }
 0x357   : > { %v2957_v10 = vsel %vm7760_vm4, %v7705_v37, %v2953_v12  ;;  %v2938_v25 = vmul.f32 %v2937_v31, %v7430_v20  ;;  %v8501_v12 = vld [vmem:[#allocation19_spill] sm:$0xff]  ;;  %vm2994_vm0 = vweird.f32 %v7736_v59  ;;  %vm3452_vm13 = vweird.f32 %v7730_v32 }
 0x358   : > { %3344 = vadd.xlane.f32.xlu1 %v3343_v53  ;;  %v2973_v53 = vadd.f32 0.05243302, %v2972_v6  ;;  %v3635_v13 = vmul.f32 %v3622_v18, %v3445_v15  ;;  %v3579_v37 = vmul.f32 %v3566_v26, %v3445_v15  ;;  %v3126_v34 = vadd.f32 %v3093_v9, %v8501_v12 }
 0x359   : > { %3113 = vadd.xlane.f32.xlu0 %v3112_v17  ;;  %v3678_v17 = vsub.f32 %v6831_v16, %v7587_v47  ;;  %v7796_v16 = vld [vmem:[%s8280_s8 + $0x3] ss:$0 sm:$0xff]  ;;  %v7801_v47 = vld [vmem:[%s8280_s8 + $0x6] ss:$0 sm:$0xff]  ;;  %v3346_v8 = vsel %vm3045_vm10, %v3315_v60, 0.0 }
 0x35a   : > { %v7752_v38 = vpop.eup %4588  ;;  %v2974_v20 = vmul.f32 %v2973_v53, %v7539_v63  ;;  %v3650_v9 = vmul.f32 %v7796_v16, %v3635_v13  ;;  %v3594_v31 = vmul.f32 %v7806_v33, %v3579_v37 }
 0x35b   : > { %v7766_v54 = vpop.eup %4590  ;;  %v3447_v48 = vmul.f32 %v7752_v38, %v7730_v32  ;;  %v3691_v30 = vmul.f32 %v3678_v17, %v3445_v15  ;;  %v7825_v15 = vmul.f32 %v3016_v27, %v2470_v28  ;;  %vm3453_vm11 = vweird.f32 %v7752_v38 }
 0x35c   : > { %v2990_v46 = vmul.f32 %v7766_v54, %v7736_v59  ;;  %v3665_v23 = vadd.f32 %v7801_v47, %v3650_v9  ;;  %v3609_v28 = vadd.f32 %v7813_v44, %v3594_v31  ;;  %v2975_v41 = vadd.f32 0.18741608, %v2974_v20  ;;  %vm3454_vm14 = vmor %vm3452_vm13, %vm3453_vm11 }
 0x35d   : > { %v3448_v6 = vmul.f32 %v7752_v38, %v3447_v48  ;;  %v7818_v48 = vld [vmem:[%s8280_s8 + $0x4] ss:$0 sm:$0xff]  ;;  %v3115_v53 = vsel %vm3045_vm10, %v7825_v15, 0.0  ;;  %v7849_v37 = vmul.f32 %v7825_v15, %v7322_v7  ;;  %vm2995_vm8 = vweird.f32 %v7766_v54 }
 0x35e   : > { %v3145_v56 = vpop.xlane.xlu1 %3144  ;;  %v2991_v26 = vsub.f32 1.0, %v2990_v46  ;;  %v3706_v17 = vmul.f32 %v7818_v48, %v3691_v30  ;;  %4333 = vmatmul.msk.f32.vlgmr.msrb.gmra.mxu0 %vm3045_vm10, %v3665_v23  ;;  %4346 = vmatmul.msk.f32.vlgmr.msrb.gmra.mxu1 %vm3045_vm10, %v3609_v28  ;;  %v3251_v30 = vmul.f32 %v7825_v15, %v7825_v15  ;;  %vm7862_vm9 = vmor %vm2994_vm0, %vm2995_vm8 }
 0x35f   : > { %v3178_v18 = vadd.f32 %v3145_v56, %v3126_v34  ;;  %v3449_v12 = vmul.f32 0.5, %v3448_v6  ;;  %v3000_v34 = vand.u32 2147483648, %v7736_v59 }
 0x360   : > { %3165 = vadd.xlane.f32.xlu1 %v3164_v50  ;;  %v3262_v35 = vpop.xlane.xlu0 %3261  ;;  %v7823_v50 = vld [vmem:[%s8280_s8 + $0x7] ss:$0 sm:$0xff]  ;;  %v2992_v56 = vmul.f32 %v7766_v54, %v2991_v26 }
 0x361   : > { %3282 = vadd.xlane.f32.xlu0 %v3281_v62  ;;  %v2962_v62 = vsel %vm7773_vm7, %v2961_v5, %v2957_v10  ;;  %v3721_v27 = vadd.f32 %v7823_v50, %v3706_v17  ;;  %v7842_v10 = vmul.f32 %v3178_v18, %v8488_v55  ;;  %v8502_v5 = vld [vmem:[#allocation20_spill] sm:$0xff] }
 0x362   : > { %v2963_v13 = vmul.f32 %v2962_v62, %v2938_v25  ;;  %v3295_v46 = vadd.f32 %v3262_v35, %v8502_v5  ;;  %v2976_v35 = vmul.f32 %v2975_v41, %v7539_v63  ;;  %v2998_v25 = vand.u32 2147483647, %v7736_v59 }
 0x363   : > { %4363 = vmatmul.msk.f32.vlgmr.msrb.gmra.mxu2 %vm3045_vm10, %v3721_v27  ;;  %v2993_v9 = vadd.f32 %v7766_v54, %v2992_v56  ;;  %v3399_v62 = vmul.f32 %v7842_v10, %v7842_v10  ;;  %v3167_v63 = vsel %vm3045_vm10, %v7849_v37, 0.0  ;;  %v2471_v59 = vmul.f32 0.5, %v7403_v11 }
 0x364   : > { %v4327_v20 = vclamps-f32 %v2963_v13, 1.0  ;;  %v2977_v28 = vadd.f32 1.1283791, %v2976_v35  ;;  %vm7872_vm12 = vcmp.eq.f32.partialorder %v2998_v25, 8.507059e+37  ;;  %v3001_v27 = vor.u32 1.1754944e-38, %v3000_v34 }
 0x365   : > { %v2997_v41 = vsel %vm7862_vm9, %v7766_v54, %v2993_v9  ;;  %v3316_v56 = vmul.f32 %v7849_v37, %v7849_v37 }
 0x366   : > { %v3017_v13 = vadd.f32 1.0, %v4327_v20  ;;  %v2978_v25 = vmul.f32 %v2977_v28, %v7510_v1  ;;  %v8509_v28 = vld [vmem:[#allocation22_spill] sm:$0xff] }
 0x368   : > { %3347 = vadd.xlane.f32.xlu1 %v3346_v8  ;;  %v3450_v8 = vsub.f32 1.5, %v3449_v12  ;;  %v3284_v12 = vsel %vm3045_vm10, %v3251_v30, 0.0  ;;  %v8508_v30 = vld [vmem:[#allocation21_spill] sm:$0xff] }
 0x369   : > { %3116 = vadd.xlane.f32.xlu0 %v3115_v53 }
 0x36a   : > { %v3327_v60 = vpop.xlane.xlu1 %3326  ;;  %v3451_v18 = vmul.f32 %v7752_v38, %v3450_v8  ;;  %v3623_v8 = vsub.f32 %v6892_v29, %v7692_v19  ;;  %v3002_v29 = vsel %vm7872_vm12, %v3001_v27, %v2997_v41 }
 0x36b   : > { %v3096_v6 = vpop.xlane.xlu0 %3095  ;;  %v3360_v23 = vadd.f32 %v3327_v60, %v3295_v46  ;;  %v8507_v60 = vld [vmem:[#allocation10_spill] sm:$0xff] }
 0x36c   : > { %v3455_v46 = vsel %vm3454_vm14, %v7752_v38, %v3451_v18  ;;  %v3567_v32 = vsub.f32 %v8507_v60, %v7692_v19  ;;  %v3127_v54 = vadd.f32 %v3096_v6, %v8508_v30  ;;  %v3003_v6 = vmul.f32 %v3002_v29, %v2978_v25 }
 0x36d   : > { %v3386_v31 = vmul.f32 %v3360_v23, %v8488_v55  ;;  %v3679_v23 = vsub.f32 %v6975_v21, %v7692_v19  ;;  %v3636_v34 = vmul.f32 %v3623_v8, %v3455_v46 }
 0x36e   : > { %v3580_v20 = vmul.f32 %v3567_v32, %v3455_v46  ;;  %v4328_v8 = vclamps-f32 %v3003_v6, 1.0  ;;  %v8511_v6 = vld [vmem:[#allocation36_spill] sm:$0xff] }
 0x36f   : > { %v3412_v17 = vsub.f32 %v3386_v31, %v3399_v62  ;;  %v3692_v9 = vmul.f32 %v3679_v23, %v3455_v46  ;;  %v7891_v31 = vmul.f32 %v3017_v13, %v2471_v59  ;;  %v3349_v62 = vsel %vm3045_vm10, %v3316_v56, 0.0 }
 0x370   : > { %3168 = vadd.xlane.f32.xlu1 %v3167_v63  ;;  %v3651_v26 = vmul.f32 %v7796_v16, %v3636_v34  ;;  %v3595_v21 = vmul.f32 %v7806_v33, %v3580_v20  ;;  %v2472_v34 = vmul.f32 0.5, %v7488_v3  ;;  %v3018_v20 = vadd.f32 1.0, %v4328_v8  ;;  %v8512_v3 = vld [vmem:[#allocation11_spill] sm:$0xff] }
 0x371   : > { %3285 = vadd.xlane.f32.xlu0 %v3284_v12  ;;  %v3425_v11 = vadd.f32 1e-12, %v3412_v17  ;;  %v3707_v19 = vmul.f32 %v7818_v48, %v3692_v9  ;;  %v3118_v1 = vsel %vm3045_vm10, %v7891_v31, 0.0  ;;  %v7912_v41 = vmul.f32 %v7891_v31, %v7435_v43 }
 0x372   : > { %v3666_v18 = vadd.f32 %v7801_v47, %v3651_v26  ;;  %v3610_v63 = vadd.f32 %v7813_v44, %v3595_v21  ;;  %v3252_v46 = vmul.f32 %v7891_v31, %v7891_v31 }
 0x373   : > { %v3148_v5 = vpop.xlane.xlu1 %3147  ;;  %4592 = vrsqrt.f32 %v3425_v11  ;;  %v3722_v59 = vadd.f32 %v7823_v50, %v3707_v19  ;;  %vm3462_vm1 = vweird.f32 %v3425_v11  ;;  %v3317_v19 = vmul.f32 %v7912_v41, %v7912_v41 }
 0x374   : > { %v3265_v35 = vpop.xlane.xlu0 %3264  ;;  %v3179_v38 = vadd.f32 %v3148_v5, %v3127_v54  ;;  %4334 = vmatmul.msk.f32.gmra.mxu0 %vm3045_vm10, %v3666_v18  ;;  %4347 = vmatmul.msk.f32.gmra.mxu1 %vm3045_vm10, %v3610_v63  ;;  %v3170_v54 = vsel %vm3045_vm10, %v7912_v41, 0.0  ;;  %v3287_v25 = vsel %vm3045_vm10, %v3252_v46, 0.0  ;;  %v3624_v18 = vsub.f32 %v8511_v6, %v7842_v10 }
 0x375   : > { %v3296_v53 = vadd.f32 %v3265_v35, %v8509_v28  ;;  %4364 = vmatmul.msk.f32.gmra.mxu2 %vm3045_vm10, %v3722_v59  ;;  %v3568_v63 = vsub.f32 %v8512_v3, %v7842_v10  ;;  %v3680_v59 = vsub.f32 %v7131_v51, %v7842_v10  ;;  %v7933_v28 = vmul.f32 %v3018_v20, %v2472_v34  ;;  %v8513_v51 = vld [vmem:[#allocation24_spill] sm:$0xff] }
 0x376   : > { %v7905_v12 = vmul.f32 %v3179_v38, %v8488_v55 }
 0x377   : > { %v3121_v46 = vsel %vm3045_vm10, %v7933_v28, 0.0  ;;  %v7950_v20 = vmul.f32 %v7933_v28, %v7514_v0 }
 0x378   : > { %3350 = vadd.xlane.f32.xlu1 %v3349_v62  ;;  %v3400_v23 = vmul.f32 %v7905_v12, %v7905_v12  ;;  %v8510_v62 = vld [vmem:[#allocation23_spill] sm:$0xff] }
 0x379   : > { %3119 = vadd.xlane.f32.xlu0 %v3118_v1  ;;  %v4593_v17 = vpop.eup %4592  ;;  %v3173_v6 = vsel %vm3045_vm10, %v7950_v20, 0.0 }
 0x37a   : > { %v3457_v27 = vmul.f32 %v4593_v17, %v3425_v11  ;;  %vm3463_vm15 = vweird.f32 %v4593_v17 }
 0x37b   : > { %v3330_v13 = vpop.xlane.xlu1 %3329  ;;  %vm3464_vm2 = vmor %vm3462_vm1, %vm3463_vm15 }
 0x37c   : > { %v3361_v56 = vadd.f32 %v3330_v13, %v3296_v53  ;;  %v3099_v5 = vpop.xlane.xlu0 %3098  ;;  %v3458_v60 = vmul.f32 %v4593_v17, %v3457_v27 }
 0x37d   : > { %v3128_v26 = vadd.f32 %v3099_v5, %v8510_v62  ;;  %v3352_v5 = vsel %vm3045_vm10, %v3317_v19, 0.0  ;;  %v3253_v62 = vmul.f32 %v7933_v28, %v7933_v28 }
 0x37e   : > { %v3387_v32 = vmul.f32 %v3361_v56, %v8488_v55  ;;  %v3459_v30 = vmul.f32 0.5, %v3458_v60 }
 0x380   : > { %v3413_v35 = vsub.f32 %v3387_v32, %v3400_v23  ;;  %3171 = vadd.xlane.f32.xlu1 %v3170_v54  ;;  %v3460_v9 = vsub.f32 1.5, %v3459_v30 }
 0x381   : > { %3288 = vadd.xlane.f32.xlu0 %v3287_v25 }
 0x382   : > { %v3426_v29 = vadd.f32 1e-12, %v3413_v35  ;;  %v3461_v38 = vmul.f32 %v4593_v17, %v3460_v9 }
 0x383   : > { %v3151_v21 = vpop.xlane.xlu1 %3150 }
 0x384   : > { %4594 = vrsqrt.f32 %v3426_v29  ;;  %v3268_v1 = vpop.xlane.xlu0 %3267  ;;  %v3465_v11 = vsel %vm3464_vm2, %v4593_v17, %v3461_v38  ;;  %v3180_v53 = vadd.f32 %v3151_v21, %v3128_v26  ;;  %vm3472_vm4 = vweird.f32 %v3426_v29 }
 0x385   : > { %v3637_v27 = vmul.f32 %v3624_v18, %v3465_v11  ;;  %v3581_v13 = vmul.f32 %v3568_v63, %v3465_v11  ;;  %v3693_v56 = vmul.f32 %v3680_v59, %v3465_v11  ;;  %v3297_v10 = vadd.f32 %v3268_v1, %v8513_v51  ;;  %v7962_v18 = vpop.xlane.xlu2 %3221  ;;  %v8516_v51 = vld [vmem:[#allocation33_spill] sm:$0xff] }
 0x386   : > { %v7943_v23 = vmul.f32 %v3180_v53, %v8488_v55  ;;  %v3290_v63 = vsel %vm3045_vm10, %v3253_v62, 0.0  ;;  %v8517_v62 = vld [vmem:[#allocation27_spill] sm:$0xff] }
 0x387   : > { %v3652_v8 = vmul.f32 %v7796_v16, %v3637_v27  ;;  %v3596_v60 = vmul.f32 %v7806_v33, %v3581_v13  ;;  %v3708_v32 = vmul.f32 %v7818_v48, %v3693_v56  ;;  %v8514_v27 = vld [vmem:[#allocation26_spill] sm:$0xff] }
 0x388   : > { %3353 = vadd.xlane.f32.xlu1 %v3352_v5  ;;  %v3401_v19 = vmul.f32 %v7943_v23, %v7943_v23  ;;  %v3318_v5 = vmul.f32 %v7950_v20, %v7950_v20 }
 0x389   : > { %3122 = vadd.xlane.f32.xlu0 %v3121_v46  ;;  %v3667_v30 = vadd.f32 %v7801_v47, %v3652_v8  ;;  %v3611_v54 = vadd.f32 %v7813_v44, %v3596_v60  ;;  %v3723_v35 = vadd.f32 %v7823_v50, %v3708_v32  ;;  %v3625_v8 = vsub.f32 %v7194_v14, %v7905_v12  ;;  %v8515_v60 = vld [vmem:[#allocation12_spill] sm:$0xff] }
 0x38a   : > { %v4595_v17 = vpop.eup %4594  ;;  %v3569_v32 = vsub.f32 %v8515_v60, %v7905_v12 }
 0x38b   : > { %v3467_v25 = vmul.f32 %v4595_v17, %v3426_v29  ;;  %v3333_v34 = vpop.xlane.xlu1 %3332  ;;  %4335 = vmatmul.msk.f32.gmra.mxu0 %vm3045_vm10, %v3667_v30  ;;  %4348 = vmatmul.msk.f32.gmra.mxu1 %vm3045_vm10, %v3611_v54  ;;  %vm3473_vm3 = vweird.f32 %v4595_v17 }
 0x38c   : > { %v3362_v9 = vadd.f32 %v3333_v34, %v3297_v10  ;;  %v3102_v38 = vpop.xlane.xlu0 %3101  ;;  %4365 = vmatmul.msk.f32.gmra.mxu2 %vm3045_vm10, %v3723_v35  ;;  %vm3474_vm5 = vmor %vm3472_vm4, %vm3473_vm3  ;;  %v3681_v10 = vsub.f32 %v8516_v51, %v7905_v12  ;;  %v3355_v34 = vsel %vm3045_vm10, %v3318_v5, 0.0  ;;  %v8518_v51 = vld [vmem:[#allocation28_spill] sm:$0xff] }
 0x38d   : > { %v3468_v26 = vmul.f32 %v4595_v17, %v3467_v25  ;;  %v3129_v13 = vadd.f32 %v3102_v38, %v8514_v27 }
 0x38e   : > { %v3388_v21 = vmul.f32 %v3362_v9, %v8488_v55 }
 0x38f   : > { %v3469_v1 = vmul.f32 0.5, %v3468_v26 }
 0x390   : > { %v3414_v3 = vsub.f32 %v3388_v21, %v3401_v19  ;;  %3174 = vadd.xlane.f32.xlu1 %v3173_v6  ;;  %v7979_v19 = vpop.xlane.xlu2 %3068 }
 0x391   : > { %v3470_v59 = vsub.f32 1.5, %v3469_v1  ;;  %3291 = vadd.xlane.f32.xlu0 %v3290_v63 }
 0x392   : > { %v3427_v11 = vadd.f32 1e-12, %v3414_v3 }
 0x393   : > { %v3471_v53 = vmul.f32 %v4595_v17, %v3470_v59  ;;  %v3154_v56 = vpop.xlane.xlu1 %3153 }
 0x394   : > { %4596 = vrsqrt.f32 %v3427_v11  ;;  %v3271_v46 = vpop.xlane.xlu0 %3270  ;;  %v3181_v29 = vadd.f32 %v3154_v56, %v3129_v13  ;;  %vm3482_vm7 = vweird.f32 %v3427_v11 }
 0x395   : > { %v3475_v30 = vsel %vm3474_vm5, %v4595_v17, %v3471_v53  ;;  %v3298_v26 = vadd.f32 %v3271_v46, %v8517_v62 }
 0x396   : > { %v3638_v54 = vmul.f32 %v3625_v8, %v3475_v30  ;;  %v3582_v35 = vmul.f32 %v3569_v32, %v3475_v30  ;;  %v3694_v25 = vmul.f32 %v3681_v10, %v3475_v30  ;;  %v7982_v12 = vmul.f32 %v3181_v29, %v8488_v55 }
 0x398   : > { %3356 = vadd.xlane.f32.xlu1 %v3355_v34  ;;  %v3653_v9 = vmul.f32 %v7796_v16, %v3638_v54  ;;  %v3597_v38 = vmul.f32 %v7806_v33, %v3582_v35  ;;  %v3709_v14 = vmul.f32 %v7818_v48, %v3694_v25  ;;  %v3402_v56 = vmul.f32 %v7982_v12, %v7982_v12  ;;  %v3225_v29 = vpop.xlane.xlu2 %3224  ;;  %v8519_v35 = vld [vmem:[#allocation34_spill] sm:$0xff] }
 0x399   : > { %v3626_v25 = vsub.f32 %v8519_v35, %v7943_v23  ;;  %v8520_v34 = vld [vmem:[#allocation14_spill] sm:$0xff] }
 0x39a   : > { %v4597_v21 = vpop.eup %4596  ;;  %v3668_v17 = vadd.f32 %v7801_v47, %v3653_v9  ;;  %v3612_v1 = vadd.f32 %v7813_v44, %v3597_v38  ;;  %v3724_v6 = vadd.f32 %v7823_v50, %v3709_v14  ;;  %v3570_v9 = vsub.f32 %v8520_v34, %v7943_v23 }
 0x39b   : > { %v3477_v3 = vmul.f32 %v4597_v21, %v3427_v11  ;;  %v3336_v63 = vpop.xlane.xlu1 %3335  ;;  %vm3483_vm6 = vweird.f32 %v4597_v21  ;;  %v3682_v38 = vsub.f32 %v7369_v22, %v7943_v23 }
 0x39c   : > { %v3363_v59 = vadd.f32 %v3336_v63, %v3298_v26  ;;  %v3105_v53 = vpop.xlane.xlu0 %3104  ;;  %4336 = vmatmul.msk.f32.gmra.mxu0 %vm3045_vm10, %v3668_v17  ;;  %4349 = vmatmul.msk.f32.gmra.mxu1 %vm3045_vm10, %v3612_v1  ;;  %vm3484_vm0 = vmor %vm3482_vm7, %vm3483_vm6 }
 0x39d   : > { %v3478_v27 = vmul.f32 %v4597_v21, %v3477_v3  ;;  %4366 = vmatmul.msk.f32.gmra.mxu2 %vm3045_vm10, %v3724_v6  ;;  %v3130_v10 = vadd.f32 %v3105_v53, %v8518_v51 }
 0x39e   : > { %v3389_v13 = vmul.f32 %v3363_v59, %v8488_v55 }
 0x39f   : > { %v3479_v5 = vmul.f32 0.5, %v3478_v27 }
 0x3a0   : > { %v3415_v46 = vsub.f32 %v3389_v13, %v3402_v56 }
 0x3a1   : > { %v3480_v8 = vsub.f32 1.5, %v3479_v5 }
 0x3a2   : > { %v3428_v60 = vadd.f32 1e-12, %v3415_v46 }
 0x3a3   : > { %v3481_v32 = vmul.f32 %v4597_v21, %v3480_v8  ;;  %v3157_v30 = vpop.xlane.xlu1 %3156 }
 0x3a4   : > { %4598 = vrsqrt.f32 %v3428_v60  ;;  %v3274_v54 = vpop.xlane.xlu0 %3273  ;;  %v3182_v62 = vadd.f32 %v3157_v30, %v3130_v10  ;;  %vm3492_vm9 = vweird.f32 %v3428_v60 }
 0x3a5   : > { %v3485_v14 = vsel %vm3484_vm0, %v4597_v21, %v3481_v32  ;;  %v3299_v63 = vadd.f32 %v3274_v54, %v7962_v18  ;;  %v3072_v18 = vpop.xlane.xlu2 %3071 }
 0x3a6   : > { %v3639_v26 = vmul.f32 %v3626_v25, %v3485_v14  ;;  %v3583_v11 = vmul.f32 %v3570_v9, %v3485_v14  ;;  %v3695_v17 = vmul.f32 %v3682_v38, %v3485_v14  ;;  %v8005_v53 = vmul.f32 %v3182_v62, %v8488_v55 }
 0x3a7   : > { %v3627_v38 = vsub.f32 %v7420_v58, %v7982_v12  ;;  %v3571_v14 = vsub.f32 %v8477_v4, %v7982_v12  ;;  %v3683_v62 = vsub.f32 %v7454_v2, %v7982_v12 }
 0x3a8   : > { %v3654_v1 = vmul.f32 %v7796_v16, %v3639_v26  ;;  %v3598_v6 = vmul.f32 %v7806_v33, %v3583_v11  ;;  %v3710_v3 = vmul.f32 %v7818_v48, %v3695_v17  ;;  %v3403_v32 = vmul.f32 %v8005_v53, %v8005_v53 }
 0x3aa   : > { %v4599_v59 = vpop.eup %4598  ;;  %v3669_v27 = vadd.f32 %v7801_v47, %v3654_v1  ;;  %v3613_v22 = vadd.f32 %v7813_v44, %v3598_v6  ;;  %v3725_v23 = vadd.f32 %v7823_v50, %v3710_v3 }
 0x3ab   : > { %v3487_v21 = vmul.f32 %v4599_v59, %v3428_v60  ;;  %v3339_v13 = vpop.xlane.xlu1 %3338  ;;  %vm3493_vm8 = vweird.f32 %v4599_v59 }
 0x3ac   : > { %v3364_v56 = vadd.f32 %v3339_v13, %v3299_v63  ;;  %v3108_v5 = vpop.xlane.xlu0 %3107  ;;  %4337 = vmatmul.msk.f32.gmra.mxu0 %vm3045_vm10, %v3669_v27  ;;  %4350 = vmatmul.msk.f32.gmra.mxu1 %vm3045_vm10, %v3613_v22  ;;  %vm3494_vm11 = vmor %vm3492_vm9, %vm3493_vm8 }
 0x3ad   : > { %v3488_v46 = vmul.f32 %v4599_v59, %v3487_v21  ;;  %4367 = vmatmul.msk.f32.gmra.mxu2 %vm3045_vm10, %v3725_v23  ;;  %v3131_v25 = vadd.f32 %v3108_v5, %v7979_v19  ;;  %v3228_v6 = vpop.xlane.xlu2 %3227 }
 0x3ae   : > { %v3390_v8 = vmul.f32 %v3364_v56, %v8488_v55 }
 0x3af   : > { %v3489_v51 = vmul.f32 0.5, %v3488_v46 }
 0x3b0   : > { %v3416_v10 = vsub.f32 %v3390_v8, %v3403_v32 }
 0x3b1   : > { %v3490_v30 = vsub.f32 1.5, %v3489_v51 }
 0x3b2   : > { %v3429_v54 = vadd.f32 1e-12, %v3416_v10 }
 0x3b3   : > { %v3491_v35 = vmul.f32 %v4599_v59, %v3490_v30  ;;  %v3160_v34 = vpop.xlane.xlu1 %3159 }
 0x3b4   : > { %4600 = vrsqrt.f32 %v3429_v54  ;;  %v3277_v9 = vpop.xlane.xlu0 %3276  ;;  %v3183_v11 = vadd.f32 %v3160_v34, %v3131_v25  ;;  %vm3502_vm13 = vweird.f32 %v3429_v54 }
 0x3b5   : > { %v3495_v26 = vsel %vm3494_vm11, %v4599_v59, %v3491_v35  ;;  %v3300_v27 = vadd.f32 %v3277_v9, %v3225_v29  ;;  %v3075_v51 = vpop.xlane.xlu2 %3074  ;;  %v3628_v9 = vsub.f32 %v7500_v40, %v8005_v53 }
 0x3b6   : > { %v3640_v17 = vmul.f32 %v3627_v38, %v3495_v26  ;;  %v3584_v1 = vmul.f32 %v3571_v14, %v3495_v26  ;;  %v3696_v60 = vmul.f32 %v3683_v62, %v3495_v26  ;;  %v8027_v22 = vmul.f32 %v3183_v11, %v8488_v55 }
 0x3b7   : > { %v3572_v38 = vsub.f32 %v6223_v61, %v8005_v53  ;;  %v3684_v14 = vsub.f32 %v7531_v36, %v8005_v53 }
 0x3b8   : > { %v3655_v19 = vmul.f32 %v7796_v16, %v3640_v17  ;;  %v3599_v3 = vmul.f32 %v7806_v33, %v3584_v1  ;;  %v3711_v63 = vmul.f32 %v7818_v48, %v3696_v60  ;;  %v3404_v5 = vmul.f32 %v8027_v22, %v8027_v22 }
 0x3ba   : > { %v4601_v58 = vpop.eup %4600  ;;  %v3670_v4 = vadd.f32 %v7801_v47, %v3655_v19  ;;  %v3614_v2 = vadd.f32 %v7813_v44, %v3599_v3  ;;  %v3726_v12 = vadd.f32 %v7823_v50, %v3711_v63 }
 0x3bb   : > { %v3497_v59 = vmul.f32 %v4601_v58, %v3429_v54  ;;  %v3342_v23 = vpop.xlane.xlu1 %3341  ;;  %vm3503_vm12 = vweird.f32 %v4601_v58 }
 0x3bc   : > { %v3365_v21 = vadd.f32 %v3342_v23, %v3300_v27  ;;  %v3111_v13 = vpop.xlane.xlu0 %3110  ;;  %4338 = vmatmul.msk.f32.gmra.mxu0 %vm3045_vm10, %v3670_v4  ;;  %4351 = vmatmul.msk.f32.gmra.mxu1 %vm3045_vm10, %v3614_v2  ;;  %vm3504_vm14 = vmor %vm3502_vm13, %vm3503_vm12 }
 0x3bd   : > { %v3498_v56 = vmul.f32 %v4601_v58, %v3497_v59  ;;  %4368 = vmatmul.msk.f32.gmra.mxu2 %vm3045_vm10, %v3726_v12  ;;  %v3132_v35 = vadd.f32 %v3111_v13, %v3072_v18 }
 0x3be   : > { %v3391_v29 = vmul.f32 %v3365_v21, %v8488_v55 }
 0x3bf   : > { %v3499_v46 = vmul.f32 0.5, %v3498_v56 }
 0x3c0   : > { %v3417_v8 = vsub.f32 %v3391_v29, %v3404_v5 }
 0x3c1   : > { %v3500_v32 = vsub.f32 1.5, %v3499_v46 }
 0x3c2   : > { %v3430_v10 = vadd.f32 1e-12, %v3417_v8 }
 0x3c3   : > { %v3501_v30 = vmul.f32 %v4601_v58, %v3500_v32  ;;  %v3163_v25 = vpop.xlane.xlu1 %3162  ;;  %v3629_v32 = vsub.f32 %v7573_v49, %v8027_v22 }
 0x3c4   : > { %4602 = vrsqrt.f32 %v3430_v10  ;;  %v3280_v34 = vpop.xlane.xlu0 %3279  ;;  %v3184_v26 = vadd.f32 %v3163_v25, %v3132_v35  ;;  %vm3512_vm1 = vweird.f32 %v3430_v10  ;;  %v3685_v35 = vsub.f32 %v7598_v42, %v8027_v22 }
 0x3c5   : > { %v3505_v62 = vsel %vm3504_vm14, %v4601_v58, %v3501_v30  ;;  %v3301_v19 = vadd.f32 %v3280_v34, %v3228_v6  ;;  %v3231_v58 = vpop.xlane.xlu2 %3230  ;;  %v3573_v30 = vsub.f32 %v6931_v39, %v8027_v22 }
 0x3c6   : > { %v3641_v11 = vmul.f32 %v3628_v9, %v3505_v62  ;;  %v3585_v17 = vmul.f32 %v3572_v38, %v3505_v62  ;;  %v3697_v1 = vmul.f32 %v3684_v14, %v3505_v62  ;;  %v8048_v40 = vmul.f32 %v3184_v26, %v8488_v55 }
 0x3c8   : > { %v3656_v18 = vmul.f32 %v7796_v16, %v3641_v11  ;;  %v3600_v54 = vmul.f32 %v7806_v33, %v3585_v17  ;;  %v3712_v60 = vmul.f32 %v7818_v48, %v3697_v1  ;;  %v3405_v59 = vmul.f32 %v8048_v40, %v8048_v40 }
 0x3ca   : > { %v4603_v3 = vpop.eup %4602  ;;  %v3671_v61 = vadd.f32 %v7801_v47, %v3656_v18  ;;  %v3615_v36 = vadd.f32 %v7813_v44, %v3600_v54  ;;  %v3727_v53 = vadd.f32 %v7823_v50, %v3712_v60 }
 0x3cb   : > { %v3507_v63 = vmul.f32 %v4603_v3, %v3430_v10  ;;  %v3345_v27 = vpop.xlane.xlu1 %3344  ;;  %vm3513_vm15 = vweird.f32 %v4603_v3 }
 0x3cc   : > { %v3366_v4 = vadd.f32 %v3345_v27, %v3301_v19  ;;  %v3114_v2 = vpop.xlane.xlu0 %3113  ;;  %4339 = vmatmul.msk.f32.gmra.mxu0 %vm3045_vm10, %v3671_v61  ;;  %4352 = vmatmul.msk.f32.gmra.mxu1 %vm3045_vm10, %v3615_v36  ;;  %vm3514_vm2 = vmor %vm3512_vm1, %vm3513_vm15 }
 0x3cd   : > { %v3508_v6 = vmul.f32 %v4603_v3, %v3507_v63  ;;  %4369 = vmatmul.msk.f32.gmra.mxu2 %vm3045_vm10, %v3727_v53  ;;  %v3133_v5 = vadd.f32 %v3114_v2, %v3075_v51  ;;  %v3078_v34 = vpop.xlane.xlu2 %3077 }
 0x3ce   : > { %v3392_v12 = vmul.f32 %v3366_v4, %v8488_v55 }
 0x3cf   : > { %v3509_v23 = vmul.f32 0.5, %v3508_v6 }
 0x3d0   : > { %v3418_v21 = vsub.f32 %v3392_v12, %v3405_v59  ;;  %v3630_v59 = vsub.f32 %v7635_v24, %v8048_v40 }
 0x3d1   : > { %v3510_v13 = vsub.f32 1.5, %v3509_v23  ;;  %v3574_v23 = vsub.f32 %v7061_v45, %v8048_v40 }
 0x3d2   : > { %v3431_v56 = vadd.f32 1e-12, %v3418_v21  ;;  %v3686_v21 = vsub.f32 %v7689_v52, %v8048_v40 }
 0x3d3   : > { %v3511_v29 = vmul.f32 %v4603_v3, %v3510_v13  ;;  %v3166_v46 = vpop.xlane.xlu1 %3165 }
 0x3d4   : > { %4604 = vrsqrt.f32 %v3431_v56  ;;  %v3283_v8 = vpop.xlane.xlu0 %3282  ;;  %v3185_v9 = vadd.f32 %v3166_v46, %v3133_v5  ;;  %vm3522_vm4 = vweird.f32 %v3431_v56 }
 0x3d5   : > { %v3515_v25 = vsel %vm3514_vm2, %v4603_v3, %v3511_v29  ;;  %v3302_v11 = vadd.f32 %v3283_v8, %v3231_v58  ;;  %v3234_v53 = vpop.xlane.xlu2 %3233 }
 0x3d6   : > { %v3642_v38 = vmul.f32 %v3629_v32, %v3515_v25  ;;  %v3586_v14 = vmul.f32 %v3573_v30, %v3515_v25  ;;  %v3698_v10 = vmul.f32 %v3685_v35, %v3515_v25  ;;  %v8069_v17 = vmul.f32 %v3185_v9, %v8488_v55 }
 0x3d8   : > { %v3657_v51 = vmul.f32 %v7796_v16, %v3642_v38  ;;  %v3601_v62 = vmul.f32 %v7806_v33, %v3586_v14  ;;  %v3713_v26 = vmul.f32 %v7818_v48, %v3698_v10  ;;  %v3406_v61 = vmul.f32 %v8069_v17, %v8069_v17 }
 0x3da   : > { %v4605_v49 = vpop.eup %4604  ;;  %v3672_v39 = vadd.f32 %v7801_v47, %v3657_v51  ;;  %v3616_v42 = vadd.f32 %v7813_v44, %v3601_v62  ;;  %v3728_v22 = vadd.f32 %v7823_v50, %v3713_v26 }
 0x3db   : > { %v3517_v1 = vmul.f32 %v4605_v49, %v3431_v56  ;;  %v3348_v18 = vpop.xlane.xlu1 %3347  ;;  %vm3523_vm3 = vweird.f32 %v4605_v49  ;;  %v3799_v30 = vpop.f32.mrf.mxu0 }
 0x3dc   : > { %v3367_v54 = vadd.f32 %v3348_v18, %v3302_v11  ;;  %v3117_v60 = vpop.xlane.xlu0 %3116  ;;  %4340 = vmatmul.msk.f32.gmra.mxu0 %vm3045_vm10, %v3672_v39  ;;  %4353 = vmatmul.msk.f32.gmra.mxu1 %vm3045_vm10, %v3616_v42  ;;  %vm3524_vm5 = vmor %vm3522_vm4, %vm3523_vm3  ;;  %v3894_v35 = vpop.f32.mrf.mxu1  ;;  %v8100_v11 = vld [vmem:[%s8282_s10 + $0x1] ss:$0 sm:$0xff] }
 0x3dd   : > { %v3518_v19 = vmul.f32 %v4605_v49, %v3517_v1  ;;  %4370 = vmatmul.msk.f32.gmra.mxu2 %vm3045_vm10, %v3728_v22  ;;  %v3134_v2 = vadd.f32 %v3117_v60, %v3078_v34  ;;  %v3081_v34 = vpop.xlane.xlu2 %3080  ;;  %v3895_v51 = vadd.f32 %v3894_v35, %v3799_v30 }
 0x3de   : > { %v3393_v3 = vmul.f32 %v3367_v54, %v8488_v55 }
 0x3df   : > { %v3519_v36 = vmul.f32 0.5, %v3518_v19 }
 0x3e0   : > { %v3419_v63 = vsub.f32 %v3393_v3, %v3406_v61 }
 0x3e1   : > { %v3520_v27 = vsub.f32 1.5, %v3519_v36 }
 0x3e2   : > { %v3432_v58 = vadd.f32 1e-12, %v3419_v63 }
 0x3e3   : > { %v3521_v4 = vmul.f32 %v4605_v49, %v3520_v27  ;;  %v3169_v6 = vpop.xlane.xlu1 %3168 }
 0x3e4   : > { %4606 = vrsqrt.f32 %v3432_v58  ;;  %v3286_v12 = vpop.xlane.xlu0 %3285  ;;  %v3186_v29 = vadd.f32 %v3169_v6, %v3134_v2  ;;  %vm3532_vm7 = vweird.f32 %v3432_v58  ;;  %v8521_v2 = vld [vmem:[#allocation35_spill] sm:$0xff] }
 0x3e5   : > { %v3525_v13 = vsel %vm3524_vm5, %v4605_v49, %v3521_v4  ;;  %v3303_v9 = vadd.f32 %v3286_v12, %v3234_v53  ;;  %v3237_v63 = vpop.xlane.xlu2 %3236  ;;  %v3631_v4 = vsub.f32 %v7732_v57, %v8069_v17  ;;  %v3575_v6 = vsub.f32 %v8521_v2, %v8069_v17  ;;  %v8522_v12 = vld [vmem:[#allocation32_spill] sm:$0xff] }
 0x3e6   : > { %v3643_v5 = vmul.f32 %v3630_v59, %v3525_v13  ;;  %v3587_v46 = vmul.f32 %v3574_v23, %v3525_v13  ;;  %v3699_v8 = vmul.f32 %v3686_v21, %v3525_v13  ;;  %v8090_v45 = vmul.f32 %v3186_v29, %v8488_v55  ;;  %v3994_v39 = vpop.f32.mrf.mxu2 }
 0x3e7   : > { %v4033_v1 = vadd.f32 %v3994_v39, %v3895_v51  ;;  %v3687_v59 = vsub.f32 %v8522_v12, %v8069_v17 }
 0x3e8   : > { %v3658_v56 = vmul.f32 %v7796_v16, %v3643_v5  ;;  %v3602_v32 = vmul.f32 %v7806_v33, %v3587_v46  ;;  %v3714_v25 = vmul.f32 %v7818_v48, %v3699_v8  ;;  %v3407_v22 = vmul.f32 %v8090_v45, %v8090_v45 }
 0x3e9   : > { %v4048_v60 = vadd.f32 %v8100_v11, %v4033_v1 }
 0x3ea   : > { %v4607_v24 = vpop.eup %4606  ;;  %v3673_v52 = vadd.f32 %v7801_v47, %v3658_v56  ;;  %v3617_v40 = vadd.f32 %v7813_v44, %v3602_v32  ;;  %v3729_v10 = vadd.f32 %v7823_v50, %v3714_v25 }
 0x3eb   : > { %v3527_v38 = vmul.f32 %v4607_v24, %v3432_v58  ;;  %v3351_v14 = vpop.xlane.xlu1 %3350  ;;  %vm3533_vm6 = vweird.f32 %v4607_v24  ;;  %4061 = vst [vmem:[%s8109_s17] sm:$0xff] %v4048_v60 }
 0x3ec   : > { %v3368_v62 = vadd.f32 %v3351_v14, %v3303_v9  ;;  %v3120_v26 = vpop.xlane.xlu0 %3119  ;;  %4341 = vmatmul.msk.f32.gmra.mxu0 %vm3045_vm10, %v3673_v52  ;;  %4354 = vmatmul.msk.f32.gmra.mxu1 %vm3045_vm10, %v3617_v40  ;;  %vm3534_vm0 = vmor %vm3532_vm7, %vm3533_vm6 }
 0x3ed   : > { %v3528_v49 = vmul.f32 %v4607_v24, %v3527_v38  ;;  %4371 = vmatmul.msk.f32.gmra.mxu2 %vm3045_vm10, %v3729_v10  ;;  %v3135_v36 = vadd.f32 %v3120_v26, %v3081_v34  ;;  %v3084_v14 = vpop.xlane.xlu2 %3083 }
 0x3ee   : > { %v3394_v42 = vmul.f32 %v3368_v62, %v8488_v55 }
 0x3ef   : > { %v3529_v18 = vmul.f32 0.5, %v3528_v49 }
 0x3f0   : > { %v3420_v54 = vsub.f32 %v3394_v42, %v3407_v22 }
 0x3f1   : > { %v3530_v19 = vsub.f32 1.5, %v3529_v18  ;;  %v3802_v30 = vpop.f32.mrf.mxu0  ;;  %v3897_v34 = vpop.f32.mrf.mxu1 }
 0x3f2   : > { %v3433_v3 = vadd.f32 1e-12, %v3420_v54  ;;  %v3898_v10 = vadd.f32 %v3897_v34, %v3802_v30 }
 0x3f3   : > { %v3531_v61 = vmul.f32 %v4607_v24, %v3530_v19  ;;  %v3172_v53 = vpop.xlane.xlu1 %3171 }
 0x3f4   : > { %4608 = vrsqrt.f32 %v3433_v3  ;;  %v3289_v27 = vpop.xlane.xlu0 %3288  ;;  %v3187_v21 = vadd.f32 %v3172_v53, %v3135_v36  ;;  %vm3542_vm9 = vweird.f32 %v3433_v3  ;;  %v3576_v36 = vsub.f32 %v7322_v7, %v8090_v45 }
 0x3f5   : > { %v3535_v23 = vsel %vm3534_vm0, %v4607_v24, %v3531_v61  ;;  %v3304_v56 = vadd.f32 %v3289_v27, %v3237_v63  ;;  %v3632_v61 = vsub.f32 %v7825_v15, %v8090_v45  ;;  %v3688_v53 = vsub.f32 %v7849_v37, %v8090_v45  ;;  %v3240_v12 = vpop.xlane.xlu2 %3239 }
 0x3f6   : > { %v3644_v13 = vmul.f32 %v3631_v4, %v3535_v23  ;;  %v3588_v29 = vmul.f32 %v3575_v6, %v3535_v23  ;;  %v3700_v58 = vmul.f32 %v3687_v59, %v3535_v23  ;;  %v8122_v57 = vmul.f32 %v3187_v21, %v8488_v55 }
 0x3f8   : > { %v3659_v5 = vmul.f32 %v7796_v16, %v3644_v13  ;;  %v3603_v46 = vmul.f32 %v7806_v33, %v3588_v29  ;;  %v3715_v8 = vmul.f32 %v7818_v48, %v3700_v58  ;;  %v3408_v62 = vmul.f32 %v8122_v57, %v8122_v57  ;;  %v3997_v49 = vpop.f32.mrf.mxu2 }
 0x3f9   : > { %v4034_v42 = vadd.f32 %v3997_v49, %v3898_v10  ;;  %v3577_v34 = vsub.f32 %v7435_v43, %v8122_v57  ;;  %v4630_v10 = vld [vmem:[%s8280_s8 + $0x3] ss:$0 sm:$0xff]  ;;  %v4632_v43 = vld [vmem:[%s8280_s8 + $0x4] ss:$0 sm:$0xff] }
 0x3fa   : > { %v4609_v32 = vpop.eup %4608  ;;  %v3674_v35 = vadd.f32 %v7801_v47, %v3659_v5  ;;  %v3618_v17 = vadd.f32 %v7813_v44, %v3603_v46  ;;  %v3730_v25 = vadd.f32 %v7823_v50, %v3715_v8 }
 0x3fb   : > { %v3537_v24 = vmul.f32 %v4609_v32, %v3433_v3  ;;  %v3354_v9 = vpop.xlane.xlu1 %3353  ;;  %vm3543_vm8 = vweird.f32 %v4609_v32  ;;  %v4049_v18 = vadd.f32 %v8100_v11, %v4034_v42 }
 0x3fc   : > { %v3369_v52 = vadd.f32 %v3354_v9, %v3304_v56  ;;  %v3123_v40 = vpop.xlane.xlu0 %3122  ;;  %4342 = vmatmul.msk.f32.gmra.mxu0 %vm3045_vm10, %v3674_v35  ;;  %4355 = vmatmul.msk.f32.gmra.mxu1 %vm3045_vm10, %v3618_v17  ;;  %vm3544_vm11 = vmor %vm3542_vm9, %vm3543_vm8  ;;  %v3689_v9 = vsub.f32 %v7912_v41, %v8122_v57 }
 0x3fd   : > { %v3538_v38 = vmul.f32 %v4609_v32, %v3537_v24  ;;  %4372 = vmatmul.msk.f32.gmra.mxu2 %vm3045_vm10, %v3730_v25  ;;  %v3136_v60 = vadd.f32 %v3123_v40, %v3084_v14  ;;  %4062 = vst [vmem:[%s8109_s17 + $0x8] sm:$0xff] %v4049_v18 }
 0x3fe   : > { %v3395_v51 = vmul.f32 %v3369_v52, %v8488_v55 }
 0x3ff   : > { %v3539_v26 = vmul.f32 0.5, %v3538_v38 }
 0x400   : > { %v3421_v39 = vsub.f32 %v3395_v51, %v3408_v62 }
 0x401   : > { %v3540_v22 = vsub.f32 1.5, %v3539_v26  ;;  %v4633_v26 = vld [vmem:[%s8280_s8 + $0x6] ss:$0 sm:$0xff] }
 0x402   : > { %v3434_v1 = vadd.f32 1e-12, %v3421_v39  ;;  %v4634_v39 = vld [vmem:[%s8280_s8 + $0x5] ss:$0 sm:$0xff] }
 0x403   : > { %v3541_v54 = vmul.f32 %v4609_v32, %v3540_v22  ;;  %v3175_v19 = vpop.xlane.xlu1 %3174  ;;  %v4635_v22 = vld [vmem:[%s8280_s8 + $0x7] ss:$0 sm:$0xff] }
 0x404   : > { %4610 = vrsqrt.f32 %v3434_v1  ;;  %v3188_v27 = vadd.f32 %v3175_v19, %v3136_v60  ;;  %v3292_v4 = vpop.xlane.xlu0 %3291  ;;  %vm3552_vm13 = vweird.f32 %v3434_v1 }
 0x405   : > { %v3545_v63 = vsel %vm3544_vm11, %v4609_v32, %v3541_v54  ;;  %v3305_v15 = vadd.f32 %v3292_v4, %v3240_v12 }
 0x406   : > { %v3645_v2 = vmul.f32 %v3632_v61, %v3545_v63  ;;  %v3589_v6 = vmul.f32 %v3576_v36, %v3545_v63  ;;  %v3701_v3 = vmul.f32 %v3688_v53, %v3545_v63  ;;  %v8145_v7 = vmul.f32 %v3188_v27, %v8488_v55 }
 0x408   : > { %v3660_v59 = vmul.f32 %v7796_v16, %v3645_v2  ;;  %v3604_v23 = vmul.f32 %v7806_v33, %v3589_v6  ;;  %v3716_v21 = vmul.f32 %v7818_v48, %v3701_v3  ;;  %v3805_v46 = vpop.f32.mrf.mxu0  ;;  %v3900_v8 = vpop.f32.mrf.mxu1  ;;  %v3634_v6 = vsub.f32 %v7933_v28, %v8145_v7 }
 0x409   : > { %v3578_v3 = vsub.f32 %v7514_v0, %v8145_v7  ;;  %v3690_v12 = vsub.f32 %v7950_v20, %v8145_v7 }
 0x40a   : > { %v4611_v13 = vpop.eup %4610  ;;  %v3675_v37 = vadd.f32 %v7801_v47, %v3660_v59  ;;  %v3619_v45 = vadd.f32 %v7813_v44, %v3604_v23  ;;  %v3731_v29 = vadd.f32 %v7823_v50, %v3716_v21  ;;  %v3409_v47 = vmul.f32 %v8145_v7, %v8145_v7 }
 0x40b   : > { %v3547_v58 = vmul.f32 %v4611_v13, %v3434_v1  ;;  %v3357_v5 = vpop.xlane.xlu1 %3356  ;;  %v3901_v50 = vadd.f32 %v3900_v8, %v3805_v46  ;;  %vm3553_vm12 = vweird.f32 %v4611_v13 }
 0x40c   : > { %v3370_v16 = vadd.f32 %v3357_v5, %v3305_v15  ;;  %4343 = vmatmul.msk.f32.gmra.mxu0 %vm3045_vm10, %v3675_v37  ;;  %4356 = vmatmul.msk.f32.gmra.mxu1 %vm3045_vm10, %v3619_v45  ;;  %vm3554_vm14 = vmor %vm3552_vm13, %vm3553_vm12 }
 0x40d   : > { %v3548_v33 = vmul.f32 %v4611_v13, %v3547_v58  ;;  %4373 = vmatmul.msk.f32.gmra.mxu2 %vm3045_vm10, %v3731_v29 }
 0x40e   : > { %v3396_v48 = vmul.f32 %v3370_v16, %v8488_v55  ;;  %v3633_v55 = vsub.f32 %v7891_v31, %v8122_v57  ;;  %v4631_v31 = vld [vmem:[%s8280_s8 + $0x2] ss:$0 sm:$0xff] }
 0x40f   : > { %v3549_v44 = vmul.f32 0.5, %v3548_v33  ;;  %v4000_v32 = vpop.f32.mrf.mxu2 }
 0x410   : > { %v3422_v56 = vsub.f32 %v3396_v48, %v3409_v47  ;;  %v4035_v35 = vadd.f32 %v4000_v32, %v3901_v50 }
 0x411   : > { %v3550_v30 = vsub.f32 1.5, %v3549_v44 }
 0x412   : > { %v3435_v17 = vadd.f32 1e-12, %v3422_v56  ;;  %v4050_v24 = vadd.f32 %v8100_v11, %v4035_v35 }
 0x413   : > { %v3551_v25 = vmul.f32 %v4611_v13, %v3550_v30 }
 0x414   : > { %4612 = vrsqrt.f32 %v3435_v17  ;;  %4063 = vst [vmem:[%s8109_s17 + $0x10] sm:$0xff] %v4050_v24  ;;  %vm3562_vm1 = vweird.f32 %v3435_v17 }
 0x415   : > { %v3555_v52 = vsel %vm3554_vm14, %v4611_v13, %v3551_v25 }
 0x416   : > { %v3646_v40 = vmul.f32 %v3633_v55, %v3555_v52  ;;  %v3590_v38 = vmul.f32 %v3577_v34, %v3555_v52  ;;  %v3702_v14 = vmul.f32 %v3689_v9, %v3555_v52 }
 0x418   : > { %v3661_v51 = vmul.f32 %v4630_v10, %v3646_v40  ;;  %v3605_v62 = vmul.f32 %v4631_v31, %v3590_v38  ;;  %v3717_v41 = vmul.f32 %v4632_v43, %v3702_v14 }
 0x419   : > { %v3808_v54 = vpop.f32.mrf.mxu0  ;;  %v3903_v60 = vpop.f32.mrf.mxu1 }
 0x41a   : > { %v4613_v57 = vpop.eup %4612  ;;  %v3676_v49 = vadd.f32 %v4633_v26, %v3661_v51  ;;  %v3620_v42 = vadd.f32 %v4634_v39, %v3605_v62  ;;  %v3732_v1 = vadd.f32 %v4635_v22, %v3717_v41  ;;  %v3904_v36 = vadd.f32 %v3903_v60, %v3808_v54 }
 0x41b   : > { %v3557_v18 = vmul.f32 %v4613_v57, %v3435_v17  ;;  %vm3563_vm15 = vweird.f32 %v4613_v57 }
 0x41c   : > { %4344 = vmatmul.msk.f32.gmra.mxu0 %vm3045_vm10, %v3676_v49  ;;  %4357 = vmatmul.msk.f32.gmra.mxu1 %vm3045_vm10, %v3620_v42  ;;  %vm3564_vm2 = vmor %vm3562_vm1, %vm3563_vm15 }
 0x41d   : > { %v3558_v19 = vmul.f32 %v4613_v57, %v3557_v18  ;;  %4374 = vmatmul.msk.f32.gmra.mxu2 %vm3045_vm10, %v3732_v1 }
 0x41f   : > { %v3559_v61 = vmul.f32 0.5, %v3558_v19 }
 0x420   : > { %v4003_v53 = vpop.f32.mrf.mxu2 }
 0x421   : > { %v3560_v63 = vsub.f32 1.5, %v3559_v61  ;;  %v4036_v27 = vadd.f32 %v4003_v53, %v3904_v36 }
 0x423   : > { %v3561_v4 = vmul.f32 %v4613_v57, %v3560_v63  ;;  %v4051_v2 = vadd.f32 %v8100_v11, %v4036_v27 }
 0x425   : > { %4064 = vst [vmem:[%s8109_s17 + $0x18] sm:$0xff] %v4051_v2  ;;  %v3565_v59 = vsel %vm3564_vm2, %v4613_v57, %v3561_v4 }
 0x426   : > { %v3647_v23 = vmul.f32 %v3634_v6, %v3565_v59  ;;  %v3591_v21 = vmul.f32 %v3578_v3, %v3565_v59  ;;  %v3703_v15 = vmul.f32 %v3690_v12, %v3565_v59 }
 0x428   : > { %v3662_v13 = vmul.f32 %v4630_v10, %v3647_v23  ;;  %v3606_v37 = vmul.f32 %v4631_v31, %v3591_v21  ;;  %v3718_v45 = vmul.f32 %v4632_v43, %v3703_v15 }
 0x429   : > { %v3811_v5 = vpop.f32.mrf.mxu0  ;;  %v3906_v0 = vpop.f32.mrf.mxu1 }
 0x42a   : > { %v3677_v29 = vadd.f32 %v4633_v26, %v3662_v13  ;;  %v3621_v28 = vadd.f32 %v4634_v39, %v3606_v37  ;;  %v3733_v58 = vadd.f32 %v4635_v22, %v3718_v45  ;;  %v3907_v20 = vadd.f32 %v3906_v0, %v3811_v5 }
 0x42c   : > { %4345 = vmatmul.msk.f32.gmra.mxu0 %vm3045_vm10, %v3677_v29  ;;  %4358 = vmatmul.msk.f32.gmra.mxu1 %vm3045_vm10, %v3621_v28 }
 0x42d   : > { %4375 = vmatmul.msk.f32.gmra.mxu2 %vm3045_vm10, %v3733_v58 }
 0x430   : > { %v4006_v7 = vpop.f32.mrf.mxu2 }
 0x431   : > { %v4037_v46 = vadd.f32 %v4006_v7, %v3907_v20 }
 0x433   : > { %v4052_v8 = vadd.f32 %v8100_v11, %v4037_v46 }
 0x435   : > { %4065 = vst [vmem:[%s8109_s17 + $0x20] sm:$0xff] %v4052_v8 }
 0x436   : > { %4663 = shalt.err (!%p4660_p3)
}
 0x437   : > { %s4734_s28 = smov 128   ;;  %s4735_s16 = smov 8  }
 0x438   : > { %4419 = dma.vmem_to_hbm [thread:$0]  (%p4839_p5), %s4093_s30, 1664, %s4095_s23, %s4075_s26, %s4734_s28, %s4734_s28, %s4735_s16  }
 0x439   : > { %v3814_v16 = vpop.f32.mrf.mxu0  ;;  %v3909_v33 = vpop.f32.mrf.mxu1  ;;  %s4108_s3 = scalar_lea.hbm %s8284_s12, %s4380_s0  ;;  %s4109_s4 = sshll.u32 %s8109_s17, 4  ;;  %s4110_s4 = int_to_ptr.vmem [resolvable:$true] %s4109_s4 }
 0x43a   : > { %v3910_v48 = vadd.f32 %v3909_v33, %v3814_v16  ;;  %s4111_s30 = sshll.u32 %s4108_s3, 4  ;;  %s4080_s15 = scalar_lea.sflag [#allocation5], %s6404_s29  ;;  %s4112_s30 = int_to_ptr.hbm [resolvable:$true] %s4111_s30 }
 0x43b   : > { %s4678_s23 = sshra.s32 %s4112_s30, 4  ;;  %s4684_s18 = scalar_lea.hbm %s8284_s12, 208  ;;  %s4679_s23 = int_to_ptr.hbm [resolvable:$true] %s4678_s23 }
 0x43c   : > { %s4680_s26 = scalar_lea.hbm %s4679_s23, 104  ;;  %p4685_p9 = scmp.lt.s32.totalorder %s4679_s23, %s8284_s12 }
 0x43d   : > { %p4681_p4 = scmp.ne.s32.totalorder %s4679_s23, %s4680_s26  ;;  %p4686_p10 = scmp.lt.s32.totalorder %s4684_s18, %s4680_s26 }
 0x43f   : > { %p4682_p7 = pnand %p4681_p4, %p4839_p5  ;;  %p4687_p11 = por %p4686_p10, %p4685_p9 }
 0x440   : > { %v4009_v47 = vpop.f32.mrf.mxu2 }
 0x441   : > { %v4038_v44 = vadd.f32 %v4009_v47, %v3910_v48  ;;  %p4683_p8 = pneg %p4682_p7 }
 0x443   : > { %v4053_v50 = vadd.f32 %v8100_v11, %v4038_v44  ;;  %p4688_p12 = pnand %p4687_p11, %p4683_p8 }
 0x445   : > { %4066 = vst [vmem:[%s8109_s17 + $0x28] sm:$0xff] %v4053_v50 }
 0x449   : > { %v3817_v56 = vpop.f32.mrf.mxu0  ;;  %v3912_v32 = vpop.f32.mrf.mxu1 }
 0x44a   : > { %v3913_v30 = vadd.f32 %v3912_v32, %v3817_v56 }
 0x450   : > { %v4012_v35 = vpop.f32.mrf.mxu2 }
 0x451   : > { %v4039_v17 = vadd.f32 %v4012_v35, %v3913_v30 }
 0x453   : > { %v4054_v25 = vadd.f32 %v8100_v11, %v4039_v17 }
 0x455   : > { %4067 = vst [vmem:[%s8109_s17 + $0x30] sm:$0xff] %v4054_v25 }
 0x459   : > { %v3820_v24 = vpop.f32.mrf.mxu0  ;;  %v3915_v55 = vpop.f32.mrf.mxu1 }
 0x45a   : > { %v3916_v34 = vadd.f32 %v3915_v55, %v3820_v24 }
 0x460   : > { %v4015_v9 = vpop.f32.mrf.mxu2 }
 0x461   : > { %v4040_v52 = vadd.f32 %v4015_v9, %v3916_v34 }
 0x463   : > { %v4055_v40 = vadd.f32 %v8100_v11, %v4040_v52 }
 0x465   : > { %4068 = vst [vmem:[%s8109_s17 + $0x38] sm:$0xff] %v4055_v40 }
 0x469   : > { %v3823_v38 = vpop.f32.mrf.mxu0  ;;  %v3918_v14 = vpop.f32.mrf.mxu1 }
 0x46a   : > { %v3919_v10 = vadd.f32 %v3918_v14, %v3823_v38 }
 0x470   : > { %v4018_v51 = vpop.f32.mrf.mxu2 }
 0x471   : > { %v4041_v31 = vadd.f32 %v4018_v51, %v3919_v10 }
 0x473   : > { %v4056_v62 = vadd.f32 %v8100_v11, %v4041_v31 }
 0x475   : > { %4069 = vst [vmem:[%s8109_s17 + $0x40] sm:$0xff] %v4056_v62 }
 0x479   : > { %v3826_v43 = vpop.f32.mrf.mxu0  ;;  %v3921_v41 = vpop.f32.mrf.mxu1 }
 0x47a   : > { %v3922_v57 = vadd.f32 %v3921_v41, %v3826_v43 }
 0x480   : > { %v4021_v26 = vpop.f32.mrf.mxu2 }
 0x481   : > { %v4042_v49 = vadd.f32 %v4021_v26, %v3922_v57 }
 0x483   : > { %v4057_v39 = vadd.f32 %v8100_v11, %v4042_v49 }
 0x485   : > { %4070 = vst [vmem:[%s8109_s17 + $0x48] sm:$0xff] %v4057_v39 }
 0x489   : > { %v3829_v42 = vpop.f32.mrf.mxu0  ;;  %v3924_v22 = vpop.f32.mrf.mxu1 }
 0x48a   : > { %v3925_v1 = vadd.f32 %v3924_v22, %v3829_v42 }
 0x490   : > { %v4024_v18 = vpop.f32.mrf.mxu2 }
 0x491   : > { %v4043_v54 = vadd.f32 %v4024_v18, %v3925_v1 }
 0x493   : > { %v4058_v60 = vadd.f32 %v8100_v11, %v4043_v54 }
 0x495   : > { %4071 = vst [vmem:[%s8109_s17 + $0x50] sm:$0xff] %v4058_v60 }
 0x499   : > { %v3832_v19 = vpop.f32.mrf.mxu0  ;;  %v3927_v61 = vpop.f32.mrf.mxu1 }
 0x49a   : > { %v3928_v36 = vadd.f32 %v3927_v61, %v3832_v19 }
 0x4a0   : > { %v4027_v53 = vpop.f32.mrf.mxu2 }
 0x4a1   : > { %v4044_v63 = vadd.f32 %v4027_v53, %v3928_v36 }
 0x4a3   : > { %v4059_v27 = vadd.f32 %v8100_v11, %v4044_v63 }
 0x4a5   : > { %4072 = vst [vmem:[%s8109_s17 + $0x58] sm:$0xff] %v4059_v27 }
 0x4a9   : > { %v3835_v4 = vpop.f32.mrf.mxu0  ;;  %v3930_v2 = vpop.f32.mrf.mxu1 }
 0x4aa   : > { %v3931_v6 = vadd.f32 %v3930_v2, %v3835_v4 }
 0x4b0   : > { %v4030_v3 = vpop.f32.mrf.mxu2 }
 0x4b1   : > { %v4045_v12 = vadd.f32 %v4030_v3, %v3931_v6 }
 0x4b3   : > { %v4060_v59 = vadd.f32 %v8100_v11, %v4045_v12 }
 0x4b5   : > { %4073 = vst [vmem:[%s8109_s17 + $0x60] sm:$0xff] %v4060_v59 }
 0x4b6   : > { %4691 = shalt.err (!%p4688_p12)
}
 0x4b7   : > { %4420 = dma.vmem_to_hbm [thread:$0]  (%p4839_p5), %s4110_s4, 1664, %s4112_s30, %s4080_s15, %s4734_s28, %s4734_s28, %s4735_s16  }
 0x4b8 PF: > { %p4430_p13 = scmp.ge.s32.totalorder %s4730_s24, 2  ;;  %s4126_s29 = sand.u32 1, %s4718_s21  }
 0x4b9   : > { %s4127_s17 = scalar_lea.sflag [#allocation3], %s4126_s29 }
 0x4ba   : > { %p4424_p0 = pnand %p4430_p13, %p4843_p6 }
 0x4bc   : > { %p4425_p1 = pneg %p4424_p0 }
 0x4be   : > { %4709 = dma.done.wait (%p4425_p1), %s4127_s17, 1664  }
 0x4bf   : > { %4711 = vsyncadd (%p4425_p1), %s4127_s17, 4294965632  ;;  %s4137_s1 = scalar_lea.sflag [#allocation5], %s4126_s29 }
 0x4c0   : > { %4713 = dma.done.wait (%p4425_p1), %s4137_s1, 1664  }
 0x4c1   : > { %4715 = vsyncadd (%p4425_p1), %s4137_s1, 4294965632  ;;  %s8523_s13 = sld [smem:[#allocation8_spill]]  ;;  %p26_p5 = scmp.ge.s32.totalorder %s4826_s27, 4  }
 0x4c2   : > { %s8524_s23 = sld [smem:[#allocation9_spill]]  ;;  %s8525_s21 = smov %s4722_s22 }
 0x4c3   : > { %s8527_s24 = smov %s4826_s27  ;;  %28 = sbr.rel (!%p26_p5) target bundleno = 11 (0xb), region = 124 }
 0x4c7   : > { %s8526_s22 = smov %s8523_s13 }
 0x4c8   :  { %4143 = vsyncpa [#allocation3], 1 }
 0x4c9   :  { %4145 = vsyncpa [#allocation3 + $0x1], 1 }
 0x4ca   :  { %4146 = vsyncpa [#allocation5], 1 }
 0x4cb   :  { %4148 = vsyncpa [#allocation5 + $0x1], 1 }

</bundles_post_ra>
